<compile_context>
chip_gen: v6e
topology: v6e:2x2x1
jax: 0.10.0
libtpu: 0.0.40
codegen_flags: <defaults>
</compile_context>

<pallas_src>
import jax
import jax.numpy as jnp
from jax.experimental import pallas as pl
from jax.experimental.pallas import tpu as pltpu

H, W, C_IN = 16, 16, 8          # input spatial / channels
HO, WO = H // 2, W // 2         # after MaxPool2d(2, 2)
C_MID, C_OUT = 12, 12           # conv channel counts
K1, K2 = 9 * C_IN, 9 * C_MID    # im2col contraction sizes
EPS = 1e-5
B_TILE = 8                      # images per grid step (capped at N)


def _elu(v):
    # ELU(alpha=1); clamp exp arg so the discarded positive branch can't overflow.
    return jnp.where(v > 0, v, jnp.exp(jnp.minimum(v, 0.0)) - 1.0)


def f2_kernel(x_ref, w1_ref, w2_ref, s1_ref, t1_ref, s2_ref, t2_ref,
              out_ref, pad1, pad2):
    b = x_ref.shape[0]

    # ---- refresh only the zero halo of the padded scratches (interior is fully
    #      overwritten below each step; full-buffer zeroing removed) ----
    pad1[:, 0, :, :] = jnp.zeros((b, WO + 2, C_IN), jnp.float32)
    pad1[:, HO + 1, :, :] = jnp.zeros((b, WO + 2, C_IN), jnp.float32)
    pad1[:, :, 0, :] = jnp.zeros((b, HO + 2, C_IN), jnp.float32)
    pad1[:, :, WO + 1, :] = jnp.zeros((b, HO + 2, C_IN), jnp.float32)
    pad2[:, 0, :, :] = jnp.zeros((b, WO + 2, C_MID), jnp.float32)
    pad2[:, HO + 1, :, :] = jnp.zeros((b, WO + 2, C_MID), jnp.float32)
    pad2[:, :, 0, :] = jnp.zeros((b, HO + 2, C_MID), jnp.float32)
    pad2[:, :, WO + 1, :] = jnp.zeros((b, HO + 2, C_MID), jnp.float32)

    # ---- MaxPool2d(2, 2): max over the 4 strided views of each 2x2 window ----
    p = jnp.maximum(
        jnp.maximum(x_ref[:, pl.ds(0, HO, 2), pl.ds(0, WO, 2), :],
                    x_ref[:, pl.ds(0, HO, 2), pl.ds(1, WO, 2), :]),
        jnp.maximum(x_ref[:, pl.ds(1, HO, 2), pl.ds(0, WO, 2), :],
                    x_ref[:, pl.ds(1, HO, 2), pl.ds(1, WO, 2), :]))  # (b,HO,WO,C_IN)

    # ---- BatchNorm2d(8) (folded scale/shift) + ELU ----
    y1 = _elu(p * s1_ref[...] + t1_ref[...])

    # ---- Conv2d(8 -> 12, 3x3, pad 1): im2col -> single MXU matmul ----
    pad1[:, 1:HO + 1, 1:WO + 1, :] = y1
    a1 = jnp.concatenate(
        [pad1[:, dh:dh + HO, dw:dw + WO, :]
         for dh in range(3) for dw in range(3)],
        axis=-1).reshape(b * HO * WO, K1)                          # (b*64, 72)
    h1 = jnp.dot(a1, w1_ref[...], preferred_element_type=jnp.float32)  # (b*64, 12)

    # ---- BatchNorm2d(12) + ELU ----
    y2 = _elu(h1 * s2_ref[...] + t2_ref[...])

    # ---- Conv2d(12 -> 12, 3x3, pad 1): im2col -> single MXU matmul ----
    pad2[:, 1:HO + 1, 1:WO + 1, :] = y2.reshape(b, HO, WO, C_MID)
    a2 = jnp.concatenate(
        [pad2[:, dh:dh + HO, dw:dw + WO, :]
         for dh in range(3) for dw in range(3)],
        axis=-1).reshape(b * HO * WO, K2)                          # (b*64, 108)
    o2 = jnp.dot(a2, w2_ref[...], preferred_element_type=jnp.float32)  # (b*64, 12)

    # ---- emit NCHW-ordered rows (b, C_OUT, HO*WO); wrapper reshape is free ----
    out_ref[...] = jnp.swapaxes(o2.reshape(b, HO * WO, C_OUT), 1, 2)


def f2_forward(x_nchw, params, b_tile=B_TILE):
    """x_nchw: (N, 8, 16, 16) float32 -> (N, 12, 8, 8) float32."""
    n = x_nchw.shape[0]
    b = min(b_tile, n)
    n_pad = pl.cdiv(n, b) * b

    x = x_nchw.astype(jnp.float32)
    if n_pad != n:
        x = jnp.pad(x, ((0, n_pad - n), (0, 0), (0, 0), (0, 0)))
    # TODO(synk): the one remaining wrapper-side layout op (see header comment).
    x = jnp.transpose(x, (0, 2, 3, 1))                    # NCHW -> NHWC (dense DMA)

    # Fold BatchNorm (eval mode) into per-channel scale/shift.
    inv1 = 1.0 / jnp.sqrt(params["v1"] + EPS)
    inv2 = 1.0 / jnp.sqrt(params["v2"] + EPS)
    s1 = (params["g1"] * inv1).reshape(1, C_IN)
    t1 = (params["b1"] - params["m1"] * params["g1"] * inv1).reshape(1, C_IN)
    s2 = (params["g2"] * inv2).reshape(1, C_MID)
    t2 = (params["b2"] - params["m2"] * params["g2"] * inv2).reshape(1, C_MID)

    # HWIO conv weights reshaped to im2col form (rows ordered (dh, dw, ci)).
    w1r = params["w1"].reshape(K1, C_MID).astype(jnp.float32)
    w2r = params["w2"].reshape(K2, C_OUT).astype(jnp.float32)

    out = pl.pallas_call(
        f2_kernel,
        out_shape=jax.ShapeDtypeStruct((n_pad, C_OUT, HO * WO), jnp.float32),
        grid_spec=pltpu.PrefetchScalarGridSpec(
            num_scalar_prefetch=0,
            grid=(n_pad // b,),
            in_specs=[
                pl.BlockSpec((b, H, W, C_IN), lambda i: (i, 0, 0, 0)),
                pl.BlockSpec((K1, C_MID), lambda i: (0, 0)),
                pl.BlockSpec((K2, C_OUT), lambda i: (0, 0)),
                pl.BlockSpec((1, C_IN), lambda i: (0, 0)),
                pl.BlockSpec((1, C_IN), lambda i: (0, 0)),
                pl.BlockSpec((1, C_MID), lambda i: (0, 0)),
                pl.BlockSpec((1, C_MID), lambda i: (0, 0)),
            ],
            out_specs=pl.BlockSpec((b, C_OUT, HO * WO), lambda i: (i, 0, 0)),
            scratch_shapes=[
                pltpu.VMEM((b, HO + 2, WO + 2, C_IN), jnp.float32),
                pltpu.VMEM((b, HO + 2, WO + 2, C_MID), jnp.float32),
            ],
        ),
        compiler_params=pltpu.CompilerParams(
            dimension_semantics=("parallel",),
            vmem_limit_bytes=32 * 1024 * 1024,
        ),
    )(x, w1r, w2r, s1, t1, s2, t2)

    # (n, 12, 64) rows are already in NCHW element order -> free reshape.
    return out[:n].reshape(n, C_OUT, HO, WO)


def f2_reference(x_nchw, p):
    """Pure-JAX reference with identical semantics (sanity check)."""
    x = jnp.transpose(x_nchw, (0, 2, 3, 1)).astype(jnp.float32)
    y = jax.lax.reduce_window(x, -jnp.inf, jax.lax.max,
                              (1, 2, 2, 1), (1, 2, 2, 1), "VALID")

    def bn(v, g, b, m, var):
        return (v - m) / jnp.sqrt(var + EPS) * g + b

    def elu(v):
        return jnp.where(v > 0, v, jnp.exp(jnp.minimum(v, 0.0)) - 1.0)

    y = elu(bn(y, p["g1"], p["b1"], p["m1"], p["v1"]))
    y = jax.lax.conv_general_dilated(y, p["w1"], (1, 1), "SAME",
                                     dimension_numbers=("NHWC", "HWIO", "NHWC"))
    y = elu(bn(y, p["g2"], p["b2"], p["m2"], p["v2"]))
    y = jax.lax.conv_general_dilated(y, p["w2"], (1, 1), "SAME",
                                     dimension_numbers=("NHWC", "HWIO", "NHWC"))
    return jnp.transpose(y, (0, 3, 1, 2))


if __name__ == "__main__":
    key = jax.random.PRNGKey(0)
    ks = jax.random.split(key, 11)

    # Input matching the PyTorch module's expectation: NCHW with 8 channels.
    x = jax.random.normal(ks[0], (2, C_IN, H, W), jnp.float32)

    params = dict(
        # Conv weights stored HWIO (PyTorch keeps them OIHW; values are synthetic).
        w1=jax.random.normal(ks[1], (3, 3, C_IN, C_MID), jnp.float32) * 0.1,
        w2=jax.random.normal(ks[2], (3, 3, C_MID, C_OUT), jnp.float32) * 0.1,
        # BatchNorm2d(8): gamma, beta, running_mean, running_var
        g1=jax.random.uniform(ks[3], (C_IN,), jnp.float32, 0.5, 1.5),
        b1=jax.random.normal(ks[4], (C_IN,), jnp.float32) * 0.1,
        m1=jax.random.normal(ks[5], (C_IN,), jnp.float32) * 0.1,
        v1=jax.random.uniform(ks[6], (C_IN,), jnp.float32, 0.5, 1.5),
        # BatchNorm2d(12)
        g2=jax.random.uniform(ks[7], (C_MID,), jnp.float32, 0.5, 1.5),
        b2=jax.random.normal(ks[8], (C_MID,), jnp.float32) * 0.1,
        m2=jax.random.normal(ks[9], (C_MID,), jnp.float32) * 0.1,
        v2=jax.random.uniform(ks[10], (C_MID,), jnp.float32, 0.5, 1.5),
    )

    out = jax.block_until_ready(f2_forward(x, params))
    assert out.shape == (2, C_OUT, HO, WO), out.shape

    ref = jax.block_until_ready(f2_reference(x, params))
    if not bool(jnp.allclose(out, ref, atol=1e-2, rtol=1e-2)):
        raise AssertionError("Pallas kernel output mismatch vs JAX reference")

    print("KERNEL_OK")
</pallas_src>

<mosaic_0001>
module attributes {stable_mosaic.version = 11 : i64} {
  func.func @f2_kernel(%arg0: i32, %arg1: memref<2x16x16x8xf32, #tpu.memory_space<vmem>>, %arg2: memref<72x12xf32, #tpu.memory_space<vmem>>, %arg3: memref<108x12xf32, #tpu.memory_space<vmem>>, %arg4: memref<1x8xf32, #tpu.memory_space<vmem>>, %arg5: memref<1x8xf32, #tpu.memory_space<vmem>>, %arg6: memref<1x12xf32, #tpu.memory_space<vmem>>, %arg7: memref<1x12xf32, #tpu.memory_space<vmem>>, %arg8: memref<2x12x64xf32, #tpu.memory_space<vmem>>, %arg9: memref<2x10x10x8xf32, #tpu.memory_space<vmem>>, %arg10: memref<2x10x10x12xf32, #tpu.memory_space<vmem>>) attributes {dimension_semantics = [#tpu.dimension_semantics<parallel>], iteration_bounds = array<i64: 1>, scalar_prefetch = 0 : i64, scratch_operands = 2 : i64, tpu.core_type = #tpu.core_type<tc>, window_params = [{transform_indices = @transform_0, window_bounds = array<i64: 2, 16, 16, 8>}, {pipeline_mode = #tpu.pipeline_mode<synchronous>, transform_indices = @transform_1, window_bounds = array<i64: 72, 12>}, {pipeline_mode = #tpu.pipeline_mode<synchronous>, transform_indices = @transform_2, window_bounds = array<i64: 108, 12>}, {pipeline_mode = #tpu.pipeline_mode<synchronous>, transform_indices = @transform_3, window_bounds = array<i64: 1, 8>}, {pipeline_mode = #tpu.pipeline_mode<synchronous>, transform_indices = @transform_4, window_bounds = array<i64: 1, 8>}, {pipeline_mode = #tpu.pipeline_mode<synchronous>, transform_indices = @transform_5, window_bounds = array<i64: 1, 12>}, {pipeline_mode = #tpu.pipeline_mode<synchronous>, transform_indices = @transform_6, window_bounds = array<i64: 1, 12>}, {transform_indices = @transform_7, window_bounds = array<i64: 2, 12, 64>}]} {
    %cst = arith.constant 0.000000e+00 : f32
    %0 = vector.broadcast %cst : f32 to vector<2x10x8xf32>
    %c0 = arith.constant 0 : index
    %c0_0 = arith.constant 0 : index
    %c0_1 = arith.constant 0 : index
    %c0_2 = arith.constant 0 : index
    %1 = vector.load %arg9[%c0, %c0_0, %c0_1, %c0_2] : memref<2x10x10x8xf32, #tpu.memory_space<vmem>>, vector<2x1x10x8xf32>
    %2 = vector.shape_cast %1 : vector<2x1x10x8xf32> to vector<2x10x8xf32>
    %3 = vector.shape_cast %0 : vector<2x10x8xf32> to vector<2x1x10x8xf32>
    tpu.vector_store %arg9[%c0, %c0_0, %c0_1, %c0_2], %3 {strides = array<i32>} : memref<2x10x10x8xf32, #tpu.memory_space<vmem>>, vector<2x1x10x8xf32>,
    %cst_3 = arith.constant 0.000000e+00 : f32
    %4 = vector.broadcast %cst_3 : f32 to vector<2x10x8xf32>
    %c0_4 = arith.constant 0 : index
    %c9 = arith.constant 9 : index
    %c0_5 = arith.constant 0 : index
    %c0_6 = arith.constant 0 : index
    %5 = vector.load %arg9[%c0_4, %c9, %c0_5, %c0_6] : memref<2x10x10x8xf32, #tpu.memory_space<vmem>>, vector<2x1x10x8xf32>
    %6 = vector.shape_cast %5 : vector<2x1x10x8xf32> to vector<2x10x8xf32>
    %7 = vector.shape_cast %4 : vector<2x10x8xf32> to vector<2x1x10x8xf32>
    tpu.vector_store %arg9[%c0_4, %c9, %c0_5, %c0_6], %7 {strides = array<i32>} : memref<2x10x10x8xf32, #tpu.memory_space<vmem>>, vector<2x1x10x8xf32>,
    %cst_7 = arith.constant 0.000000e+00 : f32
    %8 = vector.broadcast %cst_7 : f32 to vector<2x10x8xf32>
    %c0_8 = arith.constant 0 : index
    %c0_9 = arith.constant 0 : index
    %c0_10 = arith.constant 0 : index
    %c0_11 = arith.constant 0 : index
    %9 = vector.load %arg9[%c0_8, %c0_9, %c0_10, %c0_11] : memref<2x10x10x8xf32, #tpu.memory_space<vmem>>, vector<2x10x1x8xf32>
    %10 = vector.shape_cast %9 : vector<2x10x1x8xf32> to vector<2x10x8xf32>
    %11 = vector.shape_cast %8 : vector<2x10x8xf32> to vector<2x10x1x8xf32>
    tpu.vector_store %arg9[%c0_8, %c0_9, %c0_10, %c0_11], %11 {strides = array<i32>} : memref<2x10x10x8xf32, #tpu.memory_space<vmem>>, vector<2x10x1x8xf32>,
    %cst_12 = arith.constant 0.000000e+00 : f32
    %12 = vector.broadcast %cst_12 : f32 to vector<2x10x8xf32>
    %c0_13 = arith.constant 0 : index
    %c0_14 = arith.constant 0 : index
    %c9_15 = arith.constant 9 : index
    %c0_16 = arith.constant 0 : index
    %13 = vector.load %arg9[%c0_13, %c0_14, %c9_15, %c0_16] : memref<2x10x10x8xf32, #tpu.memory_space<vmem>>, vector<2x10x1x8xf32>
    %14 = vector.shape_cast %13 : vector<2x10x1x8xf32> to vector<2x10x8xf32>
    %15 = vector.shape_cast %12 : vector<2x10x8xf32> to vector<2x10x1x8xf32>
    tpu.vector_store %arg9[%c0_13, %c0_14, %c9_15, %c0_16], %15 {strides = array<i32>} : memref<2x10x10x8xf32, #tpu.memory_space<vmem>>, vector<2x10x1x8xf32>,
    %cst_17 = arith.constant 0.000000e+00 : f32
    %16 = vector.broadcast %cst_17 : f32 to vector<2x10x12xf32>
    %c0_18 = arith.constant 0 : index
    %c0_19 = arith.constant 0 : index
    %c0_20 = arith.constant 0 : index
    %c0_21 = arith.constant 0 : index
    %17 = vector.load %arg10[%c0_18, %c0_19, %c0_20, %c0_21] : memref<2x10x10x12xf32, #tpu.memory_space<vmem>>, vector<2x1x10x12xf32>
    %18 = vector.shape_cast %17 : vector<2x1x10x12xf32> to vector<2x10x12xf32>
    %19 = vector.shape_cast %16 : vector<2x10x12xf32> to vector<2x1x10x12xf32>
    tpu.vector_store %arg10[%c0_18, %c0_19, %c0_20, %c0_21], %19 {strides = array<i32>} : memref<2x10x10x12xf32, #tpu.memory_space<vmem>>, vector<2x1x10x12xf32>,
    %cst_22 = arith.constant 0.000000e+00 : f32
    %20 = vector.broadcast %cst_22 : f32 to vector<2x10x12xf32>
    %c0_23 = arith.constant 0 : index
    %c9_24 = arith.constant 9 : index
    %c0_25 = arith.constant 0 : index
    %c0_26 = arith.constant 0 : index
    %21 = vector.load %arg10[%c0_23, %c9_24, %c0_25, %c0_26] : memref<2x10x10x12xf32, #tpu.memory_space<vmem>>, vector<2x1x10x12xf32>
    %22 = vector.shape_cast %21 : vector<2x1x10x12xf32> to vector<2x10x12xf32>
    %23 = vector.shape_cast %20 : vector<2x10x12xf32> to vector<2x1x10x12xf32>
    tpu.vector_store %arg10[%c0_23, %c9_24, %c0_25, %c0_26], %23 {strides = array<i32>} : memref<2x10x10x12xf32, #tpu.memory_space<vmem>>, vector<2x1x10x12xf32>,
    %cst_27 = arith.constant 0.000000e+00 : f32
    %24 = vector.broadcast %cst_27 : f32 to vector<2x10x12xf32>
    %c0_28 = arith.constant 0 : index
    %c0_29 = arith.constant 0 : index
    %c0_30 = arith.constant 0 : index
    %c0_31 = arith.constant 0 : index
    %25 = vector.load %arg10[%c0_28, %c0_29, %c0_30, %c0_31] : memref<2x10x10x12xf32, #tpu.memory_space<vmem>>, vector<2x10x1x12xf32>
    %26 = vector.shape_cast %25 : vector<2x10x1x12xf32> to vector<2x10x12xf32>
    %27 = vector.shape_cast %24 : vector<2x10x12xf32> to vector<2x10x1x12xf32>
    tpu.vector_store %arg10[%c0_28, %c0_29, %c0_30, %c0_31], %27 {strides = array<i32>} : memref<2x10x10x12xf32, #tpu.memory_space<vmem>>, vector<2x10x1x12xf32>,
    %cst_32 = arith.constant 0.000000e+00 : f32
    %28 = vector.broadcast %cst_32 : f32 to vector<2x10x12xf32>
    %c0_33 = arith.constant 0 : index
    %c0_34 = arith.constant 0 : index
    %c9_35 = arith.constant 9 : index
    %c0_36 = arith.constant 0 : index
    %29 = vector.load %arg10[%c0_33, %c0_34, %c9_35, %c0_36] : memref<2x10x10x12xf32, #tpu.memory_space<vmem>>, vector<2x10x1x12xf32>
    %30 = vector.shape_cast %29 : vector<2x10x1x12xf32> to vector<2x10x12xf32>
    %31 = vector.shape_cast %28 : vector<2x10x12xf32> to vector<2x10x1x12xf32>
    tpu.vector_store %arg10[%c0_33, %c0_34, %c9_35, %c0_36], %31 {strides = array<i32>} : memref<2x10x10x12xf32, #tpu.memory_space<vmem>>, vector<2x10x1x12xf32>,
    %c0_37 = arith.constant 0 : index
    %c0_38 = arith.constant 0 : index
    %c0_39 = arith.constant 0 : index
    %c0_40 = arith.constant 0 : index
    %32 = tpu.strided_load %arg1[%c0_37, %c0_38, %c0_39, %c0_40] {strides = array<i32: 1, 2, 2, 1>} : memref<2x16x16x8xf32, #tpu.memory_space<vmem>>, vector<2x8x8x8xf32>
    %c0_41 = arith.constant 0 : index
    %c0_42 = arith.constant 0 : index
    %c1 = arith.constant 1 : index
    %c0_43 = arith.constant 0 : index
    %33 = tpu.strided_load %arg1[%c0_41, %c0_42, %c1, %c0_43] {strides = array<i32: 1, 2, 2, 1>} : memref<2x16x16x8xf32, #tpu.memory_space<vmem>>, vector<2x8x8x8xf32>
    %34 = arith.maximumf %32, %33 : vector<2x8x8x8xf32>
    %c0_44 = arith.constant 0 : index
    %c1_45 = arith.constant 1 : index
    %c0_46 = arith.constant 0 : index
    %c0_47 = arith.constant 0 : index
    %35 = tpu.strided_load %arg1[%c0_44, %c1_45, %c0_46, %c0_47] {strides = array<i32: 1, 2, 2, 1>} : memref<2x16x16x8xf32, #tpu.memory_space<vmem>>, vector<2x8x8x8xf32>
    %c0_48 = arith.constant 0 : index
    %c1_49 = arith.constant 1 : index
    %c1_50 = arith.constant 1 : index
    %c0_51 = arith.constant 0 : index
    %36 = tpu.strided_load %arg1[%c0_48, %c1_49, %c1_50, %c0_51] {strides = array<i32: 1, 2, 2, 1>} : memref<2x16x16x8xf32, #tpu.memory_space<vmem>>, vector<2x8x8x8xf32>
    %37 = arith.maximumf %35, %36 : vector<2x8x8x8xf32>
    %38 = arith.maximumf %34, %37 : vector<2x8x8x8xf32>
    %c0_52 = arith.constant 0 : index
    %c0_53 = arith.constant 0 : index
    %39 = vector.load %arg4[%c0_52, %c0_53] : memref<1x8xf32, #tpu.memory_space<vmem>>, vector<1x8xf32>
    %40 = vector.shape_cast %39 : vector<1x8xf32> to vector<1x1x1x8xf32>
    %41 = vector.broadcast %40 : vector<1x1x1x8xf32> to vector<2x8x8x8xf32>
    %42 = arith.mulf %38, %41 : vector<2x8x8x8xf32>
    %c0_54 = arith.constant 0 : index
    %c0_55 = arith.constant 0 : index
    %43 = vector.load %arg5[%c0_54, %c0_55] : memref<1x8xf32, #tpu.memory_space<vmem>>, vector<1x8xf32>
    %44 = vector.shape_cast %43 : vector<1x8xf32> to vector<1x1x1x8xf32>
    %45 = vector.broadcast %44 : vector<1x1x1x8xf32> to vector<2x8x8x8xf32>
    %46 = arith.addf %42, %45 : vector<2x8x8x8xf32>
    %cst_56 = arith.constant 0.000000e+00 : f32
    %47 = vector.broadcast %cst_56 : f32 to vector<2x8x8x8xf32>
    %48 = arith.cmpf ogt, %46, %47 : vector<2x8x8x8xf32>
    %cst_57 = arith.constant 0.000000e+00 : f32
    %49 = vector.broadcast %cst_57 : f32 to vector<2x8x8x8xf32>
    %50 = arith.minimumf %46, %49 : vector<2x8x8x8xf32>
    %51 = math.exp %50 : vector<2x8x8x8xf32>
    %cst_58 = arith.constant 1.000000e+00 : f32
    %52 = vector.broadcast %cst_58 : f32 to vector<2x8x8x8xf32>
    %53 = arith.subf %51, %52 : vector<2x8x8x8xf32>
    %54 = arith.select %48, %46, %53 : vector<2x8x8x8xi1>, vector<2x8x8x8xf32>
    %c0_59 = arith.constant 0 : index
    %c1_60 = arith.constant 1 : index
    %c1_61 = arith.constant 1 : index
    %c0_62 = arith.constant 0 : index
    %55 = vector.load %arg9[%c0_59, %c1_60, %c1_61, %c0_62] : memref<2x10x10x8xf32, #tpu.memory_space<vmem>>, vector<2x8x8x8xf32>
    tpu.vector_store %arg9[%c0_59, %c1_60, %c1_61, %c0_62], %54 {strides = array<i32>} : memref<2x10x10x8xf32, #tpu.memory_space<vmem>>, vector<2x8x8x8xf32>,
    %c0_63 = arith.constant 0 : index
    %c0_64 = arith.constant 0 : index
    %c0_65 = arith.constant 0 : index
    %c0_66 = arith.constant 0 : index
    %56 = vector.load %arg9[%c0_63, %c0_64, %c0_65, %c0_66] : memref<2x10x10x8xf32, #tpu.memory_space<vmem>>, vector<2x8x8x8xf32>
    %c0_67 = arith.constant 0 : index
    %c0_68 = arith.constant 0 : index
    %c1_69 = arith.constant 1 : index
    %c0_70 = arith.constant 0 : index
    %57 = vector.load %arg9[%c0_67, %c0_68, %c1_69, %c0_70] : memref<2x10x10x8xf32, #tpu.memory_space<vmem>>, vector<2x8x8x8xf32>
    %c0_71 = arith.constant 0 : index
    %c0_72 = arith.constant 0 : index
    %c2 = arith.constant 2 : index
    %c0_73 = arith.constant 0 : index
    %58 = vector.load %arg9[%c0_71, %c0_72, %c2, %c0_73] : memref<2x10x10x8xf32, #tpu.memory_space<vmem>>, vector<2x8x8x8xf32>
    %c0_74 = arith.constant 0 : index
    %c1_75 = arith.constant 1 : index
    %c0_76 = arith.constant 0 : index
    %c0_77 = arith.constant 0 : index
    %59 = vector.load %arg9[%c0_74, %c1_75, %c0_76, %c0_77] : memref<2x10x10x8xf32, #tpu.memory_space<vmem>>, vector<2x8x8x8xf32>
    %c0_78 = arith.constant 0 : index
    %c1_79 = arith.constant 1 : index
    %c1_80 = arith.constant 1 : index
    %c0_81 = arith.constant 0 : index
    %60 = vector.load %arg9[%c0_78, %c1_79, %c1_80, %c0_81] : memref<2x10x10x8xf32, #tpu.memory_space<vmem>>, vector<2x8x8x8xf32>
    %c0_82 = arith.constant 0 : index
    %c1_83 = arith.constant 1 : index
    %c2_84 = arith.constant 2 : index
    %c0_85 = arith.constant 0 : index
    %61 = vector.load %arg9[%c0_82, %c1_83, %c2_84, %c0_85] : memref<2x10x10x8xf32, #tpu.memory_space<vmem>>, vector<2x8x8x8xf32>
    %c0_86 = arith.constant 0 : index
    %c2_87 = arith.constant 2 : index
    %c0_88 = arith.constant 0 : index
    %c0_89 = arith.constant 0 : index
    %62 = vector.load %arg9[%c0_86, %c2_87, %c0_88, %c0_89] : memref<2x10x10x8xf32, #tpu.memory_space<vmem>>, vector<2x8x8x8xf32>
    %c0_90 = arith.constant 0 : index
    %c2_91 = arith.constant 2 : index
    %c1_92 = arith.constant 1 : index
    %c0_93 = arith.constant 0 : index
    %63 = vector.load %arg9[%c0_90, %c2_91, %c1_92, %c0_93] : memref<2x10x10x8xf32, #tpu.memory_space<vmem>>, vector<2x8x8x8xf32>
    %c0_94 = arith.constant 0 : index
    %c2_95 = arith.constant 2 : index
    %c2_96 = arith.constant 2 : index
    %c0_97 = arith.constant 0 : index
    %64 = vector.load %arg9[%c0_94, %c2_95, %c2_96, %c0_97] : memref<2x10x10x8xf32, #tpu.memory_space<vmem>>, vector<2x8x8x8xf32>
    %65 = tpu.concatenate %56, %57, %58, %59, %60, %61, %62, %63, %64 in 3 : vector<2x8x8x8xf32>, vector<2x8x8x8xf32>, vector<2x8x8x8xf32>, vector<2x8x8x8xf32>, vector<2x8x8x8xf32>, vector<2x8x8x8xf32>, vector<2x8x8x8xf32>, vector<2x8x8x8xf32>, vector<2x8x8x8xf32> -> vector<2x8x8x72xf32>
    %66 = vector.shape_cast %65 : vector<2x8x8x72xf32> to vector<128x72xf32>
    %c0_98 = arith.constant 0 : index
    %c0_99 = arith.constant 0 : index
    %67 = vector.load %arg2[%c0_98, %c0_99] : memref<72x12xf32, #tpu.memory_space<vmem>>, vector<72x12xf32>
    %cst_100 = arith.constant dense<0.000000e+00> : vector<128x12xf32>
    %68 = tpu.matmul %66, %67, %cst_100 {dimension_numbers = #tpu.dot_dimension_numbers<[1], [0], [0], [1], [0, 0, 1, 1], [], []>} : vector<128x72xf32>, vector<72x12xf32>, vector<128x12xf32> -> vector<128x12xf32>
    %c0_101 = arith.constant 0 : index
    %c0_102 = arith.constant 0 : index
    %69 = vector.load %arg6[%c0_101, %c0_102] : memref<1x12xf32, #tpu.memory_space<vmem>>, vector<1x12xf32>
    %70 = vector.broadcast %69 : vector<1x12xf32> to vector<128x12xf32>
    %71 = arith.mulf %68, %70 : vector<128x12xf32>
    %c0_103 = arith.constant 0 : index
    %c0_104 = arith.constant 0 : index
    %72 = vector.load %arg7[%c0_103, %c0_104] : memref<1x12xf32, #tpu.memory_space<vmem>>, vector<1x12xf32>
    %73 = vector.broadcast %72 : vector<1x12xf32> to vector<128x12xf32>
    %74 = arith.addf %71, %73 : vector<128x12xf32>
    %cst_105 = arith.constant 0.000000e+00 : f32
    %75 = vector.broadcast %cst_105 : f32 to vector<128x12xf32>
    %76 = arith.cmpf ogt, %74, %75 : vector<128x12xf32>
    %cst_106 = arith.constant 0.000000e+00 : f32
    %77 = vector.broadcast %cst_106 : f32 to vector<128x12xf32>
    %78 = arith.minimumf %74, %77 : vector<128x12xf32>
    %79 = math.exp %78 : vector<128x12xf32>
    %cst_107 = arith.constant 1.000000e+00 : f32
    %80 = vector.broadcast %cst_107 : f32 to vector<128x12xf32>
    %81 = arith.subf %79, %80 : vector<128x12xf32>
    %82 = arith.select %76, %74, %81 : vector<128x12xi1>, vector<128x12xf32>
    %83 = vector.shape_cast %82 : vector<128x12xf32> to vector<2x8x8x12xf32>
    %c0_108 = arith.constant 0 : index
    %c1_109 = arith.constant 1 : index
    %c1_110 = arith.constant 1 : index
    %c0_111 = arith.constant 0 : index
    %84 = vector.load %arg10[%c0_108, %c1_109, %c1_110, %c0_111] : memref<2x10x10x12xf32, #tpu.memory_space<vmem>>, vector<2x8x8x12xf32>
    tpu.vector_store %arg10[%c0_108, %c1_109, %c1_110, %c0_111], %83 {strides = array<i32>} : memref<2x10x10x12xf32, #tpu.memory_space<vmem>>, vector<2x8x8x12xf32>,
    %c0_112 = arith.constant 0 : index
    %c0_113 = arith.constant 0 : index
    %c0_114 = arith.constant 0 : index
    %c0_115 = arith.constant 0 : index
    %85 = vector.load %arg10[%c0_112, %c0_113, %c0_114, %c0_115] : memref<2x10x10x12xf32, #tpu.memory_space<vmem>>, vector<2x8x8x12xf32>
    %c0_116 = arith.constant 0 : index
    %c0_117 = arith.constant 0 : index
    %c1_118 = arith.constant 1 : index
    %c0_119 = arith.constant 0 : index
    %86 = vector.load %arg10[%c0_116, %c0_117, %c1_118, %c0_119] : memref<2x10x10x12xf32, #tpu.memory_space<vmem>>, vector<2x8x8x12xf32>
    %c0_120 = arith.constant 0 : index
    %c0_121 = arith.constant 0 : index
    %c2_122 = arith.constant 2 : index
    %c0_123 = arith.constant 0 : index
    %87 = vector.load %arg10[%c0_120, %c0_121, %c2_122, %c0_123] : memref<2x10x10x12xf32, #tpu.memory_space<vmem>>, vector<2x8x8x12xf32>
    %c0_124 = arith.constant 0 : index
    %c1_125 = arith.constant 1 : index
    %c0_126 = arith.constant 0 : index
    %c0_127 = arith.constant 0 : index
    %88 = vector.load %arg10[%c0_124, %c1_125, %c0_126, %c0_127] : memref<2x10x10x12xf32, #tpu.memory_space<vmem>>, vector<2x8x8x12xf32>
    %c0_128 = arith.constant 0 : index
    %c1_129 = arith.constant 1 : index
    %c1_130 = arith.constant 1 : index
    %c0_131 = arith.constant 0 : index
    %89 = vector.load %arg10[%c0_128, %c1_129, %c1_130, %c0_131] : memref<2x10x10x12xf32, #tpu.memory_space<vmem>>, vector<2x8x8x12xf32>
    %c0_132 = arith.constant 0 : index
    %c1_133 = arith.constant 1 : index
    %c2_134 = arith.constant 2 : index
    %c0_135 = arith.constant 0 : index
    %90 = vector.load %arg10[%c0_132, %c1_133, %c2_134, %c0_135] : memref<2x10x10x12xf32, #tpu.memory_space<vmem>>, vector<2x8x8x12xf32>
    %c0_136 = arith.constant 0 : index
    %c2_137 = arith.constant 2 : index
    %c0_138 = arith.constant 0 : index
    %c0_139 = arith.constant 0 : index
    %91 = vector.load %arg10[%c0_136, %c2_137, %c0_138, %c0_139] : memref<2x10x10x12xf32, #tpu.memory_space<vmem>>, vector<2x8x8x12xf32>
    %c0_140 = arith.constant 0 : index
    %c2_141 = arith.constant 2 : index
    %c1_142 = arith.constant 1 : index
    %c0_143 = arith.constant 0 : index
    %92 = vector.load %arg10[%c0_140, %c2_141, %c1_142, %c0_143] : memref<2x10x10x12xf32, #tpu.memory_space<vmem>>, vector<2x8x8x12xf32>
    %c0_144 = arith.constant 0 : index
    %c2_145 = arith.constant 2 : index
    %c2_146 = arith.constant 2 : index
    %c0_147 = arith.constant 0 : index
    %93 = vector.load %arg10[%c0_144, %c2_145, %c2_146, %c0_147] : memref<2x10x10x12xf32, #tpu.memory_space<vmem>>, vector<2x8x8x12xf32>
    %94 = tpu.concatenate %85, %86, %87, %88, %89, %90, %91, %92, %93 in 3 : vector<2x8x8x12xf32>, vector<2x8x8x12xf32>, vector<2x8x8x12xf32>, vector<2x8x8x12xf32>, vector<2x8x8x12xf32>, vector<2x8x8x12xf32>, vector<2x8x8x12xf32>, vector<2x8x8x12xf32>, vector<2x8x8x12xf32> -> vector<2x8x8x108xf32>
    %95 = vector.shape_cast %94 : vector<2x8x8x108xf32> to vector<128x108xf32>
    %c0_148 = arith.constant 0 : index
    %c0_149 = arith.constant 0 : index
    %96 = vector.load %arg3[%c0_148, %c0_149] : memref<108x12xf32, #tpu.memory_space<vmem>>, vector<108x12xf32>
    %cst_150 = arith.constant dense<0.000000e+00> : vector<128x12xf32>
    %97 = tpu.matmul %95, %96, %cst_150 {dimension_numbers = #tpu.dot_dimension_numbers<[1], [0], [0], [1], [0, 0, 1, 1], [], []>} : vector<128x108xf32>, vector<108x12xf32>, vector<128x12xf32> -> vector<128x12xf32>
    %98 = vector.shape_cast %97 : vector<128x12xf32> to vector<2x64x12xf32>
    %99 = tpu.transpose %98, [0, 2, 1] : vector<2x64x12xf32> -> vector<2x12x64xf32>
    %c0_151 = arith.constant 0 : index
    %c0_152 = arith.constant 0 : index
    %c0_153 = arith.constant 0 : index
    %100 = vector.load %arg8[%c0_151, %c0_152, %c0_153] : memref<2x12x64xf32, #tpu.memory_space<vmem>>, vector<2x12x64xf32>
    tpu.vector_store %arg8[%c0_151, %c0_152, %c0_153], %99 {strides = array<i32>} : memref<2x12x64xf32, #tpu.memory_space<vmem>>, vector<2x12x64xf32>,
    return
  }
  func.func @transform_0(%arg0: i32) -> (i32, i32, i32, i32) {
    %c0_i32 = arith.constant 0 : i32
    %c0_i32_0 = arith.constant 0 : i32
    %c0_i32_1 = arith.constant 0 : i32
    %c0_i32_2 = arith.constant 0 : i32
    return %arg0, %c0_i32, %c0_i32_0, %c0_i32_1 : i32, i32, i32, i32
  }
  func.func @transform_1(%arg0: i32) -> (i32, i32) {
    %c0_i32 = arith.constant 0 : i32
    %c0_i32_0 = arith.constant 0 : i32
    %c0_i32_1 = arith.constant 0 : i32
    return %c0_i32, %c0_i32_0 : i32, i32
  }
  func.func @transform_2(%arg0: i32) -> (i32, i32) {
    %c0_i32 = arith.constant 0 : i32
    %c0_i32_0 = arith.constant 0 : i32
    %c0_i32_1 = arith.constant 0 : i32
    return %c0_i32, %c0_i32_0 : i32, i32
  }
  func.func @transform_3(%arg0: i32) -> (i32, i32) {
    %c0_i32 = arith.constant 0 : i32
    %c0_i32_0 = arith.constant 0 : i32
    %c0_i32_1 = arith.constant 0 : i32
    return %c0_i32, %c0_i32_0 : i32, i32
  }
  func.func @transform_4(%arg0: i32) -> (i32, i32) {
    %c0_i32 = arith.constant 0 : i32
    %c0_i32_0 = arith.constant 0 : i32
    %c0_i32_1 = arith.constant 0 : i32
    return %c0_i32, %c0_i32_0 : i32, i32
  }
  func.func @transform_5(%arg0: i32) -> (i32, i32) {
    %c0_i32 = arith.constant 0 : i32
    %c0_i32_0 = arith.constant 0 : i32
    %c0_i32_1 = arith.constant 0 : i32
    return %c0_i32, %c0_i32_0 : i32, i32
  }
  func.func @transform_6(%arg0: i32) -> (i32, i32) {
    %c0_i32 = arith.constant 0 : i32
    %c0_i32_0 = arith.constant 0 : i32
    %c0_i32_1 = arith.constant 0 : i32
    return %c0_i32, %c0_i32_0 : i32, i32
  }
  func.func @transform_7(%arg0: i32) -> (i32, i32, i32) {
    %c0_i32 = arith.constant 0 : i32
    %c0_i32_0 = arith.constant 0 : i32
    %c0_i32_1 = arith.constant 0 : i32
    return %arg0, %c0_i32, %c0_i32_0 : i32, i32, i32
  }
}

</mosaic_0001>

<bundles_post_ra>
// kernel: tpu_custom_call.1
= control target key start
LH: loop header
LB: loop body
LE: loop exit
PB: predicated region body
PF: predicated region fallthrough
CT: control target
= control target key end

     0   :  { %vm26_vm0 = vcmask 64512   ;;  %vm28_vm1 = vcmask 58368   ;;  %vm37_vm2 = vcmask 57344   ;;  %v3112_v0 = vmov 0.0   ;;  %s3113_s16 = smov 8   ;;  %s3114_s21 = smov 16   ;;  %s4799_s0 = inlined_call_operand.vmem [shape: f32[2,16,16,8], index: 0, kind: input, shape index: {}]   ;;  %s4800_s3 = inlined_call_operand.vmem [shape: f32[1,8], index: 3, kind: input, shape index: {}]   ;;  %s4801_s4 = inlined_call_operand.vmem [shape: f32[1,8], index: 4, kind: input, shape index: {}]   ;;  %s4802_s1 = inlined_call_operand.vmem [shape: f32[72,12], index: 1, kind: input, shape index: {}]   ;;  %s4803_s5 = inlined_call_operand.vmem [shape: f32[1,12], index: 5, kind: input, shape index: {}]   ;;  %s4804_s6 = inlined_call_operand.vmem [shape: f32[1,12], index: 6, kind: input, shape index: {}]   ;;  %s4805_s2 = inlined_call_operand.vmem [shape: f32[108,12], index: 2, kind: input, shape index: {}]   ;;  %s4806_s7 = inlined_call_operand.vmem [shape: f32[2,12,64], index: 7, kind: output, shape index: {}]  }
   0x1   :  { %27 = vst.msk [vmem:[#allocation2] sm:$0xff] %vm26_vm0, %v3112_v0  ;;  %30 = vst.msk [vmem:[#allocation2 + $0xa0] sm:$0xff] %vm26_vm0, %v3112_v0  ;;  %v130_v1 = vld [vmem:[%s4799_s0] ss:$2 sm:$0xff]  ;;  %v2738_v2 = vld [vmem:[%s4799_s0 + $0x1] ss:$2 sm:$0xff] }
   0x2   :  { %29 = vst.msk [vmem:[#allocation2 + $0x8] sm:$0x3] %vm28_vm1, %v3112_v0  ;;  %31 = vst.msk [vmem:[#allocation2 + $0xa8] sm:$0x3] %vm28_vm1, %v3112_v0  ;;  %v2754_v3 = vld [vmem:[%s4799_s0 + $0x10] ss:$2 sm:$0xff]  ;;  %v193_v4 = vmax.f32 %v130_v1, %v2738_v2 }
   0x3   :  { %33 = vst.msk [vmem:[#allocation2 + $0x90] sm:$0xff] %vm26_vm0, %v3112_v0  ;;  %35 = vst.msk [vmem:[#allocation2 + $0x130] sm:$0xff] %vm26_vm0, %v3112_v0  ;;  %v2770_v5 = vld [vmem:[%s4799_s0 + $0x11] ss:$2 sm:$0xff]  ;;  %v2723_v7 = vld [vmem:[%s4799_s0 + $0x20] ss:$2 sm:$0xff] }
   0x4   :  { %34 = vst.msk [vmem:[#allocation2 + $0x98] sm:$0x3] %vm28_vm1, %v3112_v0  ;;  %36 = vst.msk [vmem:[#allocation2 + $0x138] sm:$0x3] %vm28_vm1, %v3112_v0  ;;  %v273_v6 = vmax.f32 %v2754_v3, %v2770_v5  ;;  %v2739_v8 = vld [vmem:[%s4799_s0 + $0x21] ss:$2 sm:$0xff] }
   0x5   :  { %39 = vst.msk [vmem:[#allocation2 + $0x10] sm:$0x1] %vm37_vm2, %v3112_v0  ;;  %40 = vst.msk [vmem:[#allocation2 + $0x20] sm:$0x1] %vm37_vm2, %v3112_v0  ;;  %v2755_v9 = vld [vmem:[%s4799_s0 + $0x30] ss:$2 sm:$0xff]  ;;  %v194_v11 = vmax.f32 %v2723_v7, %v2739_v8 }
   0x6   :  { %41 = vst.msk [vmem:[#allocation2 + $0x30] sm:$0x1] %vm37_vm2, %v3112_v0  ;;  %42 = vst.msk [vmem:[#allocation2 + $0x40] sm:$0x1] %vm37_vm2, %v3112_v0  ;;  %v3283_v10 = vld [vmem:[%s4800_s3] ss:$0 sm:$0xff]  ;;  %v289_v14 = vmax.f32 %v193_v4, %v273_v6 }
   0x7   :  { %43 = vst.msk [vmem:[#allocation2 + $0x50] sm:$0x1] %vm37_vm2, %v3112_v0  ;;  %44 = vst.msk [vmem:[#allocation2 + $0x60] sm:$0x1] %vm37_vm2, %v3112_v0  ;;  %v2771_v12 = vld [vmem:[%s4799_s0 + $0x31] ss:$2 sm:$0xff] }
   0x8   :  { %45 = vst.msk [vmem:[#allocation2 + $0x70] sm:$0x1] %vm37_vm2, %v3112_v0  ;;  %46 = vst.msk [vmem:[#allocation2 + $0x80] sm:$0x1] %vm37_vm2, %v3112_v0  ;;  %v2724_v13 = vld [vmem:[%s4799_s0 + $0x40] ss:$2 sm:$0xff]  ;;  %v274_v15 = vmax.f32 %v2755_v9, %v2771_v12  ;;  %v312_v22 = vmul.f32 %v3283_v10, %v289_v14 }
   0x9   :  { %49 = vst.msk [vmem:[#allocation2 + $0xb0] sm:$0x1] %vm37_vm2, %v3112_v0  ;;  %50 = vst.msk [vmem:[#allocation2 + $0xc0] sm:$0x1] %vm37_vm2, %v3112_v0  ;;  %v2740_v16 = vld [vmem:[%s4799_s0 + $0x41] ss:$2 sm:$0xff] }
   0xa   :  { %51 = vst.msk [vmem:[#allocation2 + $0xd0] sm:$0x1] %vm37_vm2, %v3112_v0  ;;  %52 = vst.msk [vmem:[#allocation2 + $0xe0] sm:$0x1] %vm37_vm2, %v3112_v0  ;;  %v2756_v17 = vld [vmem:[%s4799_s0 + $0x50] ss:$2 sm:$0xff]  ;;  %v195_v19 = vmax.f32 %v2724_v13, %v2740_v16  ;;  %v290_v23 = vmax.f32 %v194_v11, %v274_v15 }
   0xb   :  { %53 = vst.msk [vmem:[#allocation2 + $0xf0] sm:$0x1] %vm37_vm2, %v3112_v0  ;;  %54 = vst.msk [vmem:[#allocation2 + $0x100] sm:$0x1] %vm37_vm2, %v3112_v0  ;;  %v3300_v18 = vld [vmem:[%s4801_s4] ss:$0 sm:$0xff] }
   0xc   :  { %55 = vst.msk [vmem:[#allocation2 + $0x110] sm:$0x1] %vm37_vm2, %v3112_v0  ;;  %56 = vst.msk [vmem:[#allocation2 + $0x120] sm:$0x1] %vm37_vm2, %v3112_v0  ;;  %v2772_v20 = vld [vmem:[%s4799_s0 + $0x51] ss:$2 sm:$0xff]  ;;  %v3326_v34 = vadd.f32 %v3300_v18, %v312_v22  ;;  %v313_v35 = vmul.f32 %v3283_v10, %v290_v23 }
   0xd   :  { %59 = vst.msk [vmem:[#allocation2 + $0x19] sm:$0x1] %vm37_vm2, %v3112_v0  ;;  %60 = vst.msk [vmem:[#allocation2 + $0x29] sm:$0x1] %vm37_vm2, %v3112_v0  ;;  %v2725_v21 = vld [vmem:[%s4799_s0 + $0x60] ss:$2 sm:$0xff]  ;;  %v275_v24 = vmax.f32 %v2756_v17, %v2772_v20 }
   0xe   :  { %61 = vst.msk [vmem:[#allocation2 + $0x39] sm:$0x1] %vm37_vm2, %v3112_v0  ;;  %62 = vst.msk [vmem:[#allocation2 + $0x49] sm:$0x1] %vm37_vm2, %v3112_v0  ;;  %v2741_v25 = vld [vmem:[%s4799_s0 + $0x61] ss:$2 sm:$0xff]  ;;  %v3347_v46 = vadd.f32 %v3300_v18, %v313_v35 }
   0xf   :  { %63 = vst.msk [vmem:[#allocation2 + $0x59] sm:$0x1] %vm37_vm2, %v3112_v0  ;;  %64 = vst.msk [vmem:[#allocation2 + $0x69] sm:$0x1] %vm37_vm2, %v3112_v0  ;;  %v2757_v26 = vld [vmem:[%s4799_s0 + $0x70] ss:$2 sm:$0xff]  ;;  %v196_v29 = vmax.f32 %v2725_v21, %v2741_v25  ;;  %v291_v36 = vmax.f32 %v195_v19, %v275_v24 }
  0x10   :  { %65 = vst.msk [vmem:[#allocation2 + $0x79] sm:$0x1] %vm37_vm2, %v3112_v0  ;;  %66 = vst.msk [vmem:[#allocation2 + $0x89] sm:$0x1] %vm37_vm2, %v3112_v0  ;;  %v2773_v27 = vld [vmem:[%s4799_s0 + $0x71] ss:$2 sm:$0xff] }
  0x11   :  { %69 = vst.msk [vmem:[#allocation2 + $0xb9] sm:$0x1] %vm37_vm2, %v3112_v0  ;;  %70 = vst.msk [vmem:[#allocation2 + $0xc9] sm:$0x1] %vm37_vm2, %v3112_v0  ;;  %v480_v28 = vld [vmem:[#allocation2 + $0x1] sm:$0xff]  ;;  %v276_v30 = vmax.f32 %v2757_v26, %v2773_v27  ;;  %v367_v45 = vmin.f32 %v3326_v34, 0.0  ;;  %v314_v47 = vmul.f32 %v3283_v10, %v291_v36 }
  0x12   :  { %71 = vst.msk [vmem:[#allocation2 + $0xd9] sm:$0x1] %vm37_vm2, %v3112_v0  ;;  %72 = vst.msk [vmem:[#allocation2 + $0xe9] sm:$0x1] %vm37_vm2, %v3112_v0  ;;  %v2726_v31 = vld [vmem:[%s4799_s0 + $0x80] ss:$2 sm:$0xff]  ;;  %625 = vrot.lane.b32.xlu0 %v480_v28, %s3113_s16 }
  0x13   :  { %73 = vst.msk [vmem:[#allocation2 + $0xf9] sm:$0x1] %vm37_vm2, %v3112_v0  ;;  %74 = vst.msk [vmem:[#allocation2 + $0x109] sm:$0x1] %vm37_vm2, %v3112_v0  ;;  %v2742_v32 = vld [vmem:[%s4799_s0 + $0x81] ss:$2 sm:$0xff]  ;;  %v292_v40 = vmax.f32 %v196_v29, %v276_v30  ;;  %v3365_v58 = vadd.f32 %v3300_v18, %v314_v47 }
  0x14   :  { %75 = vst.msk [vmem:[#allocation2 + $0x119] sm:$0x1] %vm37_vm2, %v3112_v0  ;;  %76 = vst.msk [vmem:[#allocation2 + $0x129] sm:$0x1] %vm37_vm2, %v3112_v0  ;;  %v197_v37 = vmax.f32 %v2726_v31, %v2742_v32  ;;  %v2758_v38 = vld [vmem:[%s4799_s0 + $0x90] ss:$2 sm:$0xff] }
  0x15   :  { %58 = vst.msk [vmem:[#allocation2 + $0x9] sm:$0x1] %vm37_vm2, %v3112_v0  ;;  %38 = vst.msk [vmem:[#allocation2] sm:$0x1] %vm37_vm2, %v3112_v0  ;;  %v2774_v39 = vld [vmem:[%s4799_s0 + $0x91] ss:$2 sm:$0xff]  ;;  %v315_v49 = vmul.f32 %v3283_v10, %v292_v40 }
  0x16   :  { %47 = vst.msk [vmem:[#allocation2 + $0x90] sm:$0x1] %vm37_vm2, %v3112_v0  ;;  %48 = vst.msk [vmem:[#allocation2 + $0xa0] sm:$0x1] %vm37_vm2, %v3112_v0  ;;  %v277_v41 = vmax.f32 %v2758_v38, %v2774_v39  ;;  %v2727_v42 = vld [vmem:[%s4799_s0 + $0xa0] ss:$2 sm:$0xff] }
  0x17   :  { %57 = vst.msk [vmem:[#allocation2 + $0x130] sm:$0x1] %vm37_vm2, %v3112_v0  ;;  %67 = vst.msk [vmem:[#allocation2 + $0x99] sm:$0x1] %vm37_vm2, %v3112_v0  ;;  %v2743_v43 = vld [vmem:[%s4799_s0 + $0xa1] ss:$2 sm:$0xff]  ;;  %v3371_v60 = vadd.f32 %v3300_v18, %v315_v49 }
  0x18   :  { %68 = vst.msk [vmem:[#allocation2 + $0xa9] sm:$0x1] %vm37_vm2, %v3112_v0  ;;  %77 = vst.msk [vmem:[#allocation2 + $0x139] sm:$0x1] %vm37_vm2, %v3112_v0  ;;  %v2759_v44 = vld [vmem:[%s4799_s0 + $0xb0] ss:$2 sm:$0xff]  ;;  %v293_v50 = vmax.f32 %v197_v37, %v277_v41  ;;  %v198_v51 = vmax.f32 %v2727_v42, %v2743_v43 }
  0x19   :  { %v2775_v48 = vld [vmem:[%s4799_s0 + $0xb1] ss:$2 sm:$0xff]  ;;  %v2728_v53 = vld [vmem:[%s4799_s0 + $0xc0] ss:$2 sm:$0xff]  ;;  %v2744_v54 = vld [vmem:[%s4799_s0 + $0xc1] ss:$2 sm:$0xff] }
  0x1a   :  { %v278_v52 = vmax.f32 %v2759_v44, %v2775_v48  ;;  %v2760_v55 = vld [vmem:[%s4799_s0 + $0xd0] ss:$2 sm:$0xff]  ;;  %v383_v56 = vmul.f32 1.442695, %v367_v45  ;;  %v368_v57 = vmin.f32 %v3347_v46, 0.0  ;;  %v316_v61 = vmul.f32 %v3283_v10, %v293_v50  ;;  %s3115_s8 = smov 24  }
  0x1b   :  { %v2776_v59 = vld [vmem:[%s4799_s0 + $0xd1] ss:$2 sm:$0xff]  ;;  %v2729_v63 = vld [vmem:[%s4799_s0 + $0xe0] ss:$2 sm:$0xff]  ;;  %v2745_v1 = vld [vmem:[%s4799_s0 + $0xe1] ss:$2 sm:$0xff]  ;;  %v199_v5 = vmax.f32 %v2728_v53, %v2744_v54 }
  0x1c   :  { %v496_v33 = vld [vmem:[#allocation2 + $0x2] sm:$0xff]  ;;  %v294_v62 = vmax.f32 %v198_v51, %v278_v52  ;;  %v2761_v2 = vld [vmem:[%s4799_s0 + $0xf0] ss:$2 sm:$0xff]  ;;  %3047 = vpow2.f32 %v383_v56  ;;  %v385_v3 = vmul.f32 1.442695, %v368_v57  ;;  %v369_v4 = vmin.f32 %v3365_v58, 0.0 }
  0x1d   :  { %689 = vrot.lane.b32.xlu1 %v496_v33, %s3114_s21  ;;  %v2777_v6 = vld [vmem:[%s4799_s0 + $0xf1] ss:$2 sm:$0xff]  ;;  %v370_v7 = vmin.f32 %v3371_v60, 0.0  ;;  %v3389_v8 = vadd.f32 %v3300_v18, %v316_v61  ;;  %v2730_v11 = vld [vmem:[%s4799_s0 + $0x100] ss:$2 sm:$0xff]  ;;  %v279_v14 = vmax.f32 %v2760_v55, %v2776_v59  ;;  %v200_v15 = vmax.f32 %v2729_v63, %v2745_v1  ;;  %s3116_s9 = smov 32  }
  0x1e   :  { %v317_v9 = vmul.f32 %v3283_v10, %v294_v62  ;;  %v2746_v12 = vld [vmem:[%s4799_s0 + $0x101] ss:$2 sm:$0xff]  ;;  %3049 = vpow2.f32 %v385_v3  ;;  %v387_v13 = vmul.f32 1.442695, %v369_v4  ;;  %v2762_v16 = vld [vmem:[%s4799_s0 + $0x110] ss:$2 sm:$0xff]  ;;  %v280_v24 = vmax.f32 %v2761_v2, %v2777_v6 }
  0x1f   :  { %v2778_v17 = vld [vmem:[%s4799_s0 + $0x111] ss:$2 sm:$0xff]  ;;  %v389_v19 = vmul.f32 1.442695, %v370_v7  ;;  %v371_v20 = vmin.f32 %v3389_v8, 0.0  ;;  %v295_v23 = vmax.f32 %v199_v5, %v279_v14  ;;  %v201_v25 = vmax.f32 %v2730_v11, %v2746_v12  ;;  %s3117_s13 = smov 40  }
  0x20   :  { %v3406_v21 = vadd.f32 %v3300_v18, %v317_v9  ;;  %v2731_v22 = vld [vmem:[%s4799_s0 + $0x120] ss:$2 sm:$0xff]  ;;  %3051 = vpow2.f32 %v387_v13  ;;  %v2747_v26 = vld [vmem:[%s4799_s0 + $0x121] ss:$2 sm:$0xff]  ;;  %v2763_v27 = vld [vmem:[%s4799_s0 + $0x130] ss:$2 sm:$0xff]  ;;  %v296_v32 = vmax.f32 %v200_v15, %v280_v24  ;;  %v281_v33 = vmax.f32 %v2762_v16, %v2778_v17 }
  0x21   :  { %v2779_v28 = vld [vmem:[%s4799_s0 + $0x131] ss:$2 sm:$0xff]  ;;  %3053 = vpow2.f32 %v389_v19  ;;  %v391_v29 = vmul.f32 1.442695, %v371_v20  ;;  %v318_v31 = vmul.f32 %v3283_v10, %v295_v23  ;;  %v2732_v35 = vld [vmem:[%s4799_s0 + $0x140] ss:$2 sm:$0xff]  ;;  %v202_v38 = vmax.f32 %v2731_v22, %v2747_v26 }
  0x22   :  { %v372_v30 = vmin.f32 %v3406_v21, 0.0  ;;  %v2748_v36 = vld [vmem:[%s4799_s0 + $0x141] ss:$2 sm:$0xff]  ;;  %v282_v39 = vmax.f32 %v2763_v27, %v2779_v28  ;;  %v2764_v40 = vld [vmem:[%s4799_s0 + $0x150] ss:$2 sm:$0xff]  ;;  %v319_v43 = vmul.f32 %v3283_v10, %v296_v32  ;;  %v297_v44 = vmax.f32 %v201_v25, %v281_v33  ;;  %s3118_s25 = smov 48  }
  0x23   :  { %3055 = vpow2.f32 %v391_v29  ;;  %v2780_v41 = vld [vmem:[%s4799_s0 + $0x151] ss:$2 sm:$0xff]  ;;  %v3435_v42 = vadd.f32 %v3300_v18, %v318_v31  ;;  %v203_v45 = vmax.f32 %v2732_v35, %v2748_v36  ;;  %vm351_vm3 = vcmp.gt.f32.partialorder %v3326_v34, 0.0  ;;  %v2733_v20 = vld [vmem:[%s4799_s0 + $0x160] ss:$2 sm:$0xff]  ;;  %s3119_s15 = smov 56  }
  0x24   :  { %v393_v37 = vmul.f32 1.442695, %v372_v30  ;;  %v298_v47 = vmax.f32 %v202_v38, %v282_v39  ;;  %v283_v48 = vmax.f32 %v2764_v40, %v2780_v41  ;;  %v3440_v50 = vadd.f32 %v3300_v18, %v319_v43  ;;  %v2781_v24 = vld [vmem:[%s4799_s0 + $0x171] ss:$2 sm:$0xff]  ;;  %s3120_s28 = smov 64  }
  0x25   :  { %v373_v49 = vmin.f32 %v3435_v42, 0.0  ;;  %v320_v51 = vmul.f32 %v3283_v10, %v297_v44  ;;  %vm352_vm4 = vcmp.gt.f32.partialorder %v3347_v46, 0.0  ;;  %vm353_vm5 = vcmp.gt.f32.partialorder %v3365_v58, 0.0 }
  0x26   :  { %3057 = vpow2.f32 %v393_v37  ;;  %v321_v52 = vmul.f32 %v3283_v10, %v298_v47  ;;  %v299_v53 = vmax.f32 %v203_v45, %v283_v48  ;;  %v374_v55 = vmin.f32 %v3440_v50, 0.0 }
  0x27   :  { %v395_v54 = vmul.f32 1.442695, %v373_v49  ;;  %v3446_v56 = vadd.f32 %v3300_v18, %v320_v51  ;;  %vm354_vm6 = vcmp.gt.f32.partialorder %v3371_v60, 0.0  ;;  %vm355_vm7 = vcmp.gt.f32.partialorder %v3389_v8, 0.0 }
  0x28   :  { %v3450_v59 = vadd.f32 %v3300_v18, %v321_v52  ;;  %v322_v61 = vmul.f32 %v3283_v10, %v299_v53  ;;  %v397_v63 = vmul.f32 1.442695, %v374_v55  ;;  %vm356_vm8 = vcmp.gt.f32.partialorder %v3406_v21, 0.0  ;;  %v2750_v55 = vld [vmem:[%s4799_s0 + $0x181] ss:$2 sm:$0xff] }
  0x29   :  { %v3048_v57 = vpop.eup %3047  ;;  %3059 = vpow2.f32 %v395_v54  ;;  %v375_v2 = vmin.f32 %v3446_v56, 0.0  ;;  %vm357_vm9 = vcmp.gt.f32.partialorder %v3435_v42, 0.0  ;;  %vm358_vm10 = vcmp.gt.f32.partialorder %v3440_v50, 0.0  ;;  %v2734_v54 = vld [vmem:[%s4799_s0 + $0x180] ss:$2 sm:$0xff] }
  0x2a   :  { %v2788_v62 = vadd.f32 -1.0, %v3048_v57  ;;  %v376_v3 = vmin.f32 %v3450_v59, 0.0  ;;  %v3457_v4 = vadd.f32 %v3300_v18, %v322_v61  ;;  %3061 = vpow2.f32 %v397_v63  ;;  %v2782_v61 = vld [vmem:[%s4799_s0 + $0x191] ss:$2 sm:$0xff] }
  0x2b   :  { %v3050_v1 = vpop.eup %3049  ;;  %v399_v9 = vmul.f32 1.442695, %v375_v2  ;;  %vm359_vm11 = vcmp.gt.f32.partialorder %v3446_v56, 0.0  ;;  %vm360_vm12 = vcmp.gt.f32.partialorder %v3450_v59, 0.0  ;;  %v205_v57 = vmax.f32 %v2734_v54, %v2750_v55  ;;  %v1264_v2 = vld [vmem:[%s4802_s1 + $0x40] sm:$0xff] }
  0x2c   :  { %v431_v5 = vsel %vm351_vm3, %v3326_v34, %v2788_v62  ;;  %v2789_v6 = vadd.f32 -1.0, %v3050_v1  ;;  %v401_v11 = vmul.f32 1.442695, %v376_v3  ;;  %v377_v12 = vmin.f32 %v3457_v4, 0.0  ;;  %2910 = vmatprep.subr.mxu0 %v1264_v2 }
  0x2d   :  { %v3052_v7 = vpop.eup %3051  ;;  %448 = vst.msk [vmem:[#allocation2 + $0x11] sm:$0xff] %vm26_vm0, %v431_v5  ;;  %3063 = vpow2.f32 %v399_v9  ;;  %vm361_vm13 = vcmp.gt.f32.partialorder %v3457_v4, 0.0  ;;  %2911 = vmatpush3.msra.mxu0 %v1264_v2  ;;  %v1261_v9 = vld [vmem:[%s4802_s1 + $0x28] sm:$0xff] }
  0x2e   :  { %v3054_v13 = vpop.eup %3053  ;;  %v432_v14 = vsel %vm352_vm4, %v3347_v46, %v2789_v6  ;;  %v2790_v15 = vadd.f32 -1.0, %v3052_v7  ;;  %v403_v16 = vmul.f32 1.442695, %v377_v12  ;;  %3065 = vpow2.f32 %v401_v11  ;;  %v2749_v46 = vld [vmem:[%s4799_s0 + $0x161] ss:$2 sm:$0xff]  ;;  %v1262_v6 = vld [vmem:[%s4802_s1 + $0x30] sm:$0xff] }
  0x2f   :  { %449 = vst.msk [vmem:[#allocation2 + $0x21] sm:$0xff] %vm26_vm0, %v432_v14  ;;  %v2791_v34 = vadd.f32 -1.0, %v3054_v13  ;;  %v204_v26 = vmax.f32 %v2733_v20, %v2749_v46  ;;  %v2735_v20 = vld [vmem:[%s4799_s0 + $0x1a0] ss:$2 sm:$0xff]  ;;  %v2751_v46 = vld [vmem:[%s4799_s0 + $0x1a1] ss:$2 sm:$0xff] }
  0x30   :  { %v3056_v17 = vpop.eup %3055  ;;  %v433_v19 = vsel %vm353_vm5, %v3365_v58, %v2790_v15  ;;  %3067 = vpow2.f32 %v403_v16  ;;  %v2765_v58 = vld [vmem:[%s4799_s0 + $0x170] ss:$2 sm:$0xff]  ;;  %v1260_v15 = vld [vmem:[%s4802_s1 + $0x20] sm:$0xff]  ;;  %vm1137_vm4 = vcmask 130048   ;;  %vm1154_vm5 = vcmask 195584  }
  0x31   :  { %450 = vst.msk [vmem:[#allocation2 + $0x31] sm:$0xff] %vm26_vm0, %v433_v19  ;;  %v434_v22 = vsel %vm354_vm6, %v3371_v60, %v2791_v34  ;;  %v2792_v23 = vadd.f32 -1.0, %v3056_v17  ;;  %v284_v27 = vmax.f32 %v2765_v58, %v2781_v24  ;;  %v1259_v19 = vld [vmem:[%s4802_s1 + $0x18] sm:$0xff]  ;;  %vm1171_vm6 = vcmask 261120  }
  0x32   :  { %451 = vst.msk [vmem:[#allocation2 + $0x41] sm:$0xff] %vm26_vm0, %v434_v22  ;;  %v1258_v22 = vld [vmem:[%s4802_s1 + $0x10] sm:$0xff] }
  0x33   :  { %v3058_v25 = vpop.eup %3057  ;;  %v435_v28 = vsel %vm355_vm7, %v3389_v8, %v2792_v23  ;;  %v300_v31 = vmax.f32 %v204_v26, %v284_v27  ;;  %v206_v23 = vmax.f32 %v2735_v20, %v2751_v46  ;;  %v2767_v58 = vld [vmem:[%s4799_s0 + $0x1b0] ss:$2 sm:$0xff]  ;;  %v1257_v27 = vld [vmem:[%s4802_s1 + $0x8] sm:$0xff]  ;;  %vm1188_vm7 = vcmask 326656  }
  0x34   :  { %v2793_v60 = vadd.f32 -1.0, %v3058_v25  ;;  %v497_v29 = vld [vmem:[#allocation2 + $0x12] sm:$0xff]  ;;  %452 = vst.msk [vmem:[#allocation2 + $0x51] sm:$0xff] %vm26_vm0, %v435_v28 }
  0x35   :  { %v481_v30 = vld [vmem:[#allocation2 + $0x11] sm:$0xff]  ;;  %691 = vrot.lane.b32.xlu1 %v497_v29, %s3114_s21  ;;  %v323_v8 = vmul.f32 %v3283_v10, %v300_v31 }
  0x36   :  { %627 = vrot.lane.b32.xlu0 %v481_v30, %s3113_s16  ;;  %v436_v32 = vsel %vm356_vm8, %v3406_v21, %v2793_v60  ;;  %v3489_v33 = vld [vmem:[#allocation2 + $0x20] sm:$0xff]  ;;  %v3491_v35 = vld [vmem:[#allocation2 + $0x10] sm:$0xff]  ;;  %v3060_v36 = vpop.eup %3059  ;;  %vm1205_vm8 = vcmask 392192  }
  0x37   :  { %453 = vst.msk [vmem:[#allocation2 + $0x61] sm:$0xff] %vm26_vm0, %v436_v32  ;;  %v2794_v37 = vadd.f32 -1.0, %v3060_v36  ;;  %v3497_v38 = vadd.f32 %v3300_v18, %v323_v8  ;;  %v3062_v39 = vpop.eup %3061  ;;  %v3504_v21 = vld [vmem:[#allocation2 + $0x21] sm:$0xff]  ;;  %v2783_v25 = vld [vmem:[%s4799_s0 + $0x1b1] ss:$2 sm:$0xff] }
  0x38   :  { %v2795_v41 = vadd.f32 -1.0, %v3062_v39  ;;  %v3537_v62 = vld [vmem:[#allocation2 + $0x22] sm:$0xff]  ;;  %v3539_v63 = vld [vmem:[#allocation2 + $0x31] sm:$0xff]  ;;  %v286_v26 = vmax.f32 %v2767_v58, %v2783_v25 }
  0x39   :  { %755 = vrot.lane.b32.xlu1 %v3489_v33, %s3115_s8  ;;  %v437_v40 = vsel %vm357_vm9, %v3435_v42, %v2794_v37  ;;  %v378_v43 = vmin.f32 %v3497_v38, 0.0  ;;  %v3566_v11 = vld [vmem:[#allocation2 + $0x30] sm:$0xff]  ;;  %vm362_vm14 = vcmp.gt.f32.partialorder %v3497_v38, 0.0  ;;  %v3597_v24 = vld [vmem:[#allocation2 + $0x40] sm:$0xff]  ;;  %vm1222_vm9 = vcmask 457728  }
  0x3a   :  { %753 = vrot.lane.b32.xlu0 %v3491_v35, %s3115_s8  ;;  %454 = vst.msk [vmem:[#allocation2 + $0x71] sm:$0xff] %vm26_vm0, %v437_v40  ;;  %v3064_v44 = vpop.eup %3063  ;;  %v438_v45 = vsel %vm358_vm10, %v3440_v50, %v2795_v41  ;;  %v499_v12 = vld [vmem:[#allocation2 + $0x32] sm:$0xff]  ;;  %v302_v28 = vmax.f32 %v206_v23, %v286_v26  ;;  %v1256_v60 = vld [vmem:[%s4802_s1] sm:$0xff]  ;;  %vm1239_vm10 = vcmask 523264  }
  0x3b   :  { %v405_v47 = vmul.f32 1.442695, %v378_v43  ;;  %v3066_v48 = vpop.eup %3065  ;;  %455 = vst.msk [vmem:[#allocation2 + $0x81] sm:$0xff] %vm26_vm0, %v438_v45  ;;  %v2796_v42 = vadd.f32 -1.0, %v3064_v44  ;;  %v531_v31 = vld [vmem:[#allocation2 + $0x41] sm:$0xff]  ;;  %v485_v45 = vld [vmem:[#allocation2 + $0x51] sm:$0xff] }
  0x3c   :  { %v2797_v51 = vadd.f32 -1.0, %v3066_v48  ;;  %v2736_v39 = vld [vmem:[%s4799_s0 + $0x1c0] ss:$2 sm:$0xff]  ;;  %v2768_v40 = vld [vmem:[%s4799_s0 + $0x1d0] ss:$2 sm:$0xff] }
  0x3d   :  { %629 = vrot.lane.b32.xlu1 %v3504_v21, %s3113_s16  ;;  %v3068_v49 = vpop.eup %3067  ;;  %3069 = vpow2.f32 %v405_v47  ;;  %v439_v50 = vsel %vm359_vm11, %v3446_v56, %v2796_v42  ;;  %v2784_v43 = vld [vmem:[%s4799_s0 + $0x1d1] ss:$2 sm:$0xff]  ;;  %v500_v44 = vld [vmem:[#allocation2 + $0x42] sm:$0xff]  ;;  %vm1265_vm11 = vcmask 588800  }
  0x3e   :  { %817 = vrot.lane.b32.xlu0 %v481_v30, %s3116_s9  ;;  %v2798_v52 = vadd.f32 -1.0, %v3068_v49  ;;  %456 = vst.msk [vmem:[#allocation2 + $0xb1] sm:$0xff] %vm26_vm0, %v439_v50  ;;  %v440_v53 = vsel %vm360_vm12, %v3450_v59, %v2797_v51  ;;  %v2766_v59 = vld [vmem:[%s4799_s0 + $0x190] ss:$2 sm:$0xff]  ;;  %v287_v47 = vmax.f32 %v2768_v40, %v2784_v43  ;;  %v504_v25 = vld [vmem:[#allocation2 + $0xa2] sm:$0xff]  ;;  %vm78_vm12 = vcmask 97280  }
  0x3f   :  { %457 = vst.msk [vmem:[#allocation2 + $0xc1] sm:$0xff] %vm26_vm0, %v440_v53  ;;  %v285_v1 = vmax.f32 %v2766_v59, %v2782_v61  ;;  %v3644_v51 = vld [vmem:[#allocation2 + $0x50] sm:$0xff]  ;;  %v2753_v59 = vld [vmem:[%s4799_s0 + $0x1e1] ss:$2 sm:$0xff] }
  0x40   :  { %v441_v56 = vsel %vm361_vm13, %v3457_v4, %v2798_v52  ;;  %v1263_v4 = vld [vmem:[%s4802_s1 + $0x38] sm:$0xff]  ;;  %79 = vst.msk [vmem:[#allocation3] sm:$0xff] %vm78_vm12, %v3112_v0  ;;  %82 = vst.msk [vmem:[#allocation3 + $0xa0] sm:$0xff] %vm78_vm12, %v3112_v0  ;;  %vm80_vm13 = vcmask 91136  }
  0x41   :  { %881 = vrot.lane.b32.xlu1 %v497_v29, %s3117_s13  ;;  %458 = vst.msk [vmem:[#allocation2 + $0xd1] sm:$0xff] %vm26_vm0, %v441_v56  ;;  %v301_v3 = vmax.f32 %v205_v57, %v285_v1  ;;  %2912 = vmatprep.subr.mxu0 %v1263_v4  ;;  %v325_v29 = vmul.f32 %v3283_v10, %v302_v28  ;;  %v501_v50 = vld [vmem:[#allocation2 + $0x52] sm:$0xff]  ;;  %v2737_v57 = vld [vmem:[%s4799_s0 + $0x1e0] ss:$2 sm:$0xff] }
  0x42   :  { %819 = vrot.lane.b32.xlu0 %v3504_v21, %s3116_s9  ;;  %2913 = vmatpush3.msra.mxu0 %v1263_v4  ;;  %v2769_v61 = vld [vmem:[%s4799_s0 + $0x1f0] ss:$2 sm:$0xff]  ;;  %v3665_v1 = vld [vmem:[#allocation2 + $0x60] sm:$0xff]  ;;  %85 = vst.msk [vmem:[#allocation3 + $0x90] sm:$0xff] %vm78_vm12, %v3112_v0  ;;  %87 = vst.msk [vmem:[#allocation3 + $0x130] sm:$0xff] %vm78_vm12, %v3112_v0 }
  0x43   :  { %v324_v5 = vmul.f32 %v3283_v10, %v301_v3  ;;  %2914 = vmatprep.subr.mxu0 %v1262_v6  ;;  %v348_v30 = vadd.f32 %v3300_v18, %v325_v29  ;;  %v519_v20 = vld [vmem:[#allocation2 + $0x80] sm:$0xff]  ;;  %v584_v40 = vld [vmem:[#allocation2 + $0x91] sm:$0xff]  ;;  %83 = vst.msk [vmem:[#allocation3 + $0xa8] sm:$0x3] %vm80_vm13, %v3112_v0  ;;  %81 = vst.msk [vmem:[#allocation3 + $0x8] sm:$0x3] %vm80_vm13, %v3112_v0 }
  0x44   :  { %2915 = vmatpush3.msra.mxu0 %v1262_v6  ;;  %v533_v6 = vld [vmem:[#allocation2 + $0x61] sm:$0xff]  ;;  %86 = vst.msk [vmem:[#allocation3 + $0x98] sm:$0x3] %vm80_vm13, %v3112_v0  ;;  %88 = vst.msk [vmem:[#allocation3 + $0x138] sm:$0x3] %vm80_vm13, %v3112_v0 }
  0x45   :  { %693 = vrot.lane.b32.xlu1 %v3537_v62, %s3114_s21  ;;  %v3557_v7 = vadd.f32 %v3300_v18, %v324_v5  ;;  %2916 = vmatprep.subr.mxu0 %v1261_v9  ;;  %v380_v32 = vmin.f32 %v348_v30, 0.0  ;;  %vm364_vm1 = vcmp.gt.f32.partialorder %v348_v30, 0.0  ;;  %v535_v46 = vld [vmem:[#allocation2 + $0x81] sm:$0xff]  ;;  %v489_v26 = vld [vmem:[#allocation2 + $0xb1] sm:$0xff] }
  0x46   :  { %631 = vrot.lane.b32.xlu0 %v3539_v63, %s3113_s16  ;;  %2917 = vmatpush3.msra.mxu0 %v1261_v9  ;;  %v3707_v29 = vld [vmem:[#allocation2 + $0xb0] sm:$0xff] }
  0x47   :  { %v379_v13 = vmin.f32 %v3557_v7, 0.0  ;;  %2918 = vmatprep.subr.mxu0 %v1260_v15  ;;  %vm363_vm15 = vcmp.gt.f32.partialorder %v3557_v7, 0.0  ;;  %v409_v37 = vmul.f32 1.442695, %v380_v32 }
  0x48   :  { %2919 = vmatpush3.msra.mxu0 %v1260_v15  ;;  %v3684_v15 = vld [vmem:[#allocation2 + $0x70] sm:$0xff] }
  0x49   :  { %945 = vrot.lane.b32.xlu1 %v3489_v33, %s3118_s25  ;;  %v407_v16 = vmul.f32 1.442695, %v379_v13  ;;  %2920 = vmatprep.subr.mxu0 %v1259_v19 }
  0x4a   :  { %883 = vrot.lane.b32.xlu0 %v3537_v62, %s3117_s13  ;;  %v3070_v14 = vpop.eup %3069  ;;  %2921 = vmatpush3.msra.mxu0 %v1259_v19 }
  0x4b   :  { %v2799_v34 = vadd.f32 -1.0, %v3070_v14  ;;  %3071 = vpow2.f32 %v407_v16  ;;  %2922 = vmatprep.subr.mxu0 %v1258_v22 }
  0x4c   :  { %2923 = vmatpush3.msra.mxu0 %v1258_v22  ;;  %3073 = vpow2.f32 %v409_v37  ;;  %v488_v22 = vld [vmem:[#allocation2 + $0xa1] sm:$0xff] }
  0x4d   :  { %757 = vrot.lane.b32.xlu1 %v3566_v11, %s3115_s8  ;;  %v442_v17 = vsel %vm362_vm14, %v3497_v38, %v2799_v34  ;;  %2924 = vmatprep.subr.mxu0 %v1257_v27  ;;  %v503_v34 = vld [vmem:[#allocation2 + $0x72] sm:$0xff]  ;;  %vm89_vm14 = vcmask 90112  }
  0x4e   :  { %695 = vrot.lane.b32.xlu0 %v499_v12, %s3114_s21  ;;  %459 = vst.msk [vmem:[#allocation2 + $0xe1] sm:$0xff] %vm26_vm0, %v442_v17  ;;  %2925 = vmatpush3.msra.mxu0 %v1257_v27  ;;  %v551_v27 = vld [vmem:[#allocation2 + $0x82] sm:$0xff] }
  0x4f   :  { %2926 = vmatprep.subr.mxu0 %v1256_v60  ;;  %110 = vst.msk [vmem:[#allocation3 + $0x9] sm:$0x1] %vm89_vm14, %v3112_v0  ;;  %90 = vst.msk [vmem:[#allocation3] sm:$0x1] %vm89_vm14, %v3112_v0 }
  0x50   :  { %2927 = vmatpush3.msra.mxu0 %v1256_v60  ;;  %91 = vst.msk [vmem:[#allocation3 + $0x10] sm:$0x1] %vm89_vm14, %v3112_v0  ;;  %92 = vst.msk [vmem:[#allocation3 + $0x20] sm:$0x1] %vm89_vm14, %v3112_v0 }
  0x51   :  { %1009 = vrot.lane.b32.xlu1 %v3504_v21, %s3119_s15  ;;  %v2752_v21 = vld [vmem:[%s4799_s0 + $0x1c1] ss:$2 sm:$0xff]  ;;  %93 = vst.msk [vmem:[#allocation3 + $0x30] sm:$0x1] %vm89_vm14, %v3112_v0  ;;  %94 = vst.msk [vmem:[#allocation3 + $0x40] sm:$0x1] %vm89_vm14, %v3112_v0 }
  0x52   :  { %947 = vrot.lane.b32.xlu0 %v3566_v11, %s3118_s25  ;;  %v207_v41 = vmax.f32 %v2736_v39, %v2752_v21  ;;  %95 = vst.msk [vmem:[#allocation3 + $0x50] sm:$0x1] %vm89_vm14, %v3112_v0  ;;  %96 = vst.msk [vmem:[#allocation3 + $0x60] sm:$0x1] %vm89_vm14, %v3112_v0 }
  0x53   :  { %97 = vst.msk [vmem:[#allocation3 + $0x70] sm:$0x1] %vm89_vm14, %v3112_v0  ;;  %98 = vst.msk [vmem:[#allocation3 + $0x80] sm:$0x1] %vm89_vm14, %v3112_v0 }
  0x54   :  { %v303_v48 = vmax.f32 %v207_v41, %v287_v47  ;;  %99 = vst.msk [vmem:[#allocation3 + $0x90] sm:$0x1] %vm89_vm14, %v3112_v0  ;;  %100 = vst.msk [vmem:[#allocation3 + $0xa0] sm:$0x1] %vm89_vm14, %v3112_v0 }
  0x55   :  { %821 = vrot.lane.b32.xlu1 %v3539_v63, %s3116_s9  ;;  %101 = vst.msk [vmem:[#allocation3 + $0xb0] sm:$0x1] %vm89_vm14, %v3112_v0  ;;  %102 = vst.msk [vmem:[#allocation3 + $0xc0] sm:$0x1] %vm89_vm14, %v3112_v0 }
  0x56   :  { %759 = vrot.lane.b32.xlu0 %v3597_v24, %s3115_s8  ;;  %v326_v42 = vmul.f32 %v3283_v10, %v303_v48  ;;  %v600_v48 = vld [vmem:[#allocation2 + $0x92] sm:$0xff]  ;;  %103 = vst.msk [vmem:[#allocation3 + $0xd0] sm:$0x1] %vm89_vm14, %v3112_v0  ;;  %104 = vst.msk [vmem:[#allocation3 + $0xe0] sm:$0x1] %vm89_vm14, %v3112_v0 }
  0x57   :  { %105 = vst.msk [vmem:[#allocation3 + $0xf0] sm:$0x1] %vm89_vm14, %v3112_v0  ;;  %106 = vst.msk [vmem:[#allocation3 + $0x100] sm:$0x1] %vm89_vm14, %v3112_v0 }
  0x58   :  { %v3072_v8 = vpop.eup %3071  ;;  %v349_v49 = vadd.f32 %v3300_v18, %v326_v42  ;;  %107 = vst.msk [vmem:[#allocation3 + $0x110] sm:$0x1] %vm89_vm14, %v3112_v0  ;;  %108 = vst.msk [vmem:[#allocation3 + $0x120] sm:$0x1] %vm89_vm14, %v3112_v0 }
  0x59   :  { %1073 = vrot.lane.b32.xlu1 %v3537_v62, %s3120_s28  ;;  %v2800_v36 = vadd.f32 -1.0, %v3072_v8  ;;  %v3074_v53 = vpop.eup %3073  ;;  %v208_v62 = vmax.f32 %v2737_v57, %v2753_v59  ;;  %v568_v8 = vld [vmem:[#allocation2 + $0x90] sm:$0xff]  ;;  %109 = vst.msk [vmem:[#allocation3 + $0x130] sm:$0x1] %vm89_vm14, %v3112_v0  ;;  %111 = vst.msk [vmem:[#allocation3 + $0x19] sm:$0x1] %vm89_vm14, %v3112_v0 }
  0x5a   :  { %1011 = vrot.lane.b32.xlu0 %v3539_v63, %s3119_s15  ;;  %v381_v52 = vmin.f32 %v349_v49, 0.0  ;;  %v2801_v55 = vadd.f32 -1.0, %v3074_v53  ;;  %v2785_v63 = vld [vmem:[%s4799_s0 + $0x1f1] ss:$2 sm:$0xff]  ;;  %vm365_vm2 = vcmp.gt.f32.partialorder %v349_v49, 0.0  ;;  %s3121_s0 = smov 12  }
  0x5b   :  { %v443_v38 = vsel %vm363_vm15, %v3557_v7, %v2800_v36  ;;  %v288_v2 = vmax.f32 %v2769_v61, %v2785_v63  ;;  %v491_v53 = vld [vmem:[#allocation2 + $0xd1] sm:$0xff]  ;;  %112 = vst.msk [vmem:[#allocation3 + $0x29] sm:$0x1] %vm89_vm14, %v3112_v0  ;;  %113 = vst.msk [vmem:[#allocation3 + $0x39] sm:$0x1] %vm89_vm14, %v3112_v0 }
  0x5c   :  { %460 = vst.msk [vmem:[#allocation2 + $0xf1] sm:$0xff] %vm26_vm0, %v443_v38  ;;  %v411_v54 = vmul.f32 1.442695, %v381_v52  ;;  %v444_v56 = vsel %vm364_vm1, %v348_v30, %v2801_v55  ;;  %v505_v30 = vld [vmem:[#allocation2 + $0xb2] sm:$0xff]  ;;  %v3718_v38 = vld [vmem:[#allocation2 + $0xc0] sm:$0xff] }
  0x5d   :  { %823 = vrot.lane.b32.xlu1 %v531_v31, %s3116_s9  ;;  %461 = vst.msk [vmem:[#allocation2 + $0x101] sm:$0xff] %vm26_vm0, %v444_v56  ;;  %v304_v3 = vmax.f32 %v208_v62, %v288_v2  ;;  %v506_v52 = vld [vmem:[#allocation2 + $0xc2] sm:$0xff] }
  0x5e   :  { %633 = vrot.lane.b32.xlu0 %v531_v31, %s3113_s16  ;;  %3075 = vpow2.f32 %v411_v54  ;;  %114 = vst.msk [vmem:[#allocation3 + $0x49] sm:$0x1] %vm89_vm14, %v3112_v0  ;;  %115 = vst.msk [vmem:[#allocation3 + $0x59] sm:$0x1] %vm89_vm14, %v3112_v0 }
  0x5f   :  { %v327_v4 = vmul.f32 %v3283_v10, %v304_v3  ;;  %v502_v10 = vld [vmem:[#allocation2 + $0x62] sm:$0xff]  ;;  %116 = vst.msk [vmem:[#allocation3 + $0x69] sm:$0x1] %vm89_vm14, %v3112_v0  ;;  %117 = vst.msk [vmem:[#allocation3 + $0x79] sm:$0x1] %vm89_vm14, %v3112_v0 }
  0x60   :  { %118 = vst.msk [vmem:[#allocation3 + $0x89] sm:$0x1] %vm89_vm14, %v3112_v0  ;;  %119 = vst.msk [vmem:[#allocation3 + $0x99] sm:$0x1] %vm89_vm14, %v3112_v0 }
  0x61   :  { %1075 = vrot.lane.b32.xlu1 %v499_v12, %s3120_s28  ;;  %v350_v5 = vadd.f32 %v3300_v18, %v327_v4  ;;  %v487_v18 = vld [vmem:[#allocation2 + $0x71] sm:$0xff]  ;;  %120 = vst.msk [vmem:[#allocation3 + $0xa9] sm:$0x1] %vm89_vm14, %v3112_v0  ;;  %121 = vst.msk [vmem:[#allocation3 + $0xb9] sm:$0x1] %vm89_vm14, %v3112_v0 }
  0x62   :  { %885 = vrot.lane.b32.xlu0 %v499_v12, %s3117_s13  ;;  %v3750_v4 = vld [vmem:[#allocation2 + $0xd0] sm:$0xff]  ;;  %122 = vst.msk [vmem:[#allocation3 + $0xc9] sm:$0x1] %vm89_vm14, %v3112_v0  ;;  %123 = vst.msk [vmem:[#allocation3 + $0xd9] sm:$0x1] %vm89_vm14, %v3112_v0 }
  0x63   :  { %v382_v7 = vmin.f32 %v350_v5, 0.0  ;;  %vm366_vm3 = vcmp.gt.f32.partialorder %v350_v5, 0.0  ;;  %124 = vst.msk [vmem:[#allocation3 + $0xe9] sm:$0x1] %vm89_vm14, %v3112_v0  ;;  %125 = vst.msk [vmem:[#allocation3 + $0xf9] sm:$0x1] %vm89_vm14, %v3112_v0 }
  0x64   :  { %126 = vst.msk [vmem:[#allocation3 + $0x109] sm:$0x1] %vm89_vm14, %v3112_v0  ;;  %127 = vst.msk [vmem:[#allocation3 + $0x119] sm:$0x1] %vm89_vm14, %v3112_v0 }
  0x65   :  { %697 = vrot.lane.b32.xlu1 %v500_v44, %s3114_s21  ;;  %v413_v13 = vmul.f32 1.442695, %v382_v7  ;;  %128 = vst.msk [vmem:[#allocation3 + $0x129] sm:$0x1] %vm89_vm14, %v3112_v0  ;;  %129 = vst.msk [vmem:[#allocation3 + $0x139] sm:$0x1] %vm89_vm14, %v3112_v0 }
  0x66   :  { %635 = vrot.lane.b32.xlu0 %v485_v45, %s3113_s16 }
  0x67   :  { %3077 = vpow2.f32 %v413_v13 }
  0x69   :  { %949 = vrot.lane.b32.xlu1 %v3597_v24, %s3118_s25 }
  0x6a   :  { %887 = vrot.lane.b32.xlu0 %v500_v44, %s3117_s13 }
  0x6b   :  { %v3076_v9 = vpop.eup %3075 }
  0x6c   :  { %v2802_v12 = vadd.f32 -1.0, %v3076_v9 }
  0x6d   :  { %761 = vrot.lane.b32.xlu1 %v3644_v51, %s3115_s8 }
  0x6e   :  { %699 = vrot.lane.b32.xlu0 %v501_v50, %s3114_s21  ;;  %v445_v14 = vsel %vm365_vm2, %v349_v49, %v2802_v12 }
  0x6f   :  { %462 = vst.msk [vmem:[#allocation2 + $0x111] sm:$0xff] %vm26_vm0, %v445_v14 }
  0x71   :  { %1013 = vrot.lane.b32.xlu1 %v531_v31, %s3119_s15 }
  0x72   :  { %951 = vrot.lane.b32.xlu0 %v3644_v51, %s3118_s25 }
  0x74   :  { %v3078_v16 = vpop.eup %3077 }
  0x75   :  { %825 = vrot.lane.b32.xlu1 %v485_v45, %s3116_s9  ;;  %v2803_v17 = vadd.f32 -1.0, %v3078_v16 }
  0x76   :  { %763 = vrot.lane.b32.xlu0 %v3665_v1, %s3115_s8 }
  0x77   :  { %v446_v19 = vsel %vm366_vm3, %v350_v5, %v2803_v17  ;;  %v507_v5 = vld [vmem:[#allocation2 + $0xd2] sm:$0xff] }
  0x78   :  { %463 = vst.msk [vmem:[#allocation2 + $0x121] sm:$0xff] %vm26_vm0, %v446_v19  ;;  %v3772_v19 = vld [vmem:[#allocation2 + $0xe0] sm:$0xff] }
  0x79   :  { %1077 = vrot.lane.b32.xlu1 %v500_v44, %s3120_s28  ;;  %v537_v44 = vld [vmem:[#allocation2 + $0xc1] sm:$0xff] }
  0x7a   :  { %1015 = vrot.lane.b32.xlu0 %v485_v45, %s3119_s15 }
  0x7d   :  { %827 = vrot.lane.b32.xlu1 %v533_v6, %s3116_s9 }
  0x7e   :  { %637 = vrot.lane.b32.xlu0 %v533_v6, %s3113_s16 }
  0x81   :  { %1079 = vrot.lane.b32.xlu1 %v501_v50, %s3120_s28 }
  0x82   :  { %889 = vrot.lane.b32.xlu0 %v501_v50, %s3117_s13  ;;  %v464_v50 = vld [vmem:[#allocation2] sm:$0xff] }
  0x84   :  { %v626_v23 = vpop.permute.xlu0 %625 }
  0x85   :  { %701 = vrot.lane.b32.xlu1 %v502_v10, %s3114_s21  ;;  %v1121_v54 = vsel %vm26_vm0, %v464_v50, %v626_v23 }
  0x86   :  { %639 = vrot.lane.b32.xlu0 %v487_v18, %s3113_s16 }
  0x89   :  { %953 = vrot.lane.b32.xlu1 %v3665_v1, %s3118_s25 }
  0x8a   :  { %891 = vrot.lane.b32.xlu0 %v502_v10, %s3117_s13 }
  0x8d   :  { %765 = vrot.lane.b32.xlu1 %v3684_v15, %s3115_s8 }
  0x8e   :  { %703 = vrot.lane.b32.xlu0 %v503_v34, %s3114_s21 }
  0x8f   :  { %v690_v58 = vpop.permute.xlu1 %689 }
  0x90   :  { %v1138_v57 = vsel %vm1137_vm4, %v1121_v54, %v690_v58 }
  0x91   :  { %1017 = vrot.lane.b32.xlu1 %v533_v6, %s3119_s15 }
  0x92   :  { %955 = vrot.lane.b32.xlu0 %v3684_v15, %s3118_s25 }
  0x95   :  { %829 = vrot.lane.b32.xlu1 %v487_v18, %s3116_s9 }
  0x96   :  { %767 = vrot.lane.b32.xlu0 %v519_v20, %s3115_s8 }
  0x99   :  { %1081 = vrot.lane.b32.xlu1 %v502_v10, %s3120_s28 }
  0x9a   :  { %1019 = vrot.lane.b32.xlu0 %v487_v18, %s3119_s15 }
  0x9d   :  { %831 = vrot.lane.b32.xlu1 %v535_v46, %s3116_s9 }
  0x9e   :  { %641 = vrot.lane.b32.xlu0 %v488_v22, %s3113_s16 }
  0xa1   :  { %1083 = vrot.lane.b32.xlu1 %v503_v34, %s3120_s28 }
  0xa2   :  { %893 = vrot.lane.b32.xlu0 %v503_v34, %s3117_s13 }
  0xa5   :  { %705 = vrot.lane.b32.xlu1 %v504_v25, %s3114_s21 }
  0xa6   :  { %643 = vrot.lane.b32.xlu0 %v489_v26, %s3113_s16 }
  0xa7   :  { %v3703_v28 = vpop.permute.xlu1 %691 }
  0xa8   :  { %v628_v60 = vpop.permute.xlu0 %627 }
  0xa9   :  { %957 = vrot.lane.b32.xlu1 %v519_v20, %s3118_s25  ;;  %v1122_v6 = vsel %vm26_vm0, %v3491_v35, %v628_v60 }
  0xaa   :  { %895 = vrot.lane.b32.xlu0 %v551_v27, %s3117_s13  ;;  %v1139_v14 = vsel %vm1137_vm4, %v1122_v6, %v3703_v28 }
  0xab   :  { %v3709_v31 = vpop.permute.xlu1 %755 }
  0xac   :  { %v754_v32 = vpop.permute.xlu0 %753  ;;  %v1156_v35 = vsel %vm1154_vm5, %v1139_v14, %v3709_v31  ;;  %v508_v31 = vld [vmem:[#allocation2 + $0xe2] sm:$0xff] }
  0xad   :  { %769 = vrot.lane.b32.xlu1 %v3707_v29, %s3115_s8  ;;  %v1155_v59 = vsel %vm1154_vm5, %v1138_v57, %v754_v32  ;;  %v493_v32 = vld [vmem:[#allocation2 + $0xf1] sm:$0xff] }
  0xae   :  { %707 = vrot.lane.b32.xlu0 %v505_v30, %s3114_s21 }
  0xaf   :  { %v3714_v36 = vpop.permute.xlu1 %629 }
  0xb0   :  { %v818_v37 = vpop.permute.xlu0 %817 }
  0xb1   :  { %1021 = vrot.lane.b32.xlu1 %v535_v46, %s3119_s15  ;;  %v1172_v63 = vsel %vm1171_vm6, %v1155_v59, %v818_v37 }
  0xb2   :  { %959 = vrot.lane.b32.xlu0 %v568_v8, %s3118_s25 }
  0xb3   :  { %v882_v39 = vpop.permute.xlu1 %881 }
  0xb4   :  { %v820_v21 = vpop.permute.xlu0 %819  ;;  %v1189_v2 = vsel %vm1188_vm7, %v1172_v63, %v882_v39  ;;  %v1123_v39 = vsel %vm26_vm0, %v3489_v33, %v3714_v36  ;;  %v3811_v36 = vld [vmem:[#allocation2 + $0xf0] sm:$0xff] }
  0xb5   :  { %833 = vrot.lane.b32.xlu1 %v489_v26, %s3116_s9  ;;  %v1173_v34 = vsel %vm1171_vm6, %v1156_v35, %v820_v21  ;;  %v539_v26 = vld [vmem:[#allocation2 + $0xe1] sm:$0xff] }
  0xb6   :  { %771 = vrot.lane.b32.xlu0 %v3718_v38, %s3115_s8  ;;  %v510_v35 = vld [vmem:[#allocation2 + $0x102] sm:$0xff] }
  0xb7   :  { %v3723_v41 = vpop.permute.xlu1 %693 }
  0xb8   :  { %v3725_v43 = vpop.permute.xlu0 %631  ;;  %v1140_v21 = vsel %vm1137_vm4, %v1123_v39, %v3723_v41  ;;  %v509_v41 = vld [vmem:[#allocation2 + $0xf2] sm:$0xff] }
  0xb9   :  { %1085 = vrot.lane.b32.xlu1 %v551_v27, %s3120_s28 }
  0xba   :  { %1023 = vrot.lane.b32.xlu0 %v584_v40, %s3119_s15 }
  0xbb   :  { %v946_v45 = vpop.permute.xlu1 %945 }
  0xbc   :  { %v884_v47 = vpop.permute.xlu0 %883  ;;  %v1206_v3 = vsel %vm1205_vm8, %v1189_v2, %v946_v45 }
  0xbd   :  { %835 = vrot.lane.b32.xlu1 %v537_v44, %s3116_s9  ;;  %v1190_v16 = vsel %vm1188_vm7, %v1173_v34, %v884_v47 }
  0xbe   :  { %645 = vrot.lane.b32.xlu0 %v537_v44, %s3113_s16 }
  0xbf   :  { %v3731_v42 = vpop.permute.xlu1 %757 }
  0xc0   :  { %v3733_v49 = vpop.permute.xlu0 %695  ;;  %v1157_v40 = vsel %vm1154_vm5, %v1140_v21, %v3731_v42  ;;  %v1124_v42 = vsel %vm26_vm0, %v3566_v11, %v3725_v43 }
  0xc1   :  { %1087 = vrot.lane.b32.xlu1 %v600_v48, %s3120_s28 }
  0xc2   :  { %897 = vrot.lane.b32.xlu0 %v505_v30, %s3117_s13 }
  0xc3   :  { %v1010_v55 = vpop.permute.xlu1 %1009 }
  0xc4   :  { %v948_v56 = vpop.permute.xlu0 %947  ;;  %v1223_v7 = vsel %vm1222_vm9, %v1206_v3, %v1010_v55  ;;  %v1141_v55 = vsel %vm1137_vm4, %v1124_v42, %v3733_v49  ;;  %v3834_v49 = vld [vmem:[#allocation2 + $0x100] sm:$0xff] }
  0xc5   :  { %709 = vrot.lane.b32.xlu1 %v506_v52, %s3114_s21  ;;  %v1207_v17 = vsel %vm1205_vm8, %v1190_v16, %v948_v56 }
  0xc6   :  { %647 = vrot.lane.b32.xlu0 %v491_v53, %s3113_s16 }
  0xc7   :  { %v822_v61 = vpop.permute.xlu1 %821 }
  0xc8   :  { %v3742_v62 = vpop.permute.xlu0 %759  ;;  %v1174_v47 = vsel %vm1171_vm6, %v1157_v40, %v822_v61 }
  0xc9   :  { %961 = vrot.lane.b32.xlu1 %v3718_v38, %s3118_s25  ;;  %v1158_v56 = vsel %vm1154_vm5, %v1141_v55, %v3742_v62 }
  0xca   :  { %899 = vrot.lane.b32.xlu0 %v506_v52, %s3117_s13 }
  0xcb   :  { %v1074_v9 = vpop.permute.xlu1 %1073 }
  0xcc   :  { %v1012_v12 = vpop.permute.xlu0 %1011  ;;  %v1240_v13 = vsel %vm1239_vm10, %v1223_v7, %v1074_v9  ;;  %v541_v7 = vld [vmem:[#allocation2 + $0x101] sm:$0xff] }
  0xcd   :  { %773 = vrot.lane.b32.xlu1 %v3750_v4, %s3115_s8  ;;  %2928 = vmatprep.mubr.msk.f32.mxu0 %vm1265_vm11, %v1240_v13  ;;  %v1224_v20 = vsel %vm1222_vm9, %v1207_v17, %v1012_v12 }
  0xce   :  { %711 = vrot.lane.b32.xlu0 %v507_v5, %s3114_s21 }
  0xcf   :  { %v824_v10 = vpop.permute.xlu1 %823 }
  0xd0   :  { %v3764_v18 = vpop.permute.xlu0 %633  ;;  %v1175_v57 = vsel %vm1171_vm6, %v1158_v56, %v824_v10  ;;  %v495_v10 = vld [vmem:[#allocation2 + $0x111] sm:$0xff] }
  0xd1   :  { %1025 = vrot.lane.b32.xlu1 %v537_v44, %s3119_s15  ;;  %v1125_v34 = vsel %vm26_vm0, %v3597_v24, %v3764_v18 }
  0xd2   :  { %963 = vrot.lane.b32.xlu0 %v3750_v4, %s3118_s25 }
  0xd3   :  { %v1076_v46 = vpop.permute.xlu1 %1075 }
  0xd4   :  { %v886_v22 = vpop.permute.xlu0 %885  ;;  %v1241_v23 = vsel %vm1239_vm10, %v1224_v20, %v1076_v46 }
  0xd5   :  { %837 = vrot.lane.b32.xlu1 %v491_v53, %s3116_s9  ;;  %2929 = vmatmul.mubr.msk.f32.vlgmr.msra.gmra.mxu0 %vm1265_vm11, %v1241_v23  ;;  %v1191_v48 = vsel %vm1188_vm7, %v1174_v47, %v886_v22 }
  0xd6   :  { %775 = vrot.lane.b32.xlu0 %v3772_v19, %s3115_s8 }
  0xd7   :  { %v3780_v58 = vpop.permute.xlu1 %697 }
  0xd8   :  { %v3782_v25 = vpop.permute.xlu0 %635  ;;  %v1142_v20 = vsel %vm1137_vm4, %v1125_v34, %v3780_v58  ;;  %v511_v58 = vld [vmem:[#allocation2 + $0x112] sm:$0xff] }
  0xd9   :  { %1089 = vrot.lane.b32.xlu1 %v506_v52, %s3120_s28 }
  0xda   :  { %1027 = vrot.lane.b32.xlu0 %v491_v53, %s3119_s15 }
  0xdb   :  { %v950_v27 = vpop.permute.xlu1 %949 }
  0xdc   :  { %v888_v28 = vpop.permute.xlu0 %887  ;;  %v1208_v33 = vsel %vm1205_vm8, %v1191_v48, %v950_v27  ;;  %v3875_v27 = vld [vmem:[#allocation2 + $0x110] sm:$0xff] }
  0xdd   :  { %839 = vrot.lane.b32.xlu1 %v539_v26, %s3116_s9  ;;  %v1192_v59 = vsel %vm1188_vm7, %v1175_v57, %v888_v28  ;;  %v1126_v28 = vsel %vm26_vm0, %v3644_v51, %v3782_v25 }
  0xde   :  { %649 = vrot.lane.b32.xlu0 %v539_v26, %s3113_s16 }
  0xdf   :  { %v3788_v60 = vpop.permute.xlu1 %761 }
  0xe0   :  { %v3790_v30 = vpop.permute.xlu0 %699  ;;  %v1159_v46 = vsel %vm1154_vm5, %v1142_v20, %v3788_v60 }
  0xe1   :  { %1091 = vrot.lane.b32.xlu1 %v507_v5, %s3120_s28 }
  0xe2   :  { %901 = vrot.lane.b32.xlu0 %v507_v5, %s3117_s13 }
  0xe3   :  { %v1014_v8 = vpop.permute.xlu1 %1013 }
  0xe4   :  { %v952_v37 = vpop.permute.xlu0 %951  ;;  %v1225_v50 = vsel %vm1222_vm9, %v1208_v33, %v1014_v8 }
  0xe5   :  { %713 = vrot.lane.b32.xlu1 %v508_v31, %s3114_s21  ;;  %v1209_v61 = vsel %vm1205_vm8, %v1192_v59, %v952_v37  ;;  %v1143_v37 = vsel %vm1137_vm4, %v1126_v28, %v3790_v30 }
  0xe6   :  { %651 = vrot.lane.b32.xlu0 %v493_v32, %s3113_s16 }
  0xe7   :  { %v826_v44 = vpop.permute.xlu1 %825 }
  0xe8   :  { %v3803_v45 = vpop.permute.xlu0 %763 }
  0xe9   :  { %965 = vrot.lane.b32.xlu1 %v3772_v19, %s3118_s25  ;;  %v1160_v39 = vsel %vm1154_vm5, %v1143_v37, %v3803_v45  ;;  %v1738_v37 = vld [vmem:[#allocation3 + $0x91] sm:$0xff] }
  0xea   :  { %903 = vrot.lane.b32.xlu0 %v508_v31, %s3117_s13 }
  0xeb   :  { %v1078_v52 = vpop.permute.xlu1 %1077 }
  0xec   :  { %v1016_v53 = vpop.permute.xlu0 %1015  ;;  %v1242_v54 = vsel %vm1239_vm10, %v1225_v50, %v1078_v52  ;;  %v3924_v50 = vld [vmem:[#allocation2 + $0x121] sm:$0xff] }
  0xed   :  { %777 = vrot.lane.b32.xlu1 %v3811_v36, %s3115_s8  ;;  %2931 = vmatprep.mubr.msk.f32.mxu0 %vm1265_vm11, %v1242_v54  ;;  %v1226_v63 = vsel %vm1222_vm9, %v1209_v61, %v1016_v53  ;;  %v3933_v54 = vld [vmem:[#allocation2 + $0x122] sm:$0xff] }
  0xee   :  { %715 = vrot.lane.b32.xlu0 %v509_v41, %s3114_s21 }
  0xef   :  { %v828_v11 = vpop.permute.xlu1 %827 }
  0xf0   :  { %v3826_v43 = vpop.permute.xlu0 %637  ;;  %v1177_v21 = vsel %vm1171_vm6, %v1160_v39, %v828_v11  ;;  %v576_v11 = vld [vmem:[#allocation2 + $0x130] sm:$0xff] }
  0xf1   :  { %1029 = vrot.lane.b32.xlu1 %v539_v26, %s3119_s15  ;;  %v1176_v26 = vsel %vm1171_vm6, %v1159_v46, %v826_v44  ;;  %v3900_v44 = vld [vmem:[#allocation2 + $0x120] sm:$0xff]  ;;  %v1127_v57 = vsel %vm26_vm0, %v3665_v1, %v3826_v43  ;;  %v592_v43 = vld [vmem:[#allocation2 + $0x131] sm:$0xff] }
  0xf2   :  { %967 = vrot.lane.b32.xlu0 %v3811_v36, %s3118_s25 }
  0xf3   :  { %v1080_v2 = vpop.permute.xlu1 %1079 }
  0xf4   :  { %v890_v62 = vpop.permute.xlu0 %889  ;;  %v1243_v3 = vsel %vm1239_vm10, %v1226_v63, %v1080_v2 }
  0xf5   :  { %841 = vrot.lane.b32.xlu1 %v493_v32, %s3116_s9  ;;  %2932 = vmatmul.mubr.msk.f32.gmra.mxu0 %vm1265_vm11, %v1243_v3  ;;  %v1193_v24 = vsel %vm1188_vm7, %v1176_v26, %v890_v62  ;;  %v1650_v26 = vld [vmem:[#allocation3 + $0x2] sm:$0xff] }
  0xf6   :  { %779 = vrot.lane.b32.xlu0 %v3834_v49, %s3115_s8 }
  0xf7   :  { %v3842_v5 = vpop.permute.xlu1 %701 }
  0xf8   :  { %v3844_v6 = vpop.permute.xlu0 %639  ;;  %v1144_v1 = vsel %vm1137_vm4, %v1127_v57, %v3842_v5 }
  0xf9   :  { %1093 = vrot.lane.b32.xlu1 %v508_v31, %s3120_s28 }
  0xfa   :  { %1031 = vrot.lane.b32.xlu0 %v493_v32, %s3119_s15 }
  0xfb   :  { %v954_v9 = vpop.permute.xlu1 %953 }
  0xfc   :  { %v892_v12 = vpop.permute.xlu0 %891  ;;  %v1210_v18 = vsel %vm1205_vm8, %v1193_v24, %v954_v9  ;;  %v1128_v9 = vsel %vm26_vm0, %v3684_v15, %v3844_v6 }
  0xfd   :  { %843 = vrot.lane.b32.xlu1 %v541_v7, %s3116_s9  ;;  %v1194_v40 = vsel %vm1188_vm7, %v1177_v21, %v892_v12 }
  0xfe   :  { %653 = vrot.lane.b32.xlu0 %v541_v7, %s3113_s16 }
  0xff   :  { %v3850_v13 = vpop.permute.xlu1 %765 }
 0x100   :  { %v3852_v14 = vpop.permute.xlu0 %703  ;;  %v1161_v63 = vsel %vm1154_vm5, %v1144_v1, %v3850_v13 }
 0x101   :  { %1095 = vrot.lane.b32.xlu1 %v509_v41, %s3120_s28  ;;  %v1145_v34 = vsel %vm1137_vm4, %v1128_v9, %v3852_v14 }
 0x102   :  { %905 = vrot.lane.b32.xlu0 %v509_v41, %s3117_s13 }
 0x103   :  { %v1018_v16 = vpop.permute.xlu1 %1017 }
 0x104   :  { %v956_v17 = vpop.permute.xlu0 %955  ;;  %v1227_v60 = vsel %vm1222_vm9, %v1210_v18, %v1018_v16  ;;  %v1642_v16 = vld [vmem:[#allocation3 + $0xa1] sm:$0xff] }
 0x105   :  { %717 = vrot.lane.b32.xlu1 %v510_v35, %s3114_s21  ;;  %v1211_v30 = vsel %vm1205_vm8, %v1194_v40, %v956_v17  ;;  %v1634_v17 = vld [vmem:[#allocation3 + $0x1] sm:$0xff] }
 0x106   :  { %655 = vrot.lane.b32.xlu0 %v495_v10, %s3113_s16  ;;  %s3122_s16 = smov 72  }
 0x107   :  { %v3865_v22 = vpop.permute.xlu1 %829 }
 0x108   :  { %v3867_v23 = vpop.permute.xlu0 %767  ;;  %v1178_v3 = vsel %vm1171_vm6, %v1161_v63, %v3865_v22 }
 0x109   :  { %969 = vrot.lane.b32.xlu1 %v3834_v49, %s3118_s25  ;;  %v1162_v15 = vsel %vm1154_vm5, %v1145_v34, %v3867_v23 }
 0x10a   :  { %907 = vrot.lane.b32.xlu0 %v510_v35, %s3117_s13 }
 0x10b   :  { %v1082_v31 = vpop.permute.xlu1 %1081 }
 0x10c   :  { %v1020_v32 = vpop.permute.xlu0 %1019  ;;  %v1244_v8 = vsel %vm1239_vm10, %v1227_v60, %v1082_v31  ;;  %v1722_v60 = vld [vmem:[#allocation3 + $0x90] sm:$0xff] }
 0x10d   :  { %781 = vrot.lane.b32.xlu1 %v3875_v27, %s3115_s8  ;;  %2934 = vmatprep.mubr.msk.f32.mxu0 %vm1265_vm11, %v1244_v8  ;;  %v1228_v47 = vsel %vm1222_vm9, %v1211_v30, %v1020_v32  ;;  %v1754_v8 = vld [vmem:[#allocation3 + $0x92] sm:$0xff]  ;;  %v472_v30 = vld [vmem:[#allocation2 + $0xa0] sm:$0xff] }
 0x10e   :  { %719 = vrot.lane.b32.xlu0 %v511_v58, %s3114_s21  ;;  %s3123_s21 = smov 96  }
 0x10f   :  { %v3890_v51 = vpop.permute.xlu1 %831 }
 0x110   :  { %v3892_v25 = vpop.permute.xlu0 %641  ;;  %v1179_v46 = vsel %vm1171_vm6, %v1162_v15, %v3890_v51 }
 0x111   :  { %1033 = vrot.lane.b32.xlu1 %v541_v7, %s3119_s15  ;;  %v608_v7 = vld [vmem:[#allocation2 + $0x132] sm:$0xff] }
 0x112   :  { %971 = vrot.lane.b32.xlu0 %v3875_v27, %s3118_s25 }
 0x113   :  { %v1084_v45 = vpop.permute.xlu1 %1083 }
 0x114   :  { %v3903_v48 = vpop.permute.xlu0 %893  ;;  %v1245_v33 = vsel %vm1239_vm10, %v1228_v47, %v1084_v45 }
 0x115   :  { %845 = vrot.lane.b32.xlu1 %v495_v10, %s3116_s9  ;;  %2935 = vmatmul.mubr.msk.f32.gmra.mxu0 %vm1265_vm11, %v1245_v33  ;;  %v1195_v0 = vsel %vm1188_vm7, %v1178_v3, %v3903_v48 }
 0x116   :  { %783 = vrot.lane.b32.xlu0 %v3900_v44, %s3115_s8 }
 0x117   :  { %v3918_v41 = vpop.permute.xlu1 %705 }
 0x118   :  { %v3920_v42 = vpop.permute.xlu0 %643 }
 0x119   :  { %1097 = vrot.lane.b32.xlu1 %v510_v35, %s3120_s28 }
 0x11a   :  { %1035 = vrot.lane.b32.xlu0 %v495_v10, %s3119_s15 }
 0x11b   :  { %v3926_v52 = vpop.permute.xlu1 %957 }
 0x11c   :  { %v3928_v53 = vpop.permute.xlu0 %895  ;;  %v1212_v5 = vsel %vm1205_vm8, %v1195_v0, %v3926_v52 }
 0x11d   :  { %909 = vrot.lane.b32.xlu1 %v511_v58, %s3117_s13  ;;  %v1196_v22 = vsel %vm1188_vm7, %v1179_v46, %v3928_v53 }
 0x11e   :  { %847 = vrot.lane.b32.xlu0 %v3924_v50, %s3116_s9  ;;  %s3124_s9 = smov 84  }
 0x11f   :  { %v3935_v55 = vpop.permute.xlu1 %769 }
 0x120   :  { %v3937_v56 = vpop.permute.xlu0 %707 }
 0x121   :  { %911 = vrot.lane.b32.xlu1 %v3933_v54, %s3117_s13 }
 0x122   :  { %1099 = vrot.lane.b32.xlu0 %v511_v58, %s3120_s28  ;;  %v1658_v58 = vld [vmem:[#allocation3 + $0xa2] sm:$0xff] }
 0x123   :  { %v1022_v59 = vpop.permute.xlu1 %1021 }
 0x124   :  { %v3949_v61 = vpop.permute.xlu0 %959  ;;  %v1229_v12 = vsel %vm1222_vm9, %v1212_v5, %v1022_v59 }
 0x125   :  { %975 = vrot.lane.b32.xlu1 %v576_v11, %s3118_s25  ;;  %v1213_v14 = vsel %vm1205_vm8, %v1196_v22, %v3949_v61 }
 0x126   :  { %973 = vrot.lane.b32.xlu0 %v3900_v44, %s3118_s25  ;;  %v1129_v44 = vsel %vm26_vm0, %v472_v30, %v3892_v25  ;;  %v1130_v25 = vsel %vm26_vm0, %v3707_v29, %v3920_v42 }
 0x127   :  { %v834_v2 = vpop.permute.xlu1 %833  ;;  %v1146_v48 = vsel %vm1137_vm4, %v1129_v44, %v3918_v41 }
 0x128   :  { %v4038_v62 = vpop.permute.xlu0 %771  ;;  %v1163_v33 = vsel %vm1154_vm5, %v1146_v48, %v3935_v55  ;;  %v1147_v55 = vsel %vm1137_vm4, %v1130_v25, %v3937_v56 }
 0x129   :  { %1039 = vrot.lane.b32.xlu1 %v592_v43, %s3119_s15  ;;  %v1180_v53 = vsel %vm1171_vm6, %v1163_v33, %v834_v2  ;;  %v1164_v1 = vsel %vm1154_vm5, %v1147_v55, %v4038_v62 }
 0x12a   :  { %1037 = vrot.lane.b32.xlu0 %v3924_v50, %s3119_s15 }
 0x12b   :  { %v1086_v13 = vpop.permute.xlu1 %1085 }
 0x12c   :  { %v1024_v35 = vpop.permute.xlu0 %1023  ;;  %v1246_v10 = vsel %vm1239_vm10, %v1229_v12, %v1086_v13 }
 0x12d   :  { %1103 = vrot.lane.b32.xlu1 %v608_v7, %s3120_s28  ;;  %2937 = vmatprep.mubr.msk.f32.mxu0 %vm1265_vm11, %v1246_v10  ;;  %v1230_v23 = vsel %vm1222_vm9, %v1213_v14, %v1024_v35 }
 0x12e   :  { %1101 = vrot.lane.b32.xlu0 %v3933_v54, %s3120_s28 }
 0x12f   :  { %v836_v6 = vpop.permute.xlu1 %835 }
 0x130   :  { %v4062_v20 = vpop.permute.xlu0 %645  ;;  %v1181_v2 = vsel %vm1171_vm6, %v1164_v1, %v836_v6 }
 0x131   :  { %1795 = vrot.lane.b32.xlu1 %v1642_v16, %s3121_s0  ;;  %v1131_v10 = vsel %vm26_vm0, %v3718_v38, %v4062_v20 }
 0x132   :  { %1779 = vrot.lane.b32.xlu0 %v1634_v17, %s3121_s0 }
 0x133   :  { %v1088_v24 = vpop.permute.xlu1 %1087 }
 0x134   :  { %v898_v18 = vpop.permute.xlu0 %897  ;;  %v1247_v28 = vsel %vm1239_vm10, %v1230_v23, %v1088_v24 }
 0x135   :  { %2938 = vmatmul.mubr.msk.f32.gmra.mxu0 %vm1265_vm11, %v1247_v28  ;;  %1843 = vrot.lane.b32.xlu1 %v1650_v26, %s3115_s8  ;;  %v1197_v54 = vsel %vm1188_vm7, %v1180_v53, %v898_v18 }
 0x136   :  { %1859 = vrot.lane.b32.xlu0 %v1658_v58, %s3115_s8 }
 0x137   :  { %v710_v31 = vpop.permute.xlu1 %709 }
 0x138   :  { %v648_v32 = vpop.permute.xlu0 %647  ;;  %v1148_v17 = vsel %vm1137_vm4, %v1131_v10, %v710_v31 }
 0x139   :  { %2113 = vrot.lane.b32.xlu1 %v1722_v60, %s3122_s16  ;;  %v1132_v23 = vsel %vm26_vm0, %v3750_v4, %v648_v32 }
 0x13a   :  { %2241 = vrot.lane.b32.xlu0 %v1754_v8, %s3123_s21 }
 0x13b   :  { %v962_v39 = vpop.permute.xlu1 %961 }
 0x13c   :  { %v900_v51 = vpop.permute.xlu0 %899  ;;  %v1214_v11 = vsel %vm1205_vm8, %v1197_v54, %v962_v39 }
 0x13d   :  { %2177 = vrot.lane.b32.xlu1 %v1738_v37, %s3124_s9  ;;  %v1198_v29 = vsel %vm1188_vm7, %v1181_v2, %v900_v51 }
 0x13f   :  { %v774_v21 = vpop.permute.xlu1 %773 }
 0x140   :  { %v712_v40 = vpop.permute.xlu0 %711  ;;  %v1165_v15 = vsel %vm1154_vm5, %v1148_v17, %v774_v21 }
 0x141   :  { %v1149_v58 = vsel %vm1137_vm4, %v1132_v23, %v712_v40 }
 0x143   :  { %v1026_v47 = vpop.permute.xlu1 %1025 }
 0x144   :  { %v964_v45 = vpop.permute.xlu0 %963  ;;  %v1231_v57 = vsel %vm1222_vm9, %v1214_v11, %v1026_v47 }
 0x145   :  { %v1215_v42 = vsel %vm1205_vm8, %v1198_v29, %v964_v45 }
 0x147   :  { %v838_v50 = vpop.permute.xlu1 %837 }
 0x148   :  { %v776_v52 = vpop.permute.xlu0 %775  ;;  %v1182_v22 = vsel %vm1171_vm6, %v1165_v15, %v838_v50 }
 0x149   :  { %v1166_v28 = vsel %vm1154_vm5, %v1149_v58, %v776_v52 }
 0x14b   :  { %v1090_v59 = vpop.permute.xlu1 %1089 }
 0x14c   :  { %v1028_v61 = vpop.permute.xlu0 %1027  ;;  %v1248_v41 = vsel %vm1239_vm10, %v1231_v57, %v1090_v59 }
 0x14d   :  { %2940 = vmatprep.mubr.msk.f32.mxu0 %vm1265_vm11, %v1248_v41  ;;  %v1232_v3 = vsel %vm1222_vm9, %v1215_v42, %v1028_v61 }
 0x14f   :  { %v840_v43 = vpop.permute.xlu1 %839 }
 0x150   :  { %v650_v63 = vpop.permute.xlu0 %649  ;;  %v1183_v8 = vsel %vm1171_vm6, %v1166_v28, %v840_v43 }
 0x151   :  { %v1133_v33 = vsel %vm26_vm0, %v3772_v19, %v650_v63 }
 0x153   :  { %v1092_v0 = vpop.permute.xlu1 %1091 }
 0x154   :  { %v902_v5 = vpop.permute.xlu0 %901  ;;  %v1249_v7 = vsel %vm1239_vm10, %v1232_v3, %v1092_v0 }
 0x155   :  { %2941 = vmatmul.mubr.msk.f32.gmra.mxu0 %vm1265_vm11, %v1249_v7  ;;  %v1199_v14 = vsel %vm1188_vm7, %v1182_v22, %v902_v5 }
 0x157   :  { %v714_v56 = vpop.permute.xlu1 %713 }
 0x158   :  { %v652_v9 = vpop.permute.xlu0 %651  ;;  %v1150_v53 = vsel %vm1137_vm4, %v1133_v33, %v714_v56 }
 0x159   :  { %v1134_v41 = vsel %vm26_vm0, %v3811_v36, %v652_v9 }
 0x15b   :  { %v966_v12 = vpop.permute.xlu1 %965 }
 0x15c   :  { %v904_v62 = vpop.permute.xlu0 %903  ;;  %v1216_v26 = vsel %vm1205_vm8, %v1199_v14, %v966_v12  ;;  %v4148_v12 = vld [vmem:[%s4803_s5] ss:$0 sm:$0xff]  ;;  %s3125_s5 = smov 36  }
 0x15d   :  { %v1200_v37 = vsel %vm1188_vm7, %v1183_v8, %v904_v62 }
 0x15f   :  { %v778_v13 = vpop.permute.xlu1 %777 }
 0x160   :  { %v716_v35 = vpop.permute.xlu0 %715  ;;  %v1167_v54 = vsel %vm1154_vm5, %v1150_v53, %v778_v13  ;;  %v4154_v13 = vld [vmem:[%s4804_s6] ss:$0 sm:$0xff]  ;;  %s3126_s6 = smov 60  }
 0x161   :  { %v1151_v63 = vsel %vm1137_vm4, %v1134_v41, %v716_v35 }
 0x163   :  { %v1030_v34 = vpop.permute.xlu1 %1029 }
 0x164   :  { %v968_v16 = vpop.permute.xlu0 %967  ;;  %v1233_v24 = vsel %vm1222_vm9, %v1216_v26, %v1030_v34 }
 0x165   :  { %v1217_v4 = vsel %vm1205_vm8, %v1200_v37, %v968_v16 }
 0x167   :  { %v842_v6 = vpop.permute.xlu1 %841 }
 0x168   :  { %v780_v46 = vpop.permute.xlu0 %779  ;;  %v1184_v57 = vsel %vm1171_vm6, %v1167_v54, %v842_v6 }
 0x169   :  { %v1168_v2 = vsel %vm1154_vm5, %v1151_v63, %v780_v46 }
 0x16b   :  { %v1094_v38 = vpop.permute.xlu1 %1093 }
 0x16c   :  { %v1032_v20 = vpop.permute.xlu0 %1031  ;;  %v1250_v18 = vsel %vm1239_vm10, %v1233_v24, %v1094_v38 }
 0x16d   :  { %2943 = vmatprep.mubr.msk.f32.mxu0 %vm1265_vm11, %v1250_v18  ;;  %v1234_v32 = vsel %vm1222_vm9, %v1217_v4, %v1032_v20 }
 0x16f   :  { %v844_v60 = vpop.permute.xlu1 %843 }
 0x170   :  { %v654_v31 = vpop.permute.xlu0 %653  ;;  %v1185_v3 = vsel %vm1171_vm6, %v1168_v2, %v844_v60 }
 0x171   :  { %v1135_v35 = vsel %vm26_vm0, %v3834_v49, %v654_v31 }
 0x173   :  { %v1096_v39 = vpop.permute.xlu1 %1095 }
 0x174   :  { %v906_v51 = vpop.permute.xlu0 %905  ;;  %v1251_v21 = vsel %vm1239_vm10, %v1234_v32, %v1096_v39 }
 0x175   :  { %2944 = vmatmul.mubr.msk.f32.gmra.mxu0 %vm1265_vm11, %v1251_v21  ;;  %v1201_v59 = vsel %vm1188_vm7, %v1184_v57, %v906_v51 }
 0x177   :  { %v718_v30 = vpop.permute.xlu1 %717 }
 0x178   :  { %v656_v40 = vpop.permute.xlu0 %655  ;;  %v1152_v22 = vsel %vm1137_vm4, %v1135_v35, %v718_v30 }
 0x179   :  { %v1136_v10 = vsel %vm26_vm0, %v3875_v27, %v656_v40 }
 0x17b   :  { %v970_v44 = vpop.permute.xlu1 %969 }
 0x17c   :  { %v908_v47 = vpop.permute.xlu0 %907  ;;  %v1218_v61 = vsel %vm1205_vm8, %v1201_v59, %v970_v44 }
 0x17d   :  { %v1202_v0 = vsel %vm1188_vm7, %v1185_v3, %v908_v47 }
 0x17f   :  { %v782_v45 = vpop.permute.xlu1 %781 }
 0x180   :  { %v720_v48 = vpop.permute.xlu0 %719  ;;  %v1169_v26 = vsel %vm1154_vm5, %v1152_v22, %v782_v45 }
 0x181   :  { %v1153_v14 = vsel %vm1137_vm4, %v1136_v10, %v720_v48 }
 0x183   :  { %v1034_v50 = vpop.permute.xlu1 %1033 }
 0x184   :  { %v972_v52 = vpop.permute.xlu0 %971  ;;  %v1235_v55 = vsel %vm1222_vm9, %v1218_v61, %v1034_v50 }
 0x185   :  { %v1219_v36 = vsel %vm1205_vm8, %v1202_v0, %v972_v52 }
 0x187   :  { %v846_v11 = vpop.permute.xlu1 %845 }
 0x188   :  { %v784_v25 = vpop.permute.xlu0 %783  ;;  %v1186_v20 = vsel %vm1171_vm6, %v1169_v26, %v846_v11 }
 0x189   :  { %v1170_v49 = vsel %vm1154_vm5, %v1153_v14, %v784_v25 }
 0x18b   :  { %v1098_v19 = vpop.permute.xlu1 %1097 }
 0x18c   :  { %v1036_v1 = vpop.permute.xlu0 %1035  ;;  %v1252_v43 = vsel %vm1239_vm10, %v1235_v55, %v1098_v19 }
 0x18d   :  { %2946 = vmatprep.mubr.msk.f32.mxu0 %vm1265_vm11, %v1252_v43  ;;  %v1236_v5 = vsel %vm1222_vm9, %v1219_v36, %v1036_v1 }
 0x18f   :  { %v910_v29 = vpop.permute.xlu1 %909 }
 0x190   :  { %v848_v42 = vpop.permute.xlu0 %847  ;;  %v1203_v58 = vsel %vm1188_vm7, %v1186_v20, %v910_v29 }
 0x191   :  { %v1187_v18 = vsel %vm1171_vm6, %v1170_v49, %v848_v42  ;;  %vm2470_vm6 = vcmask 1043456  }
 0x193   :  { %v912_v7 = vpop.permute.xlu1 %911 }
 0x194   :  { %v1100_v56 = vpop.permute.xlu0 %1099  ;;  %v1204_v28 = vsel %vm1188_vm7, %v1187_v18, %v912_v7 }
 0x195   :  { %v1253_v9 = vsel %vm1239_vm10, %v1236_v5, %v1100_v56  ;;  %v2930_v62 = vpop.f32.mrf.mxu0 }
 0x196   :  { %2947 = vmatmul.mubr.msk.f32.gmra.mxu0 %vm1265_vm11, %v1253_v9  ;;  %v1467_v34 = vmul.f32 %v2930_v62, %v4148_v12 }
 0x197   :  { %v976_v16 = vpop.permute.xlu1 %975  ;;  %v1380_v15 = vpop.f32.mrf.mxu0 }
 0x198   :  { %v974_v17 = vpop.permute.xlu0 %973  ;;  %v1490_v6 = vadd.f32 %v4154_v13, %v1467_v34  ;;  %v1466_v46 = vmul.f32 %v4148_v12, %v1380_v15  ;;  %v1221_v8 = vsel %vm1205_vm8, %v1204_v28, %v976_v16  ;;  %v2420_v28 = vld [vmem:[%s4805_s2 + $0x68] sm:$0xf] }
 0x199   :  { %v1220_v37 = vsel %vm1205_vm8, %v1203_v58, %v974_v17  ;;  %3004 = vmatprep.subr.msk.mxu1 %vm2470_vm6, %v2420_v28  ;;  %2952 = vmatprep.subr.msk.mxu0 %vm2470_vm6, %v2420_v28 }
 0x19a   :  { %v1522_v23 = vmin.f32 %v1490_v6, 0.0  ;;  %v1489_v27 = vadd.f32 %v4154_v13, %v1466_v46  ;;  %vm1506_vm0 = vcmp.gt.f32.partialorder %v1490_v6, 0.0  ;;  %3018 = vmatpush3.msk.msra.mxu1 %vm2470_vm6, %v2420_v28  ;;  %2953 = vmatpush3.msk.msra.mxu0 %vm2470_vm6, %v2420_v28  ;;  %vm2421_vm6 = vcmask 883712  }
 0x19b   :  { %v1040_v24 = vpop.permute.xlu1 %1039 }
 0x19c   :  { %v1038_v38 = vpop.permute.xlu0 %1037  ;;  %v1539_v60 = vmul.f32 1.442695, %v1522_v23  ;;  %v1521_v31 = vmin.f32 %v1489_v27, 0.0  ;;  %v1238_v32 = vsel %vm1222_vm9, %v1221_v8, %v1040_v24  ;;  %vm1505_vm15 = vcmp.gt.f32.partialorder %v1489_v27, 0.0 }
 0x19d   :  { %v1237_v39 = vsel %vm1222_vm9, %v1220_v37, %v1038_v38 }
 0x19e   :  { %3079 = vpow2.f32 %v1539_v60  ;;  %v1537_v4 = vmul.f32 1.442695, %v1521_v31  ;;  %v2419_v31 = vld [vmem:[%s4805_s2 + $0x60] sm:$0xff] }
 0x19f   :  { %v1104_v51 = vpop.permute.xlu1 %1103  ;;  %3005 = vmatprep.subr.mxu1 %v2419_v31  ;;  %2954 = vmatprep.subr.mxu0 %v2419_v31 }
 0x1a0   :  { %v1102_v21 = vpop.permute.xlu0 %1101  ;;  %v1255_v30 = vsel %vm1239_vm10, %v1238_v32, %v1104_v51  ;;  %3081 = vpow2.f32 %v1537_v4  ;;  %3019 = vmatpush3.msra.mxu1 %v2419_v31  ;;  %v2418_v51 = vld [vmem:[%s4805_s2 + $0x58] sm:$0xff]  ;;  %2955 = vmatpush3.msra.mxu0 %v2419_v31 }
 0x1a1   :  { %v1254_v40 = vsel %vm1239_vm10, %v1237_v39, %v1102_v21  ;;  %3006 = vmatprep.subr.mxu1 %v2418_v51  ;;  %2956 = vmatprep.subr.mxu0 %v2418_v51 }
 0x1a2   :  { %2949 = vmatprep.mubr.msk.f32.mxu0 %vm1265_vm11, %v1254_v40  ;;  %3020 = vmatpush3.msra.mxu1 %v2418_v51  ;;  %v2417_v40 = vld [vmem:[%s4805_s2 + $0x50] sm:$0xff] }
 0x1a3   :  { %2950 = vmatmul.mubr.msk.f32.gmra.mxu0 %vm1265_vm11, %v1255_v30  ;;  %3007 = vmatprep.subr.mxu1 %v2417_v40 }
 0x1a4   :  { %2957 = vmatpush3.msra.mxu0 %v2418_v51  ;;  %3021 = vmatpush3.msra.mxu1 %v2417_v40 }
 0x1a5   :  { %2958 = vmatprep.subr.mxu0 %v2417_v40 }
 0x1a6   :  { %2959 = vmatpush3.msra.mxu0 %v2417_v40 }
 0x1ab   :  { %v3080_v44 = vpop.eup %3079 }
 0x1ac   :  { %v2823_v47 = vadd.f32 -1.0, %v3080_v44 }
 0x1ad   :  { %v3082_v45 = vpop.eup %3081 }
 0x1ae   :  { %v1586_v48 = vsel %vm1506_vm0, %v1490_v6, %v2823_v47  ;;  %v2822_v33 = vadd.f32 -1.0, %v3082_v45  ;;  %v2416_v47 = vld [vmem:[%s4805_s2 + $0x48] sm:$0xff] }
 0x1af   :  { %1603 = vst.msk [vmem:[#allocation3 + $0x21] sm:$0xff] %vm78_vm12, %v1586_v48  ;;  %3008 = vmatprep.subr.mxu1 %v2416_v47  ;;  %2960 = vmatprep.subr.mxu0 %v2416_v47 }
 0x1b0   :  { %v1585_v50 = vsel %vm1505_vm15, %v1489_v27, %v2822_v33  ;;  %3022 = vmatpush3.msra.mxu1 %v2416_v47  ;;  %2961 = vmatpush3.msra.mxu0 %v2416_v47 }
 0x1b1   :  { %1602 = vst.msk [vmem:[#allocation3 + $0x11] sm:$0xff] %vm78_vm12, %v1585_v50  ;;  %v2415_v50 = vld [vmem:[%s4805_s2 + $0x40] sm:$0xff] }
 0x1b2   :  { %3009 = vmatprep.subr.mxu1 %v2415_v50  ;;  %2962 = vmatprep.subr.mxu0 %v2415_v50 }
 0x1b3   :  { %3023 = vmatpush3.msra.mxu1 %v2415_v50  ;;  %2963 = vmatpush3.msra.mxu0 %v2415_v50 }
 0x1b5   :  { %v2933_v52 = vpop.f32.mrf.mxu0 }
 0x1b6   :  { %v1469_v53 = vmul.f32 %v2933_v52, %v4148_v12  ;;  %v4183_v54 = vld [vmem:[#allocation3 + $0x20] sm:$0xff] }
 0x1b7   :  { %v1636_v11 = vld [vmem:[#allocation3 + $0x21] sm:$0xff]  ;;  %1909 = vrot.lane.b32.xlu1 %v4183_v54, %s3125_s5  ;;  %v1390_v25 = vpop.f32.mrf.mxu0 }
 0x1b8   :  { %1783 = vrot.lane.b32.xlu0 %v1636_v11, %s3121_s0  ;;  %v1492_v57 = vadd.f32 %v4154_v13, %v1469_v53  ;;  %v1468_v59 = vmul.f32 %v4148_v12, %v1390_v25  ;;  %v4191_v55 = vld [vmem:[#allocation3 + $0x22] sm:$0xff]  ;;  %v1698_v63 = vld [vmem:[#allocation3 + $0x12] sm:$0xff] }
 0x1b9   :  { %v1635_v2 = vld [vmem:[#allocation3 + $0x11] sm:$0xff] }
 0x1ba   :  { %v1524_v61 = vmin.f32 %v1492_v57, 0.0  ;;  %v1491_v41 = vadd.f32 %v4154_v13, %v1468_v59  ;;  %vm1508_vm1 = vcmp.gt.f32.partialorder %v1492_v57, 0.0  ;;  %v1666_v5 = vld [vmem:[#allocation3 + $0x10] sm:$0xff]  ;;  %v2414_v53 = vld [vmem:[%s4805_s2 + $0x38] sm:$0xff] }
 0x1bb   :  { %2037 = vrot.lane.b32.xlu1 %v4191_v55, %s3126_s6  ;;  %3010 = vmatprep.subr.mxu1 %v2414_v53  ;;  %v2413_v25 = vld [vmem:[%s4805_s2 + $0x30] sm:$0xff] }
 0x1bc   :  { %1847 = vrot.lane.b32.xlu0 %v4191_v55, %s3115_s8  ;;  %v1543_v19 = vmul.f32 1.442695, %v1524_v61  ;;  %v1523_v1 = vmin.f32 %v1491_v41, 0.0  ;;  %vm1507_vm2 = vcmp.gt.f32.partialorder %v1491_v41, 0.0  ;;  %3024 = vmatpush3.msra.mxu1 %v2414_v53  ;;  %v2411_v61 = vld [vmem:[%s4805_s2 + $0x20] sm:$0xff] }
 0x1bd   :  { %2964 = vmatprep.subr.mxu0 %v2414_v53  ;;  %3011 = vmatprep.subr.mxu1 %v2413_v25 }
 0x1be   :  { %3083 = vpow2.f32 %v1543_v19  ;;  %v1541_v43 = vmul.f32 1.442695, %v1523_v1  ;;  %2965 = vmatpush3.msra.mxu0 %v2414_v53  ;;  %3025 = vmatpush3.msra.mxu1 %v2413_v25  ;;  %v2410_v1 = vld [vmem:[%s4805_s2 + $0x18] sm:$0xff] }
 0x1bf   :  { %2099 = vrot.lane.b32.xlu1 %v4183_v54, %s3122_s16  ;;  %2966 = vmatprep.subr.mxu0 %v2413_v25 }
 0x1c0   :  { %1973 = vrot.lane.b32.xlu0 %v1636_v11, %s3118_s25  ;;  %3085 = vpow2.f32 %v1541_v43  ;;  %2967 = vmatpush3.msra.mxu0 %v2413_v25 }
 0x1c3   :  { %2163 = vrot.lane.b32.xlu1 %v1636_v11, %s3124_s9 }
 0x1c4   :  { %2035 = vrot.lane.b32.xlu0 %v1698_v63, %s3126_s6 }
 0x1c7   :  { %1781 = vrot.lane.b32.xlu1 %v1635_v2, %s3121_s0 }
 0x1cb   :  { %v3084_v29 = vpop.eup %3083  ;;  %1845 = vrot.lane.b32.xlu1 %v1698_v63, %s3115_s8 }
 0x1cc   :  { %v2825_v42 = vadd.f32 -1.0, %v3084_v29 }
 0x1cd   :  { %v3086_v3 = vpop.eup %3085 }
 0x1ce   :  { %v1588_v0 = vsel %vm1508_vm1, %v1492_v57, %v2825_v42  ;;  %v2824_v36 = vadd.f32 -1.0, %v3086_v3  ;;  %v2412_v57 = vld [vmem:[%s4805_s2 + $0x28] sm:$0xff]  ;;  %v2409_v42 = vld [vmem:[%s4805_s2 + $0x10] sm:$0xff]  ;;  %vm2307_vm1 = vcmask 293888  }
 0x1cf   :  { %1605 = vst.msk [vmem:[#allocation3 + $0x41] sm:$0xff] %vm78_vm12, %v1588_v0  ;;  %1907 = vrot.lane.b32.xlu1 %v1666_v5, %s3125_s5  ;;  %3012 = vmatprep.subr.mxu1 %v2412_v57  ;;  %v2408_v0 = vld [vmem:[%s4805_s2 + $0x8] sm:$0xff]  ;;  %v2407_v5 = vld [vmem:[%s4805_s2] sm:$0xff] }
 0x1d0   :  { %v1587_v7 = vsel %vm1507_vm2, %v1491_v41, %v2824_v36  ;;  %3026 = vmatpush3.msra.mxu1 %v2412_v57  ;;  %2968 = vmatprep.subr.mxu0 %v2412_v57  ;;  %v4325_v36 = vpop.permute.xlu1 %1795  ;;  %vm2340_vm2 = vcmask 490496  }
 0x1d1   :  { %1604 = vst.msk [vmem:[#allocation3 + $0x31] sm:$0xff] %vm78_vm12, %v1587_v7  ;;  %3013 = vmatprep.subr.mxu1 %v2411_v61  ;;  %2969 = vmatpush3.msra.mxu0 %v2412_v57 }
 0x1d2   :  { %3027 = vmatpush3.msra.mxu1 %v2411_v61  ;;  %2970 = vmatprep.subr.mxu0 %v2411_v61 }
 0x1d3   :  { %1971 = vrot.lane.b32.xlu1 %v1635_v2, %s3118_s25  ;;  %3014 = vmatprep.subr.mxu1 %v2410_v1 }
 0x1d4   :  { %2971 = vmatpush3.msra.mxu0 %v2411_v61  ;;  %3028 = vmatpush3.msra.mxu1 %v2410_v1 }
 0x1d5   :  { %v2936_v56 = vpop.f32.mrf.mxu0  ;;  %2972 = vmatprep.subr.mxu0 %v2410_v1  ;;  %3015 = vmatprep.subr.mxu1 %v2409_v42 }
 0x1d6   :  { %v1471_v9 = vmul.f32 %v2936_v56, %v4148_v12  ;;  %v1685_v62 = vld [vmem:[#allocation3 + $0x41] sm:$0xff]  ;;  %2973 = vmatpush3.msra.mxu0 %v2410_v1  ;;  %3029 = vmatpush3.msra.mxu1 %v2409_v42 }
 0x1d7   :  { %v4209_v35 = vld [vmem:[#allocation3 + $0x40] sm:$0xff]  ;;  %1977 = vrot.lane.b32.xlu0 %v1685_v62, %s3118_s25  ;;  %v1400_v10 = vpop.f32.mrf.mxu0  ;;  %2974 = vmatprep.subr.mxu0 %v2409_v42 }
 0x1d8   :  { %1913 = vrot.lane.b32.xlu1 %v4209_v35, %s3125_s5  ;;  %v1494_v34 = vadd.f32 %v4154_v13, %v1471_v9  ;;  %v1470_v16 = vmul.f32 %v4148_v12, %v1400_v10  ;;  %v1701_v6 = vld [vmem:[#allocation3 + $0x42] sm:$0xff]  ;;  %v4219_v26 = vld [vmem:[#allocation3 + $0x30] sm:$0xff]  ;;  %3016 = vmatprep.subr.mxu1 %v2408_v0 }
 0x1d9   :  { %v4224_v49 = vld [vmem:[#allocation3 + $0x31] sm:$0xff]  ;;  %2975 = vmatpush3.msra.mxu0 %v2409_v42  ;;  %3030 = vmatpush3.msra.mxu1 %v2408_v0 }
 0x1da   :  { %v1526_v17 = vmin.f32 %v1494_v34, 0.0  ;;  %v1493_v15 = vadd.f32 %v4154_v13, %v1470_v16  ;;  %vm1510_vm3 = vcmp.gt.f32.partialorder %v1494_v34, 0.0  ;;  %v4236_v58 = vld [vmem:[#allocation3 + $0x32] sm:$0xff]  ;;  %2976 = vmatprep.subr.mxu0 %v2408_v0  ;;  %3017 = vmatprep.subr.mxu1 %v2407_v5  ;;  %v4340_v16 = vpop.permute.xlu1 %1843 }
 0x1db   :  { %2041 = vrot.lane.b32.xlu0 %v1701_v6, %s3126_s6  ;;  %2977 = vmatpush3.msra.mxu0 %v2408_v0 }
 0x1dc   :  { %1787 = vrot.lane.b32.xlu1 %v1685_v62, %s3121_s0  ;;  %v1547_v46 = vmul.f32 1.442695, %v1526_v17  ;;  %v1525_v22 = vmin.f32 %v1493_v15, 0.0  ;;  %vm1509_vm4 = vcmp.gt.f32.partialorder %v1493_v15, 0.0  ;;  %3031 = vmatpush3.msra.mxu1 %v2407_v5 }
 0x1dd   :  { %2978 = vmatprep.subr.mxu0 %v2407_v5 }
 0x1de   :  { %3087 = vpow2.f32 %v1547_v46  ;;  %v1545_v14 = vmul.f32 1.442695, %v1525_v22  ;;  %2979 = vmatpush3.msra.mxu0 %v2407_v5 }
 0x1df   :  { %1911 = vrot.lane.b32.xlu0 %v4219_v26, %s3125_s5 }
 0x1e0   :  { %1851 = vrot.lane.b32.xlu1 %v1701_v6, %s3115_s8  ;;  %3089 = vpow2.f32 %v1545_v14 }
 0x1e3   :  { %1975 = vrot.lane.b32.xlu0 %v4224_v49, %s3118_s25 }
 0x1e4   :  { %2103 = vrot.lane.b32.xlu1 %v4209_v35, %s3122_s16 }
 0x1e8   :  { %2167 = vrot.lane.b32.xlu1 %v1685_v62, %s3124_s9 }
 0x1eb   :  { %v3088_v23 = vpop.eup %3087 }
 0x1ec   :  { %2231 = vrot.lane.b32.xlu1 %v1701_v6, %s3123_s21  ;;  %v2827_v27 = vadd.f32 -1.0, %v3088_v23  ;;  %v4346_v23 = vpop.permute.xlu1 %2113 }
 0x1ed   :  { %v3090_v24 = vpop.eup %3089 }
 0x1ee   :  { %v1590_v38 = vsel %vm1510_vm3, %v1494_v34, %v2827_v27  ;;  %v2826_v20 = vadd.f32 -1.0, %v3090_v24  ;;  %vm2390_vm3 = vcmask 785408  }
 0x1ef   :  { %1607 = vst.msk [vmem:[#allocation3 + $0x61] sm:$0xff] %vm78_vm12, %v1590_v38 }
 0x1f0   :  { %1785 = vrot.lane.b32.xlu1 %v4224_v49, %s3121_s0  ;;  %v1589_v18 = vsel %vm1509_vm4, %v1493_v15, %v2826_v20  ;;  %v4355_v38 = vpop.permute.xlu1 %2177  ;;  %vm2373_vm4 = vcmask 687104  }
 0x1f1   :  { %1606 = vst.msk [vmem:[#allocation3 + $0x51] sm:$0xff] %vm78_vm12, %v1589_v18 }
 0x1f4   :  { %1849 = vrot.lane.b32.xlu1 %v4236_v58, %s3115_s8 }
 0x1f5   :  { %v2939_v60 = vpop.f32.mrf.mxu0 }
 0x1f6   :  { %v1473_v8 = vmul.f32 %v2939_v60, %v4148_v12  ;;  %v4247_v37 = vld [vmem:[#allocation3 + $0x60] sm:$0xff] }
 0x1f7   :  { %v1410_v4 = vpop.f32.mrf.mxu0  ;;  %1917 = vrot.lane.b32.xlu0 %v4247_v37, %s3125_s5  ;;  %v1640_v44 = vld [vmem:[#allocation3 + $0x61] sm:$0xff] }
 0x1f8   :  { %v4250_v32 = vadd.f32 %v4154_v13, %v1473_v8  ;;  %2039 = vrot.lane.b32.xlu1 %v4236_v58, %s3126_s6  ;;  %v1472_v39 = vmul.f32 %v4148_v12, %v1410_v4  ;;  %v1703_v52 = vld [vmem:[#allocation3 + $0x62] sm:$0xff]  ;;  %v4282_v11 = vld [vmem:[#allocation3 + $0x51] sm:$0xff]  ;;  %v4361_v8 = vpop.permute.xlu0 %1779 }
 0x1f9   :  { %v4293_v59 = vld [vmem:[#allocation3 + $0x52] sm:$0xff] }
 0x1fa   :  { %v1528_v21 = vmin.f32 %v4250_v32, 0.0  ;;  %v4262_v30 = vadd.f32 %v4154_v13, %v1472_v39  ;;  %v4302_v19 = vld [vmem:[#allocation3 + $0x50] sm:$0xff]  ;;  %vm1512_vm7 = vcmp.gt.f32.partialorder %v4250_v32, 0.0 }
 0x1fb   :  { %1791 = vrot.lane.b32.xlu0 %v1640_v44, %s3121_s0 }
 0x1fc   :  { %v1551_v45 = vmul.f32 1.442695, %v1528_v21  ;;  %v1527_v48 = vmin.f32 %v4262_v30, 0.0  ;;  %2101 = vrot.lane.b32.xlu1 %v4219_v26, %s3122_s16  ;;  %vm1511_vm9 = vcmp.gt.f32.partialorder %v4262_v30, 0.0 }
 0x1fe   :  { %3091 = vpow2.f32 %v1551_v45  ;;  %v1549_v33 = vmul.f32 1.442695, %v1527_v48 }
 0x1ff   :  { %2045 = vrot.lane.b32.xlu0 %v1703_v52, %s3126_s6 }
 0x200   :  { %3093 = vpow2.f32 %v1549_v33  ;;  %1981 = vrot.lane.b32.xlu1 %v1640_v44, %s3118_s25 }
 0x203   :  { %1789 = vrot.lane.b32.xlu0 %v4282_v11, %s3121_s0 }
 0x204   :  { %1855 = vrot.lane.b32.xlu1 %v1703_v52, %s3115_s8 }
 0x207   :  { %1853 = vrot.lane.b32.xlu0 %v4293_v59, %s3115_s8 }
 0x208   :  { %2107 = vrot.lane.b32.xlu1 %v4247_v37, %s3122_s16 }
 0x20b   :  { %v3092_v41 = vpop.eup %3091  ;;  %2105 = vrot.lane.b32.xlu0 %v4302_v19, %s3122_s16 }
 0x20c   :  { %v2829_v43 = vadd.f32 -1.0, %v3092_v41  ;;  %2171 = vrot.lane.b32.xlu1 %v1640_v44, %s3124_s9 }
 0x20d   :  { %v3094_v63 = vpop.eup %3093 }
 0x20e   :  { %v1592_v2 = vsel %vm1512_vm7, %v4250_v32, %v2829_v43  ;;  %v2828_v29 = vadd.f32 -1.0, %v3094_v63 }
 0x20f   :  { %1609 = vst.msk [vmem:[#allocation3 + $0x81] sm:$0xff] %vm78_vm12, %v1592_v2  ;;  %2169 = vrot.lane.b32.xlu0 %v4282_v11, %s3124_s9 }
 0x210   :  { %v1591_v3 = vsel %vm1511_vm9, %v4262_v30, %v2828_v29  ;;  %2235 = vrot.lane.b32.xlu1 %v1703_v52, %s3123_s21  ;;  %v4370_v30 = vpop.permute.xlu0 %1859 }
 0x211   :  { %1608 = vst.msk [vmem:[#allocation3 + $0x71] sm:$0xff] %vm78_vm12, %v1591_v3 }
 0x213   :  { %2043 = vrot.lane.b32.xlu0 %v4293_v59, %s3126_s6 }
 0x214   :  { %1915 = vrot.lane.b32.xlu1 %v4302_v19, %s3125_s5  ;;  %v4383_v50 = vpop.permute.xlu0 %2241 }
 0x215   :  { %v2942_v7 = vpop.f32.mrf.mxu0 }
 0x216   :  { %v1475_v56 = vmul.f32 %v2942_v7, %v4148_v12  ;;  %v1673_v9 = vld [vmem:[#allocation3 + $0x80] sm:$0xff] }
 0x217   :  { %v1420_v62 = vpop.f32.mrf.mxu0  ;;  %1921 = vrot.lane.b32.xlu0 %v1673_v9, %s3125_s5  ;;  %v1689_v6 = vld [vmem:[#allocation3 + $0x81] sm:$0xff] }
 0x218   :  { %v1498_v10 = vadd.f32 %v4154_v13, %v1475_v56  ;;  %1979 = vrot.lane.b32.xlu1 %v4282_v11, %s3118_s25  ;;  %v1474_v34 = vmul.f32 %v4148_v12, %v1420_v62  ;;  %v1705_v27 = vld [vmem:[#allocation3 + $0x82] sm:$0xff]  ;;  %v4350_v24 = vld [vmem:[#allocation3 + $0x70] sm:$0xff] }
 0x219   :  { %v1688_v20 = vld [vmem:[#allocation3 + $0x71] sm:$0xff] }
 0x21a   :  { %v1530_v17 = vmin.f32 %v1498_v10, 0.0  ;;  %v1497_v15 = vadd.f32 %v4154_v13, %v1474_v34  ;;  %v1704_v60 = vld [vmem:[#allocation3 + $0x72] sm:$0xff]  ;;  %vm1514_vm13 = vcmp.gt.f32.partialorder %v1498_v10, 0.0 }
 0x21b   :  { %1985 = vrot.lane.b32.xlu0 %v1689_v6, %s3118_s25 }
 0x21c   :  { %v1555_v46 = vmul.f32 1.442695, %v1530_v17  ;;  %v1529_v22 = vmin.f32 %v1497_v15, 0.0  ;;  %2233 = vrot.lane.b32.xlu1 %v4293_v59, %s3123_s21  ;;  %vm1513_vm14 = vcmp.gt.f32.partialorder %v1497_v15, 0.0 }
 0x21e   :  { %3095 = vpow2.f32 %v1555_v46  ;;  %v1553_v14 = vmul.f32 1.442695, %v1529_v22 }
 0x21f   :  { %2111 = vrot.lane.b32.xlu0 %v1673_v9, %s3122_s16 }
 0x220   :  { %3097 = vpow2.f32 %v1553_v14  ;;  %2049 = vrot.lane.b32.xlu1 %v1705_v27, %s3126_s6 }
 0x223   :  { %2175 = vrot.lane.b32.xlu0 %v1689_v6, %s3124_s9 }
 0x224   :  { %1919 = vrot.lane.b32.xlu1 %v4350_v24, %s3125_s5 }
 0x227   :  { %2239 = vrot.lane.b32.xlu0 %v1705_v27, %s3123_s21 }
 0x228   :  { %1983 = vrot.lane.b32.xlu1 %v1688_v20, %s3118_s25 }
 0x229   :  { %v4359_v18 = vpop.permute.xlu1 %1909 }
 0x22a   :  { %v4394_v41 = vpop.permute.xlu0 %1783 }
 0x22b   :  { %v3096_v28 = vpop.eup %3095  ;;  %1793 = vrot.lane.b32.xlu0 %v1688_v20, %s3121_s0 }
 0x22c   :  { %v2831_v31 = vadd.f32 -1.0, %v3096_v28  ;;  %2047 = vrot.lane.b32.xlu1 %v1704_v60, %s3126_s6 }
 0x22d   :  { %v3098_v4 = vpop.eup %3097  ;;  %v4365_v51 = vpop.permute.xlu1 %2037 }
 0x22e   :  { %v1594_v32 = vsel %vm1514_vm13, %v1498_v10, %v2831_v31  ;;  %v2830_v39 = vadd.f32 -1.0, %v3098_v4  ;;  %v4407_v3 = vpop.permute.xlu0 %1847 }
 0x22f   :  { %1611 = vst.msk [vmem:[#allocation3 + $0xc1] sm:$0xff] %vm78_vm12, %v1594_v32  ;;  %1857 = vrot.lane.b32.xlu0 %v1704_v60, %s3115_s8 }
 0x230   :  { %v1593_v21 = vsel %vm1513_vm14, %v1497_v15, %v2830_v39 }
 0x231   :  { %1610 = vst.msk [vmem:[#allocation3 + $0xb1] sm:$0xff] %vm78_vm12, %v1593_v21  ;;  %v4372_v40 = vpop.permute.xlu1 %2099 }
 0x232   :  { %v4415_v5 = vpop.permute.xlu0 %1973 }
 0x233   :  { %2109 = vrot.lane.b32.xlu0 %v4350_v24, %s3122_s16 }
 0x235   :  { %v2945_v44 = vpop.f32.mrf.mxu0  ;;  %v4376_v47 = vpop.permute.xlu1 %2163 }
 0x236   :  { %v1477_v45 = vmul.f32 %v2945_v44, %v4148_v12  ;;  %v4379_v48 = vld [vmem:[#allocation3 + $0xc1] sm:$0xff]  ;;  %v4424_v6 = vpop.permute.xlu0 %2035 }
 0x237   :  { %1799 = vrot.lane.b32.xlu1 %v4379_v48, %s3121_s0  ;;  %v1430_v33 = vpop.f32.mrf.mxu0  ;;  %2173 = vrot.lane.b32.xlu0 %v1688_v20, %s3124_s9  ;;  %v4398_v2 = vld [vmem:[#allocation3 + $0xc0] sm:$0xff] }
 0x238   :  { %v1500_v52 = vadd.f32 %v4154_v13, %v1477_v45  ;;  %v1476_v53 = vmul.f32 %v4148_v12, %v1430_v33  ;;  %v1706_v63 = vld [vmem:[#allocation3 + $0xb2] sm:$0xff]  ;;  %v4405_v42 = vld [vmem:[#allocation3 + $0xc2] sm:$0xff] }
 0x239   :  { %v4389_v57 = vpop.permute.xlu1 %1781  ;;  %v1643_v15 = vld [vmem:[#allocation3 + $0xb1] sm:$0xff] }
 0x23a   :  { %v1532_v11 = vmin.f32 %v1500_v52, 0.0  ;;  %v1499_v25 = vadd.f32 %v4154_v13, %v1476_v53  ;;  %vm1516_vm0 = vcmp.gt.f32.partialorder %v1500_v52, 0.0 }
 0x23b   :  { %1989 = vrot.lane.b32.xlu1 %v4379_v48, %s3118_s25  ;;  %2237 = vrot.lane.b32.xlu0 %v1704_v60, %s3123_s21  ;;  %v4434_v60 = vld [vmem:[#allocation3 + $0xb0] sm:$0xff] }
 0x23c   :  { %v1559_v59 = vmul.f32 1.442695, %v1532_v11  ;;  %v1531_v61 = vmin.f32 %v1499_v25, 0.0  ;;  %vm1515_vm15 = vcmp.gt.f32.partialorder %v1499_v25, 0.0 }
 0x23d   :  { %v4396_v43 = vpop.permute.xlu1 %1845 }
 0x23e   :  { %3099 = vpow2.f32 %v1559_v59  ;;  %v1557_v1 = vmul.f32 1.442695, %v1531_v61 }
 0x23f   :  { %2051 = vrot.lane.b32.xlu1 %v1706_v63, %s3126_s6  ;;  %1925 = vrot.lane.b32.xlu0 %v4398_v2, %s3125_s5 }
 0x240   :  { %3101 = vpow2.f32 %v1557_v1 }
 0x241   :  { %v4403_v29 = vpop.permute.xlu1 %1907 }
 0x243   :  { %1863 = vrot.lane.b32.xlu0 %v4405_v42, %s3115_s8 }
 0x245   :  { %v4411_v0 = vpop.permute.xlu1 %1971 }
 0x247   :  { %2053 = vrot.lane.b32.xlu0 %v4405_v42, %s3126_s6 }
 0x249   :  { %v4430_v14 = vpop.permute.xlu0 %1977 }
 0x24a   :  { %v4417_v7 = vpop.permute.xlu1 %1913 }
 0x24b   :  { %v3100_v56 = vpop.eup %3099  ;;  %2115 = vrot.lane.b32.xlu0 %v4398_v2, %s3122_s16 }
 0x24c   :  { %v2833_v9 = vadd.f32 -1.0, %v3100_v56 }
 0x24d   :  { %v3102_v62 = vpop.eup %3101  ;;  %v4446_v21 = vpop.permute.xlu0 %2041 }
 0x24e   :  { %v1596_v10 = vsel %vm1516_vm0, %v1500_v52, %v2833_v9  ;;  %v2832_v34 = vadd.f32 -1.0, %v3102_v62  ;;  %v4421_v17 = vpop.permute.xlu1 %1787 }
 0x24f   :  { %1613 = vst.msk [vmem:[#allocation3 + $0xe1] sm:$0xff] %vm78_vm12, %v1596_v10  ;;  %1797 = vrot.lane.b32.xlu0 %v1643_v15, %s3121_s0 }
 0x250   :  { %v1595_v46 = vsel %vm1515_vm15, %v1499_v25, %v2832_v34 }
 0x251   :  { %1612 = vst.msk [vmem:[#allocation3 + $0xd1] sm:$0xff] %vm78_vm12, %v1595_v46  ;;  %v1912_v1 = vpop.permute.xlu0 %1911 }
 0x252   :  { %v4428_v22 = vpop.permute.xlu1 %1851 }
 0x253   :  { %1861 = vrot.lane.b32.xlu0 %v1706_v63, %s3115_s8 }
 0x255   :  { %v1976_v46 = vpop.permute.xlu0 %1975 }
 0x256   :  { %v2948_v27 = vpop.f32.mrf.mxu0  ;;  %v2104_v20 = vpop.permute.xlu1 %2103  ;;  %v4462_v63 = vld [vmem:[#allocation3 + $0xe0] sm:$0xff] }
 0x257   :  { %v1479_v28 = vmul.f32 %v2948_v27, %v4148_v12  ;;  %1923 = vrot.lane.b32.xlu0 %v4434_v60, %s3125_s5 }
 0x258   :  { %v1440_v31 = vpop.f32.mrf.mxu0  ;;  %v4442_v39 = vld [vmem:[#allocation3 + $0xd1] sm:$0xff] }
 0x259   :  { %v4437_v4 = vadd.f32 %v4154_v13, %v1479_v28  ;;  %v1478_v32 = vmul.f32 %v4148_v12, %v1440_v31  ;;  %1801 = vrot.lane.b32.xlu1 %v4442_v39, %s3121_s0  ;;  %v4454_v11 = vld [vmem:[#allocation3 + $0xd2] sm:$0xff]  ;;  %v2277_v28 = vsel %vm78_vm12, %v4183_v54, %v4394_v41 }
 0x25a   :  { %v2168_v33 = vpop.permute.xlu1 %2167  ;;  %v4458_v61 = vld [vmem:[#allocation3 + $0xd0] sm:$0xff] }
 0x25b   :  { %v1534_v44 = vmin.f32 %v4437_v4, 0.0  ;;  %v4450_v45 = vadd.f32 %v4154_v13, %v1478_v32  ;;  %1987 = vrot.lane.b32.xlu0 %v1643_v15, %s3118_s25  ;;  %vm1518_vm7 = vcmp.gt.f32.partialorder %v4437_v4, 0.0 }
 0x25d   :  { %v1563_v52 = vmul.f32 1.442695, %v1534_v44  ;;  %v1533_v53 = vmin.f32 %v4450_v45, 0.0  ;;  %1865 = vrot.lane.b32.xlu1 %v4454_v11, %s3115_s8  ;;  %v2293_v44 = vsel %vm1154_vm5, %v2277_v28, %v4407_v3  ;;  %vm1517_vm9 = vcmp.gt.f32.partialorder %v4450_v45, 0.0 }
 0x25e   :  { %v2232_v59 = vpop.permute.xlu1 %2231 }
 0x25f   :  { %3103 = vpow2.f32 %v1563_v52  ;;  %v1561_v25 = vmul.f32 1.442695, %v1533_v53  ;;  %1927 = vrot.lane.b32.xlu0 %v4458_v61, %s3125_s5 }
 0x261   :  { %3105 = vpow2.f32 %v1561_v25  ;;  %1929 = vrot.lane.b32.xlu1 %v4462_v63, %s3125_s5 }
 0x262   :  { %v4466_v56 = vpop.permute.xlu1 %1785 }
 0x263   :  { %v2951_v9 = vpop.f32.mrf.mxu0  ;;  %2117 = vrot.lane.b32.xlu0 %v4458_v61, %s3122_s16 }
 0x264   :  { %v1481_v62 = vmul.f32 %v2951_v9, %v4148_v12  ;;  %v1646_v9 = vld [vmem:[#allocation3 + $0xe1] sm:$0xff] }
 0x265   :  { %v1450_v10 = vpop.f32.mrf.mxu0  ;;  %2165 = vrot.lane.b32.xlu1 %v4224_v49, %s3124_s9 }
 0x266   :  { %v4472_v34 = vadd.f32 %v4154_v13, %v1481_v62  ;;  %v1480_v15 = vmul.f32 %v4148_v12, %v1450_v10  ;;  %v4477_v27 = vpop.permute.xlu1 %1849  ;;  %v2310_v12 = vsel %vm2307_vm1, %v2293_v44, %v1912_v1  ;;  %v1662_v44 = vld [vmem:[#allocation3 + $0xe2] sm:$0xff] }
 0x267   :  { %2179 = vrot.lane.b32.xlu0 %v4379_v48, %s3124_s9  ;;  %v2326_v54 = vsel %vm1205_vm8, %v2310_v12, %v1976_v46 }
 0x268   :  { %v1536_v31 = vmin.f32 %v4472_v34, 0.0  ;;  %v1503_v32 = vadd.f32 %v4154_v13, %v1480_v15  ;;  %vm1520_vm13 = vcmp.gt.f32.partialorder %v4472_v34, 0.0 }
 0x269   :  { %2227 = vrot.lane.b32.xlu1 %v4191_v55, %s3123_s21  ;;  %v4492_v53 = vpop.permute.xlu0 %1917 }
 0x26a   :  { %v1567_v49 = vmul.f32 1.442695, %v1536_v31  ;;  %v1535_v52 = vmin.f32 %v1503_v32, 0.0  ;;  %v2040_v41 = vpop.permute.xlu1 %2039  ;;  %vm1519_vm14 = vcmp.gt.f32.partialorder %v1503_v32, 0.0 }
 0x26b   :  { %v2343_v25 = vsel %vm2340_vm2, %v2326_v54, %v2040_v41  ;;  %1991 = vrot.lane.b32.xlu0 %v4442_v39, %s3118_s25 }
 0x26c   :  { %v3104_v13 = vpop.eup %3103  ;;  %3107 = vpow2.f32 %v1567_v49  ;;  %v1565_v3 = vmul.f32 1.442695, %v1535_v52  ;;  %v2359_v1 = vsel %vm1265_vm11, %v2343_v25, %v2104_v20 }
 0x26d   :  { %v2835_v48 = vadd.f32 -1.0, %v3104_v13  ;;  %1803 = vrot.lane.b32.xlu1 %v1646_v9, %s3121_s0  ;;  %v2376_v62 = vsel %vm2373_vm4, %v2359_v1, %v2168_v33  ;;  %v4504_v20 = vpop.permute.xlu0 %1791 }
 0x26e   :  { %v3106_v55 = vpop.eup %3105  ;;  %3109 = vpow2.f32 %v1565_v3  ;;  %v4502_v46 = vpop.permute.xlu1 %2101  ;;  %v2393_v28 = vsel %vm2390_vm3, %v2376_v62, %v2232_v59 }
 0x26f   :  { %v1598_v10 = vsel %vm1518_vm7, %v4437_v4, %v2835_v48  ;;  %v2834_v15 = vadd.f32 -1.0, %v3106_v55  ;;  %2983 = vmatprep.mubr.msk.f32.mxu1 %vm2421_vm6, %v2393_v28  ;;  %2181 = vrot.lane.b32.xlu0 %v4442_v39, %s3124_s9  ;;  %v2279_v28 = vsel %vm78_vm12, %v4209_v35, %v4421_v17 }
 0x270   :  { %1615 = vst.msk [vmem:[#allocation3 + $0x101] sm:$0xff] %vm78_vm12, %v1598_v10 }
 0x271   :  { %v1597_v31 = vsel %vm1517_vm9, %v4450_v45, %v2834_v15  ;;  %2055 = vrot.lane.b32.xlu1 %v4454_v11, %s3126_s6  ;;  %v4518_v33 = vpop.permute.xlu0 %2045 }
 0x272   :  { %1614 = vst.msk [vmem:[#allocation3 + $0xf1] sm:$0xff] %vm78_vm12, %v1597_v31  ;;  %v4516_v4 = vpop.permute.xlu1 %1981 }
 0x273   :  { %2243 = vrot.lane.b32.xlu0 %v4405_v42, %s3123_s21 }
 0x275   :  { %2245 = vrot.lane.b32.xlu1 %v4454_v11, %s3123_s21  ;;  %v4526_v45 = vpop.permute.xlu0 %1789 }
 0x276   :  { %v4524_v59 = vpop.permute.xlu1 %1855 }
 0x277   :  { %1993 = vrot.lane.b32.xlu0 %v1646_v9, %s3118_s25 }
 0x279   :  { %v3108_v39 = vpop.eup %3107  ;;  %1867 = vrot.lane.b32.xlu1 %v1662_v44, %s3115_s8  ;;  %v4531_v54 = vpop.permute.xlu0 %1853  ;;  %v1647_v25 = vld [vmem:[#allocation3 + $0xf1] sm:$0xff] }
 0x27a   :  { %v2837_v12 = vadd.f32 -1.0, %v3108_v39  ;;  %v2108_v52 = vpop.permute.xlu1 %2107  ;;  %v4541_v48 = vld [vmem:[#allocation3 + $0xf0] sm:$0xff] }
 0x27b   :  { %v3110_v49 = vpop.eup %3109  ;;  %2229 = vrot.lane.b32.xlu0 %v4236_v58, %s3123_s21  ;;  %v2278_v58 = vsel %vm78_vm12, %v4219_v26, %v4466_v56  ;;  %v1663_v15 = vld [vmem:[#allocation3 + $0xf2] sm:$0xff]  ;;  %v2295_v26 = vsel %vm1154_vm5, %v2279_v28, %v4428_v22 }
 0x27c   :  { %v1600_v42 = vsel %vm1520_vm13, %v4472_v34, %v2837_v12  ;;  %v2836_v11 = vadd.f32 -1.0, %v3110_v49  ;;  %v2294_v1 = vsel %vm1154_vm5, %v2278_v58, %v4477_v27 }
 0x27d   :  { %1617 = vst.msk [vmem:[#allocation3 + $0x121] sm:$0xff] %vm78_vm12, %v1600_v42  ;;  %2119 = vrot.lane.b32.xlu1 %v4462_v63, %s3122_s16  ;;  %v2106_v3 = vpop.permute.xlu0 %2105  ;;  %v2311_v55 = vsel %vm2307_vm1, %v2294_v1, %v4417_v7 }
 0x27e   :  { %v1599_v41 = vsel %vm1519_vm14, %v1503_v32, %v2836_v11  ;;  %v2172_v13 = vpop.permute.xlu1 %2171  ;;  %v2327_v56 = vsel %vm1205_vm8, %v2311_v55, %v4430_v14 }
 0x27f   :  { %1616 = vst.msk [vmem:[#allocation3 + $0x111] sm:$0xff] %vm78_vm12, %v1599_v41  ;;  %1805 = vrot.lane.b32.xlu0 %v1647_v25, %s3121_s0  ;;  %v2344_v39 = vsel %vm2340_vm2, %v2327_v56, %v4446_v21  ;;  %v4576_v21 = vld [vmem:[#allocation3 + $0x100] sm:$0xff] }
 0x280   :  { %v2360_v17 = vsel %vm1265_vm11, %v2344_v39, %v2106_v3 }
 0x281   :  { %1931 = vrot.lane.b32.xlu1 %v4541_v48, %s3125_s5  ;;  %v2170_v32 = vpop.permute.xlu0 %2169 }
 0x282   :  { %v2236_v34 = vpop.permute.xlu1 %2235  ;;  %v2377_v14 = vsel %vm2373_vm4, %v2360_v17, %v2170_v32 }
 0x283   :  { %2057 = vrot.lane.b32.xlu0 %v1662_v44, %s3126_s6 }
 0x285   :  { %2183 = vrot.lane.b32.xlu1 %v1646_v9, %s3124_s9  ;;  %v2044_v10 = vpop.permute.xlu0 %2043 }
 0x286   :  { %v1916_v62 = vpop.permute.xlu1 %1915 }
 0x287   :  { %1869 = vrot.lane.b32.xlu0 %v1663_v15, %s3115_s8  ;;  %v2312_v27 = vsel %vm2307_vm1, %v2295_v26, %v1916_v62  ;;  %v1649_v62 = vld [vmem:[#allocation3 + $0x111] sm:$0xff]  ;;  %v2281_v26 = vsel %vm78_vm12, %v4247_v37, %v4504_v20 }
 0x289   :  { %1995 = vrot.lane.b32.xlu1 %v1647_v25, %s3118_s25  ;;  %v1922_v9 = vpop.permute.xlu0 %1921 }
 0x28a   :  { %v1980_v7 = vpop.permute.xlu1 %1979 }
 0x28b   :  { %v2328_v31 = vsel %vm1205_vm8, %v2312_v27, %v1980_v7  ;;  %2121 = vrot.lane.b32.xlu0 %v4541_v48, %s3122_s16  ;;  %v2297_v7 = vsel %vm1154_vm5, %v2281_v26, %v4524_v59  ;;  %v1665_v59 = vld [vmem:[#allocation3 + $0x112] sm:$0xff]  ;;  %v1618_v26 = vld [vmem:[#allocation3] sm:$0xff] }
 0x28c   :  { %v2345_v35 = vsel %vm2340_vm2, %v2328_v31, %v2044_v10  ;;  %v2280_v10 = vsel %vm78_vm12, %v4302_v19, %v4526_v45 }
 0x28d   :  { %v2361_v22 = vsel %vm1265_vm11, %v2345_v35, %v2108_v52  ;;  %2247 = vrot.lane.b32.xlu1 %v1662_v44, %s3123_s21  ;;  %v1986_v49 = vpop.permute.xlu0 %1985  ;;  %v1695_v52 = vld [vmem:[#allocation3 + $0x101] sm:$0xff]  ;;  %v2296_v56 = vsel %vm1154_vm5, %v2280_v10, %v4531_v54 }
 0x28e   :  { %v2234_v12 = vpop.permute.xlu1 %2233  ;;  %v2378_v42 = vsel %vm2373_vm4, %v2361_v22, %v2172_v13  ;;  %v2313_v37 = vsel %vm2307_vm1, %v2296_v56, %v4492_v53 }
 0x28f   :  { %v2394_v11 = vsel %vm2390_vm3, %v2377_v14, %v2234_v12  ;;  %v2395_v41 = vsel %vm2390_vm3, %v2378_v42, %v2236_v34  ;;  %1933 = vrot.lane.b32.xlu0 %v4576_v21, %s3125_s5  ;;  %v1664_v34 = vld [vmem:[#allocation3 + $0x102] sm:$0xff] }
 0x290   :  { %2984 = vmatmul.mubr.msk.f32.vlgmr.msra.gmra.mxu1 %vm2421_vm6, %v2394_v11 }
 0x291   :  { %2986 = vmatprep.mubr.msk.f32.mxu1 %vm2421_vm6, %v2395_v41  ;;  %1997 = vrot.lane.b32.xlu1 %v1695_v52, %s3118_s25  ;;  %v2112_v3 = vpop.permute.xlu0 %2111  ;;  %v1681_v41 = vld [vmem:[#allocation3 + $0x120] sm:$0xff] }
 0x292   :  { %v2050_v44 = vpop.permute.xlu1 %2049 }
 0x293   :  { %2185 = vrot.lane.b32.xlu0 %v1647_v25, %s3124_s9  ;;  %v4592_v25 = vld [vmem:[#allocation3 + $0x110] sm:$0xff] }
 0x295   :  { %2249 = vrot.lane.b32.xlu1 %v1663_v15, %s3123_s21  ;;  %v2176_v13 = vpop.permute.xlu0 %2175 }
 0x296   :  { %v1920_v58 = vpop.permute.xlu1 %1919 }
 0x297   :  { %1807 = vrot.lane.b32.xlu0 %v1695_v52, %s3121_s0  ;;  %v2314_v19 = vsel %vm2307_vm1, %v2297_v7, %v1920_v58  ;;  %v1730_v58 = vld [vmem:[#allocation3 + $0x130] sm:$0xff]  ;;  %v2275_v7 = vsel %vm78_vm12, %v1618_v26, %v4361_v8  ;;  %v1626_v8 = vld [vmem:[#allocation3 + $0xa0] sm:$0xff] }
 0x299   :  { %1871 = vrot.lane.b32.xlu1 %v1664_v34, %s3115_s8  ;;  %v2240_v32 = vpop.permute.xlu0 %2239 }
 0x29a   :  { %v1984_v1 = vpop.permute.xlu1 %1983 }
 0x29b   :  { %2059 = vrot.lane.b32.xlu0 %v1663_v15, %s3126_s6 }
 0x29d   :  { %2123 = vrot.lane.b32.xlu1 %v4576_v21, %s3122_s16  ;;  %v1794_v55 = vpop.permute.xlu0 %1793 }
 0x29e   :  { %v2282_v15 = vsel %vm78_vm12, %v4350_v24, %v1794_v55  ;;  %v2048_v31 = vpop.permute.xlu1 %2047  ;;  %v2330_v24 = vsel %vm1205_vm8, %v2314_v19, %v1984_v1  ;;  %v1762_v55 = vld [vmem:[#allocation3 + $0x132] sm:$0xff]  ;;  %v2291_v19 = vsel %vm1154_vm5, %v2275_v7, %v4340_v16  ;;  %v2283_v16 = vsel %vm78_vm12, %v1626_v8, %v4325_v36 }
 0x29f   :  { %1809 = vrot.lane.b32.xlu0 %v1649_v62, %s3121_s0  ;;  %v2347_v45 = vsel %vm2340_vm2, %v2330_v24, %v2048_v31 }
 0x2a0   :  { %v2363_v35 = vsel %vm1265_vm11, %v2347_v45, %v2112_v3  ;;  %v1713_v3 = vld [vmem:[#allocation3 + $0x122] sm:$0xff] }
 0x2a1   :  { %1935 = vrot.lane.b32.xlu1 %v4592_v25, %s3125_s5  ;;  %v1858_v28 = vpop.permute.xlu0 %1857  ;;  %v2380_v12 = vsel %vm2373_vm4, %v2363_v35, %v2176_v13 }
 0x2a2   :  { %v2298_v27 = vsel %vm1154_vm5, %v2282_v15, %v1858_v28 }
 0x2a3   :  { %v2315_v39 = vsel %vm2307_vm1, %v2298_v27, %v1922_v9  ;;  %2061 = vrot.lane.b32.xlu0 %v1664_v34, %s3126_s6  ;;  %v2329_v9 = vsel %vm1205_vm8, %v2313_v37, %v4516_v4  ;;  %v2308_v37 = vsel %vm2307_vm1, %v2291_v19, %v4403_v29 }
 0x2a4   :  { %v2331_v54 = vsel %vm1205_vm8, %v2315_v39, %v1986_v49  ;;  %v2346_v22 = vsel %vm2340_vm2, %v2329_v9, %v4518_v33  ;;  %v2397_v33 = vsel %vm2390_vm3, %v2380_v12, %v2240_v32  ;;  %v1746_v32 = vld [vmem:[#allocation3 + $0x131] sm:$0xff]  ;;  %v2324_v24 = vsel %vm1205_vm8, %v2308_v37, %v4411_v0 }
 0x2a5   :  { %2187 = vrot.lane.b32.xlu1 %v1695_v52, %s3124_s9  ;;  %v2110_v20 = vpop.permute.xlu0 %2109  ;;  %v2348_v17 = vsel %vm2340_vm2, %v2331_v54, %v2050_v44  ;;  %v2341_v54 = vsel %vm2340_vm2, %v2324_v24, %v4424_v6 }
 0x2a6   :  { %v2362_v14 = vsel %vm1265_vm11, %v2346_v22, %v2110_v20  ;;  %v2364_v4 = vsel %vm1265_vm11, %v2348_v17, %v4346_v23  ;;  %v2357_v35 = vsel %vm1265_vm11, %v2341_v54, %v4372_v40 }
 0x2a7   :  { %1873 = vrot.lane.b32.xlu0 %v1665_v59, %s3115_s8  ;;  %v2381_v52 = vsel %vm2373_vm4, %v2364_v4, %v4355_v38  ;;  %v2374_v0 = vsel %vm2373_vm4, %v2357_v35, %v4376_v47  ;;  %v3111_v47 = vld [vmem:[#allocation3 + $0x10] sm:$0xff] }
 0x2a8   :  { %v2398_v44 = vsel %vm2390_vm3, %v2381_v52, %v4383_v50 }
 0x2a9   :  { %1999 = vrot.lane.b32.xlu1 %v1649_v62, %s3118_s25  ;;  %v2174_v53 = vpop.permute.xlu0 %2173  ;;  %v4651_v1 = vpop.permute.xlu1 %1799 }
 0x2aa   :  { %v2379_v49 = vsel %vm2373_vm4, %v2362_v14, %v2174_v53  ;;  %v2299_v14 = vsel %vm1154_vm5, %v2283_v16, %v4370_v30  ;;  %v2285_v37 = vsel %vm78_vm12, %v4398_v2, %v4651_v1 }
 0x2ab   :  { %2125 = vrot.lane.b32.xlu0 %v4592_v25, %s3122_s16 }
 0x2ad   :  { %2251 = vrot.lane.b32.xlu1 %v1664_v34, %s3123_s21  ;;  %v2238_v42 = vpop.permute.xlu0 %2237  ;;  %v1697_v34 = vld [vmem:[#allocation3 + $0x121] sm:$0xff] }
 0x2ae   :  { %v2396_v11 = vsel %vm2390_vm3, %v2379_v49, %v2238_v42  ;;  %v2276_v49 = vsel %vm78_vm12, %v3111_v47, %v4389_v57 }
 0x2af   :  { %2987 = vmatmul.mubr.msk.f32.gmra.mxu1 %vm2421_vm6, %v2396_v11  ;;  %1937 = vrot.lane.b32.xlu0 %v1681_v41, %s3125_s5 }
 0x2b0   :  { %2989 = vmatprep.mubr.msk.f32.mxu1 %vm2421_vm6, %v2397_v33 }
 0x2b1   :  { %2063 = vrot.lane.b32.xlu1 %v1665_v59, %s3126_s6  ;;  %v1926_v23 = vpop.permute.xlu0 %1925 }
 0x2b3   :  { %2990 = vmatmul.mubr.msk.f32.gmra.mxu1 %vm2421_vm6, %v2398_v44  ;;  %2189 = vrot.lane.b32.xlu0 %v1649_v62, %s3124_s9  ;;  %v1990_v62 = vpop.permute.xlu1 %1989 }
 0x2b5   :  { %2065 = vrot.lane.b32.xlu1 %v1713_v3, %s3126_s6  ;;  %v4647_v13 = vpop.permute.xlu0 %1863 }
 0x2b7   :  { %2001 = vrot.lane.b32.xlu0 %v1697_v34, %s3118_s25  ;;  %v2052_v28 = vpop.permute.xlu1 %2051 }
 0x2b9   :  { %2129 = vrot.lane.b32.xlu1 %v1730_v58, %s3122_s16  ;;  %v2054_v38 = vpop.permute.xlu0 %2053 }
 0x2bb   :  { %2253 = vrot.lane.b32.xlu0 %v1665_v59, %s3123_s21 }
 0x2bd   :  { %2193 = vrot.lane.b32.xlu1 %v1746_v32, %s3124_s9  ;;  %v2116_v50 = vpop.permute.xlu0 %2115 }
 0x2bf   :  { %2127 = vrot.lane.b32.xlu0 %v1681_v41, %s3122_s16  ;;  %v2292_v41 = vsel %vm1154_vm5, %v2276_v49, %v4396_v43 }
 0x2c0   :  { %v2309_v44 = vsel %vm2307_vm1, %v2292_v41, %v4359_v18 }
 0x2c1   :  { %2257 = vrot.lane.b32.xlu1 %v1762_v55, %s3123_s21  ;;  %v1798_v10 = vpop.permute.xlu0 %1797 }
 0x2c2   :  { %v2284_v29 = vsel %vm78_vm12, %v4434_v60, %v1798_v10 }
 0x2c3   :  { %2191 = vrot.lane.b32.xlu0 %v1697_v34, %s3124_s9 }
 0x2c5   :  { %v1862_v15 = vpop.permute.xlu0 %1861 }
 0x2c6   :  { %v2300_v22 = vsel %vm1154_vm5, %v2284_v29, %v1862_v15 }
 0x2c7   :  { %2255 = vrot.lane.b32.xlu0 %v1713_v3, %s3123_s21  ;;  %v2317_v12 = vsel %vm2307_vm1, %v2300_v22, %v1926_v23 }
 0x2c8   :  { %v2333_v11 = vsel %vm1205_vm8, %v2317_v12, %v1990_v62 }
 0x2c9   :  { %v1924_v56 = vpop.permute.xlu0 %1923  ;;  %v2350_v52 = vsel %vm2340_vm2, %v2333_v11, %v2054_v38  ;;  %v2325_v38 = vsel %vm1205_vm8, %v2309_v44, %v4415_v5 }
 0x2ca   :  { %v2316_v40 = vsel %vm2307_vm1, %v2299_v14, %v1924_v56  ;;  %v2342_v62 = vsel %vm2340_vm2, %v2325_v38, %v4365_v51  ;;  %v2301_v51 = vsel %vm1154_vm5, %v2285_v37, %v4647_v13 }
 0x2cb   :  { %v4659_v27 = vpop.permute.xlu1 %1801  ;;  %v2358_v10 = vsel %vm1265_vm11, %v2342_v62, %v4502_v46 }
 0x2cc   :  { %v2286_v2 = vsel %vm78_vm12, %v4458_v61, %v4659_v27 }
 0x2cd   :  { %v1988_v31 = vpop.permute.xlu0 %1987 }
 0x2ce   :  { %v2332_v60 = vsel %vm1205_vm8, %v2316_v40, %v1988_v31 }
 0x2cf   :  { %v4663_v39 = vpop.permute.xlu1 %1865  ;;  %v2349_v42 = vsel %vm2340_vm2, %v2332_v60, %v2052_v28 }
 0x2d0   :  { %v2365_v23 = vsel %vm1265_vm11, %v2349_v42, %v2116_v50  ;;  %v2302_v13 = vsel %vm1154_vm5, %v2286_v2, %v4663_v39 }
 0x2d1   :  { %v1928_v20 = vpop.permute.xlu0 %1927 }
 0x2d2   :  { %v2318_v24 = vsel %vm2307_vm1, %v2301_v51, %v1928_v20 }
 0x2d3   :  { %v4671_v45 = vpop.permute.xlu1 %1929 }
 0x2d4   :  { %v2319_v20 = vsel %vm2307_vm1, %v2302_v13, %v4671_v45 }
 0x2d5   :  { %v2118_v59 = vpop.permute.xlu0 %2117 }
 0x2d6   :  { %v2366_v3 = vsel %vm1265_vm11, %v2350_v52, %v2118_v59 }
 0x2d7   :  { %v2166_v9 = vpop.permute.xlu1 %2165 }
 0x2d8   :  { %v2375_v15 = vsel %vm2373_vm4, %v2358_v10, %v2166_v9 }
 0x2d9   :  { %v2180_v17 = vpop.permute.xlu0 %2179 }
 0x2da   :  { %v2382_v57 = vsel %vm2373_vm4, %v2365_v23, %v2180_v17 }
 0x2db   :  { %v2228_v53 = vpop.permute.xlu1 %2227 }
 0x2dc   :  { %v2391_v6 = vsel %vm2390_vm3, %v2374_v0, %v2228_v53 }
 0x2dd   :  { %2980 = vmatprep.mubr.msk.f32.mxu0 %vm2421_vm6, %v2391_v6  ;;  %v1992_v36 = vpop.permute.xlu0 %1991 }
 0x2de   :  { %v2334_v59 = vsel %vm1205_vm8, %v2318_v24, %v1992_v36 }
 0x2df   :  { %v4691_v4 = vpop.permute.xlu1 %1803 }
 0x2e0   :  { %v2287_v42 = vsel %vm78_vm12, %v4462_v63, %v4691_v4 }
 0x2e1   :  { %v2182_v30 = vpop.permute.xlu0 %2181 }
 0x2e2   :  { %v2383_v34 = vsel %vm2373_vm4, %v2366_v3, %v2182_v30 }
 0x2e3   :  { %v2056_v33 = vpop.permute.xlu1 %2055 }
 0x2e4   :  { %v2351_v8 = vsel %vm2340_vm2, %v2334_v59, %v2056_v33 }
 0x2e5   :  { %v2244_v58 = vpop.permute.xlu0 %2243 }
 0x2e6   :  { %v2399_v32 = vsel %vm2390_vm3, %v2382_v57, %v2244_v58 }
 0x2e7   :  { %v2246_v55 = vpop.permute.xlu1 %2245  ;;  %2992 = vmatprep.mubr.msk.f32.mxu1 %vm2421_vm6, %v2399_v32 }
 0x2e8   :  { %v2400_v43 = vsel %vm2390_vm3, %v2383_v34, %v2246_v55 }
 0x2e9   :  { %2993 = vmatmul.mubr.msk.f32.gmra.mxu1 %vm2421_vm6, %v2400_v43  ;;  %v1994_v18 = vpop.permute.xlu0 %1993 }
 0x2ea   :  { %v2335_v53 = vsel %vm1205_vm8, %v2319_v20, %v1994_v18 }
 0x2eb   :  { %v1868_v50 = vpop.permute.xlu1 %1867 }
 0x2ec   :  { %v2303_v30 = vsel %vm1154_vm5, %v2287_v42, %v1868_v50 }
 0x2ed   :  { %v2230_v28 = vpop.permute.xlu0 %2229 }
 0x2ee   :  { %v2392_v26 = vsel %vm2390_vm3, %v2375_v15, %v2230_v28 }
 0x2ef   :  { %v2120_v56 = vpop.permute.xlu1 %2119  ;;  %2981 = vmatmul.mubr.msk.f32.vlgmr.msra.gmra.mxu0 %vm2421_vm6, %v2392_v26 }
 0x2f0   :  { %v2367_v9 = vsel %vm1265_vm11, %v2351_v8, %v2120_v56 }
 0x2f1   :  { %v1806_v7 = vpop.permute.xlu0 %1805 }
 0x2f2   :  { %v2288_v55 = vsel %vm78_vm12, %v4541_v48, %v1806_v7 }
 0x2f3   :  { %v1932_v5 = vpop.permute.xlu1 %1931 }
 0x2f4   :  { %v2320_v41 = vsel %vm2307_vm1, %v2303_v30, %v1932_v5 }
 0x2f5   :  { %v2058_v31 = vpop.permute.xlu0 %2057 }
 0x2f6   :  { %v2352_v22 = vsel %vm2340_vm2, %v2335_v53, %v2058_v31 }
 0x2f7   :  { %v2184_v19 = vpop.permute.xlu1 %2183 }
 0x2f8   :  { %v2384_v16 = vsel %vm2373_vm4, %v2367_v9, %v2184_v19 }
 0x2f9   :  { %v1870_v46 = vpop.permute.xlu0 %1869 }
 0x2fa   :  { %v2304_v38 = vsel %vm1154_vm5, %v2288_v55, %v1870_v46 }
 0x2fb   :  { %v1996_v54 = vpop.permute.xlu1 %1995 }
 0x2fc   :  { %v2336_v33 = vsel %vm1205_vm8, %v2320_v41, %v1996_v54 }
 0x2fd   :  { %v2122_v35 = vpop.permute.xlu0 %2121 }
 0x2fe   :  { %v2368_v6 = vsel %vm1265_vm11, %v2352_v22, %v2122_v35 }
 0x2ff   :  { %v2248_v17 = vpop.permute.xlu1 %2247 }
 0x300   :  { %v2401_v29 = vsel %vm2390_vm3, %v2384_v16, %v2248_v17 }
 0x301   :  { %2995 = vmatprep.mubr.msk.f32.mxu1 %vm2421_vm6, %v2401_v29  ;;  %v1934_v1 = vpop.permute.xlu0 %1933 }
 0x302   :  { %v2321_v50 = vsel %vm2307_vm1, %v2304_v38, %v1934_v1 }
 0x303   :  { %v1998_v0 = vpop.permute.xlu1 %1997 }
 0x304   :  { %v2337_v10 = vsel %vm1205_vm8, %v2321_v50, %v1998_v0 }
 0x305   :  { %v2186_v14 = vpop.permute.xlu0 %2185 }
 0x306   :  { %v2385_v40 = vsel %vm2373_vm4, %v2368_v6, %v2186_v14 }
 0x307   :  { %v2250_v61 = vpop.permute.xlu1 %2249 }
 0x308   :  { %v2402_v27 = vsel %vm2390_vm3, %v2385_v40, %v2250_v61 }
 0x309   :  { %2996 = vmatmul.mubr.msk.f32.gmra.mxu1 %vm2421_vm6, %v2402_v27  ;;  %v1808_v39 = vpop.permute.xlu0 %1807 }
 0x30a   :  { %v2289_v7 = vsel %vm78_vm12, %v4576_v21, %v1808_v39 }
 0x30b   :  { %v1872_v36 = vpop.permute.xlu1 %1871 }
 0x30c   :  { %v2305_v54 = vsel %vm1154_vm5, %v2289_v7, %v1872_v36 }
 0x30d   :  { %v2060_v12 = vpop.permute.xlu0 %2059 }
 0x30e   :  { %v2353_v23 = vsel %vm2340_vm2, %v2336_v33, %v2060_v12 }
 0x30f   :  { %v2124_v60 = vpop.permute.xlu1 %2123 }
 0x310   :  { %v2369_v3 = vsel %vm1265_vm11, %v2353_v23, %v2124_v60 }
 0x311   :  { %v1810_v45 = vpop.permute.xlu0 %1809 }
 0x312   :  { %v2290_v48 = vsel %vm78_vm12, %v4592_v25, %v1810_v45 }
 0x313   :  { %v1936_v47 = vpop.permute.xlu1 %1935 }
 0x314   :  { %v2322_v59 = vsel %vm2307_vm1, %v2305_v54, %v1936_v47 }
 0x315   :  { %v2062_v49 = vpop.permute.xlu0 %2061 }
 0x316   :  { %v2354_v15 = vsel %vm2340_vm2, %v2337_v10, %v2062_v49 }
 0x317   :  { %v2188_v11 = vpop.permute.xlu1 %2187 }
 0x318   :  { %v2386_v58 = vsel %vm2373_vm4, %v2369_v3, %v2188_v11 }
 0x319   :  { %v1874_v52 = vpop.permute.xlu0 %1873 }
 0x31a   :  { %v2306_v19 = vsel %vm1154_vm5, %v2290_v48, %v1874_v52  ;;  %vm2684_vm5 = vcmask 519168  }
 0x31b   :  { %v2000_v44 = vpop.permute.xlu1 %1999 }
 0x31c   :  { %v2338_v9 = vsel %vm1205_vm8, %v2322_v59, %v2000_v44 }
 0x31d   :  { %v2126_v57 = vpop.permute.xlu0 %2125 }
 0x31e   :  { %v2370_v28 = vsel %vm1265_vm11, %v2354_v15, %v2126_v57 }
 0x31f   :  { %v2252_v34 = vpop.permute.xlu1 %2251 }
 0x320   :  { %v2403_v32 = vsel %vm2390_vm3, %v2386_v58, %v2252_v34 }
 0x321   :  { %2998 = vmatprep.mubr.msk.f32.mxu1 %vm2421_vm6, %v2403_v32  ;;  %v1938_v63 = vpop.permute.xlu0 %1937 }
 0x322   :  { %v2323_v51 = vsel %vm2307_vm1, %v2306_v19, %v1938_v63 }
 0x323   :  { %v2064_v4 = vpop.permute.xlu1 %2063 }
 0x324   :  { %v2355_v35 = vsel %vm2340_vm2, %v2338_v9, %v2064_v4 }
 0x325   :  { %v2190_v43 = vpop.permute.xlu0 %2189 }
 0x326   :  { %v2387_v56 = vsel %vm2373_vm4, %v2370_v28, %v2190_v43 }
 0x327   :  { %v2066_v18 = vpop.permute.xlu1 %2065 }
 0x329   :  { %v2002_v62 = vpop.permute.xlu0 %2001 }
 0x32a   :  { %v2339_v24 = vsel %vm1205_vm8, %v2323_v51, %v2002_v62 }
 0x32b   :  { %v2130_v26 = vpop.permute.xlu1 %2129  ;;  %v2356_v25 = vsel %vm2340_vm2, %v2339_v24, %v2066_v18 }
 0x32c   :  { %v2372_v17 = vsel %vm1265_vm11, %v2356_v25, %v2130_v26 }
 0x32d   :  { %v2254_v5 = vpop.permute.xlu0 %2253 }
 0x32e   :  { %v2404_v31 = vsel %vm2390_vm3, %v2387_v56, %v2254_v5 }
 0x32f   :  { %2999 = vmatmul.mubr.msk.f32.gmra.mxu1 %vm2421_vm6, %v2404_v31  ;;  %v2194_v46 = vpop.permute.xlu1 %2193 }
 0x330   :  { %v2389_v13 = vsel %vm2373_vm4, %v2372_v17, %v2194_v46 }
 0x331   :  { %v2128_v37 = vpop.permute.xlu0 %2127 }
 0x332   :  { %v2371_v21 = vsel %vm1265_vm11, %v2355_v35, %v2128_v37 }
 0x333   :  { %v2258_v16 = vpop.permute.xlu1 %2257 }
 0x334   :  { %v2406_v20 = vsel %vm2390_vm3, %v2389_v13, %v2258_v16 }
 0x335   :  { %v2192_v8 = vpop.permute.xlu0 %2191 }
 0x336   :  { %v2388_v29 = vsel %vm2373_vm4, %v2371_v21, %v2192_v8 }
 0x339   :  { %v2256_v2 = vpop.permute.xlu0 %2255 }
 0x33a   :  { %v2405_v1 = vsel %vm2390_vm3, %v2388_v29, %v2256_v2 }
 0x33b   :  { %3001 = vmatprep.mubr.msk.f32.mxu1 %vm2421_vm6, %v2405_v1 }
 0x33c   :  { %3002 = vmatmul.mubr.msk.f32.gmra.mxu1 %vm2421_vm6, %v2406_v20 }
 0x350   :  { %v2985_v0 = vpop.f32.mrf.mxu1 }
 0x352   :  { %v2550_v53 = vpop.f32.mrf.mxu1 }
 0x36f   :  { %v2988_v22 = vpop.f32.mrf.mxu1 }
 0x371   :  { %v2560_v6 = vpop.f32.mrf.mxu1 }
 0x373   :  { %v2991_v14 = vpop.f32.mrf.mxu1 }
 0x375   :  { %v2570_v40 = vpop.f32.mrf.mxu1 }
 0x3a9   :  { %v2994_v61 = vpop.f32.mrf.mxu1 }
 0x3ab   :  { %v2580_v27 = vpop.f32.mrf.mxu1 }
 0x3ac   :  { %2651 = vxpose.xlu1.b32.start [1/8] (short) (narrow) %v2580_v27, 16 }
 0x3af   :  { %v2982_v39 = vpop.f32.mrf.mxu0 }
 0x3b0   :  { %2652 = vxpose.xlu1.b32.cont [2/8] (short) (narrow) %v2994_v61, 16 }
 0x3b1   :  { %v2540_v36 = vpop.f32.mrf.mxu0 }
 0x3b2   :  { %2619 = vxpose.xlu0.b32.start [1/8] (short) (narrow) %v2540_v36, 16 }
 0x3b6   :  { %2620 = vxpose.xlu0.b32.cont [2/8] (short) (narrow) %v2982_v39, 16 }
 0x3ba   :  { %2621 = vxpose.xlu0.b32.cont [3/8] (short) (narrow) %v2550_v53, 16 }
 0x3be   :  { %2622 = vxpose.xlu0.b32.cont [4/8] (short) (narrow) %v2985_v0, 16 }
 0x3c2   :  { %2623 = vxpose.xlu0.b32.cont [5/8] (short) (narrow) %v2560_v6, 16 }
 0x3c6   :  { %2624 = vxpose.xlu0.b32.cont [6/8] (short) (narrow) %v2988_v22, 16 }
 0x3c9   :  { %v2997_v12 = vpop.f32.mrf.mxu1 }
 0x3ca   :  { %2625 = vxpose.xlu0.b32.cont [7/8] (short) (narrow) %v2570_v40, 16 }
 0x3cb   :  { %v2590_v60 = vpop.f32.mrf.mxu1 }
 0x3cc   :  { %2653 = vxpose.xlu1.b32.cont [3/8] (short) (narrow) %v2590_v60, 16 }
 0x3ce   :  { %2626 = vxpose.xlu0.b32.end [8/8] (short) (narrow) %v2991_v14, 16 }
 0x3d0   :  { %2654 = vxpose.xlu1.b32.cont [4/8] (short) (narrow) %v2997_v12, 16 }
 0x3ef   :  { %v3000_v45 = vpop.f32.mrf.mxu1 }
 0x3f1   :  { %v2600_v47 = vpop.f32.mrf.mxu1 }
 0x3f2   :  { %2655 = vxpose.xlu1.b32.cont [5/8] (short) (narrow) %v2600_v47, 16 }
 0x3f6   :  { %2656 = vxpose.xlu1.b32.cont [6/8] (short) (narrow) %v3000_v45, 16 }
 0x3fc   :  { %v3003_v49 = vpop.f32.mrf.mxu1 }
 0x3fe   :  { %v2610_v42 = vpop.f32.mrf.mxu1 }
 0x3ff   :  { %2657 = vxpose.xlu1.b32.cont [7/8] (short) (narrow) %v2610_v42, 16 }
 0x403   :  { %2658 = vxpose.xlu1.b32.end [8/8] (short) (narrow) %v3003_v49, 16 }
 0x42e   :  { %v2635_v11 = vpop.trf.xlu0 }
 0x42f   :  { %2683 = vst.msk [vmem:[%s4806_s7] sm:$0xff] %vm1239_vm10, %v2635_v11 }
 0x432   :  { %v2636_v30 = vpop.trf.xlu0 }
 0x433   :  { %2685 = vst.msk [vmem:[%s4806_s7 + $0x8] sm:$0xf] %vm2684_vm5, %v2636_v30 }
 0x463   :  { %v2667_v41 = vpop.trf.xlu1 }
 0x464   :  { %2686 = vst.msk [vmem:[%s4806_s7 + $0x10] sm:$0xff] %vm1239_vm10, %v2667_v41 }
 0x467   :  { %v2668_v33 = vpop.trf.xlu1 }
 0x468   :  { %2687 = vst.msk [vmem:[%s4806_s7 + $0x18] sm:$0xf] %vm2684_vm5, %v2668_v33 }

</bundles_post_ra>
